<compile_context>
chip_gen: v5e
topology: v5e:2x2
jax: 0.10.0
libtpu: 0.0.40
codegen_flags: <defaults>
</compile_context>

<pallas_src>
import functools

import jax
import jax.numpy as jnp
from jax.experimental import pallas as pl
from jax.experimental.pallas import tpu as pltpu

LANES = 128


def _lrelu(v):
    # LeakyReLU(0.2)
    return jnp.where(v > 0, v, 0.2 * v)


def _round_up(n, m):
    return ((n + m - 1) // m) * m


def _slab_layout(cfg):
    """Ordered segments (name, rows, in-kernel read cols) + 8-aligned row offsets."""
    D = cfg["dim_in"] * cfg["dim_out"]
    He = cfg["enc_dim_hidden"]
    L = cfg["latent_size"]
    Hf = cfg["film_dim_hidden"]
    Hs = cfg["siren_dim_hidden"]
    segs = [("w_e0", D, He)]
    segs += [(f"w_eh{i}", He, He) for i in range(cfg["enc_n_hidden"])]
    segs += [("w_mulv", He, 2 * L), ("w_f0", L, Hf)]
    segs += [(f"w_fh{i}", Hf, Hf) for i in range(cfg["film_n_hidden"])]
    segs += [("w_gb", Hf, 2 * Hs), ("w_s0", 1, Hs)]
    segs += [(f"w_sh{i}", Hs, Hs) for i in range(cfg["siren_n_hidden"] - 1)]
    # Final-layer weight/bias are read at the full 128 lanes (zero padded) so the
    # reconstruction store is a full-lane unmasked store.
    segs += [("w_sl", Hs, LANES)]
    segs += [("b_e0", 1, He)]
    segs += [(f"b_eh{i}", 1, He) for i in range(cfg["enc_n_hidden"])]
    segs += [("b_mulv", 1, 2 * L), ("b_f0", 1, Hf)]
    segs += [(f"b_fh{i}", 1, Hf) for i in range(cfg["film_n_hidden"])]
    segs += [("b_gb", 1, 2 * Hs), ("b_s0", 1, Hs)]
    segs += [(f"b_sh{i}", 1, Hs) for i in range(cfg["siren_n_hidden"] - 1)]
    segs += [("b_sl", 1, LANES)]
    assert max(c for _, _, c in segs) <= LANES, "feature widths must fit 128 lanes"
    offsets, off = {}, 0
    for name, rows, cols in segs:
        offsets[name] = (off, rows, cols)
        off += _round_up(rows, 8)
    return segs, offsets, off


def _pack_slab(segs, named, total_rows):
    """Pack every weight/bias into one (total_rows, 128) f32 slab, 8-row aligned."""
    blocks = []
    for name, _, _ in segs:
        a = jnp.asarray(named[name], jnp.float32)
        if a.ndim == 1:
            a = a[None, :]
        r, c = a.shape
        blocks.append(jnp.pad(a, ((0, _round_up(r, 8) - r), (0, LANES - c))))
    slab = jnp.concatenate(blocks, axis=0)
    assert slab.shape == (total_rows, LANES)
    return slab


def beta_vae_kernel(*refs, cfg, B, T, use_reparam, offsets, bt_pad):
    f32 = jnp.float32
    it = iter(refs)
    x_ref = next(it)                 # (B, nz*nvar)
    tau_ref = next(it)               # (B*T, 1)
    eps_ref = next(it) if use_reparam else None
    slab_ref = next(it)              # (total_rows, 128) packed weights + biases
    out_ref = next(it)               # (bt_pad + 8, 128) output slab

    def seg(name):
        off, rows, cols = offsets[name]
        return slab_ref[off:off + rows, :cols]   # static tile-aligned slice -> cheap load

    L = cfg["latent_size"]
    Hs = cfg["siren_dim_hidden"]

    # ---------------- encoder MLP ----------------
    h = _lrelu(jnp.dot(x_ref[...], seg("w_e0"), preferred_element_type=f32) + seg("b_e0"))
    for i in range(cfg["enc_n_hidden"]):
        h = _lrelu(jnp.dot(h, seg(f"w_eh{i}"), preferred_element_type=f32)
                   + seg(f"b_eh{i}"))

    # fused mu / logvar head: one (He, 2L) matmul
    mulv = jnp.dot(h, seg("w_mulv"), preferred_element_type=f32) + seg("b_mulv")  # (B, 2L)
    mu = mulv[:, :L]
    logvar = mulv[:, L:]

    # ---------------- reparameterize (the module gates on beta == 0) ----------------
    if use_reparam:
        z = mu + eps_ref[...] * jnp.exp(0.5 * logvar)
    else:
        z = mu

    # [mu | logvar | z] goes into the tail rows of the output slab; mulv is already
    # lane-contiguous so no concatenate is needed -- just two small sliced stores.
    out_ref[bt_pad:bt_pad + B, :2 * L] = mulv
    out_ref[bt_pad:bt_pad + B, 2 * L:3 * L] = z

    # ---------------- FiLM mapping network (fused gamma/beta head) ----------------
    f = _lrelu(jnp.dot(z, seg("w_f0"), preferred_element_type=f32) + seg("b_f0"))
    for i in range(cfg["film_n_hidden"]):
        f = _lrelu(jnp.dot(f, seg(f"w_fh{i}"), preferred_element_type=f32)
                   + seg(f"b_fh{i}"))
    gb = jnp.dot(f, seg("w_gb"), preferred_element_type=f32) + seg("b_gb")        # (B, 2Hs)
    gamma = gb[:, :Hs]
    fbeta = gb[:, Hs:]

    # Broadcast FiLM params to (B*T, Hs) ONCE (hoisted out of the SIREN layer loop).
    g_bt = jnp.broadcast_to(gamma[:, None, :], (B, T, Hs)).reshape(B * T, Hs)
    b_bt = jnp.broadcast_to(fbeta[:, None, :], (B, T, Hs)).reshape(B * T, Hs)

    # ---------------- FiLM-modulated SIREN decoder, batch-folded over B*T rows ----------------
    # TODO(synk): siren.MappingNetwork / siren.SirenNet source was not provided; assumed
    # semantics: layer -> sin(w0 * (x @ W + b)) then FiLM x = gamma*x + beta, with
    # w0 = w0_initial on the first layer, 1.0 on hidden layers, plain Linear final layer.
    s = jnp.sin(cfg["siren_w0"] * (tau_ref[...] * seg("w_s0") + seg("b_s0")))     # (B*T, Hs)
    s = g_bt * s + b_bt
    for i in range(cfg["siren_n_hidden"] - 1):
        s = jnp.sin(jnp.dot(s, seg(f"w_sh{i}"), preferred_element_type=f32)
                    + seg(f"b_sh{i}"))
        s = g_bt * s + b_bt
    # Final layer is zero-padded to 128 output lanes -> single full-lane unmasked store.
    out_ref[0:B * T, :] = (jnp.dot(s, seg("w_sl"), preferred_element_type=f32)
                           + seg("b_sl"))


def beta_vae_forward(params, x, tau, eps, cfg):
    (w_e0, b_e0, w_eh, b_eh, w_mu, b_mu, w_lv, b_lv,
     w_f0, b_f0, w_fh, b_fh, w_g, b_g, w_be, b_be,
     w_s0, b_s0, w_sh, b_sh, w_sl, b_sl) = params

    B, nz, nvar = x.shape
    T = tau.shape[1]
    D = nz * nvar
    He = cfg["enc_dim_hidden"]
    L = cfg["latent_size"]
    Hf = cfg["film_dim_hidden"]
    Hs = cfg["siren_dim_hidden"]
    use_reparam = (cfg["beta"] != 0)

    # exact PyTorch encode() preprocessing: permute(0, 2, 1).reshape(-1, nz*nvar)
    xf = jnp.transpose(x, (0, 2, 1)).reshape(B, D)
    tau_flat = tau.reshape(B * T, 1)

    # ---- wrapper-side packing: fused heads + ONE (rows, 128) slab -> one input DMA ----
    named = {
        "w_e0": w_e0, "w_mulv": jnp.concatenate([w_mu, w_lv], axis=1),
        "w_f0": w_f0, "w_gb": jnp.concatenate([w_g, w_be], axis=1),
        "w_s0": w_s0, "w_sl": w_sl,
        "b_e0": b_e0, "b_mulv": jnp.concatenate([b_mu, b_lv]),
        "b_f0": b_f0, "b_gb": jnp.concatenate([b_g, b_be]),
        "b_s0": b_s0, "b_sl": b_sl,
    }
    for i in range(cfg["enc_n_hidden"]):
        named[f"w_eh{i}"] = w_eh[i]
        named[f"b_eh{i}"] = b_eh[i]
    for i in range(cfg["film_n_hidden"]):
        named[f"w_fh{i}"] = w_fh[i]
        named[f"b_fh{i}"] = b_fh[i]
    for i in range(cfg["siren_n_hidden"] - 1):
        named[f"w_sh{i}"] = w_sh[i]
        named[f"b_sh{i}"] = b_sh[i]

    segs, offsets, total_rows = _slab_layout(cfg)
    slab = _pack_slab(segs, named, total_rows)

    bt_pad = _round_up(B * T, 8)
    out_rows = bt_pad + 8

    kernel = functools.partial(
        beta_vae_kernel, cfg=cfg, B=B, T=T,
        use_reparam=use_reparam, offsets=offsets, bt_pad=bt_pad)

    args = [xf, tau_flat]
    if use_reparam:
        args.append(eps)             # eps only DMA'd when actually used
    args.append(slab)

    # Advisory scheduling hint for XLA (tiny latency-bound custom call).
    n_sh = cfg["siren_n_hidden"]
    flops = 2 * (B * D * He
                 + cfg["enc_n_hidden"] * B * He * He
                 + B * He * 2 * L
                 + B * L * Hf
                 + cfg["film_n_hidden"] * B * Hf * Hf
                 + B * Hf * 2 * Hs
                 + B * T * Hs
                 + (n_sh - 1) * B * T * Hs * Hs
                 + B * T * Hs * LANES)
    transcendentals = B * T * Hs * n_sh + B * L
    bytes_accessed = 4 * (xf.size + tau_flat.size
                          + (eps.size if use_reparam else 0)
                          + slab.size + out_rows * LANES)

    out = pl.pallas_call(
        kernel,
        out_shape=jax.ShapeDtypeStruct((out_rows, LANES), jnp.float32),
        in_specs=[pl.BlockSpec(memory_space=pltpu.MemorySpace.VMEM) for _ in args],
        out_specs=pl.BlockSpec(memory_space=pltpu.MemorySpace.VMEM),
        cost_estimate=pl.CostEstimate(flops=flops,
                                      transcendentals=transcendentals,
                                      bytes_accessed=bytes_accessed),
    )(*args)

    recon = out[:B * T, :nvar].reshape(B, T, nvar)
    tail = out[bt_pad:bt_pad + B]
    mu_o = tail[:, :L]
    logvar_o = tail[:, L:2 * L]
    z_o = tail[:, 2 * L:3 * L]
    return recon, z_o, mu_o, logvar_o


# ---------------- deterministic parameter init (synthetic, matches module shapes) ----------------
def init_params(key, cfg):
    D = cfg["dim_in"] * cfg["dim_out"]
    He = cfg["enc_dim_hidden"]
    L = cfg["latent_size"]
    Hf = cfg["film_dim_hidden"]
    Hs = cfg["siren_dim_hidden"]
    nvar = cfg["dim_out"]
    w0 = cfg["siren_w0"]

    keys = iter(jax.random.split(key, 64))

    def kaiming(fi, fo):
        # kaiming_normal_ (fan_in, gain=sqrt(2)), bias = 0, stored as (in, out) for x @ W
        w = jax.random.normal(next(keys), (fi, fo), jnp.float32) * jnp.sqrt(2.0 / fi)
        return w, jnp.zeros((fo,), jnp.float32)

    def siren_lin(fi, fo, w0_layer, first):
        bound = (1.0 / fi) if first else ((6.0 / fi) ** 0.5 / w0_layer)
        k1, k2 = jax.random.split(next(keys))
        w = jax.random.uniform(k1, (fi, fo), jnp.float32, -bound, bound)
        b = jax.random.uniform(k2, (fo,), jnp.float32, -bound, bound)
        return w, b

    # encoder
    w_e0, b_e0 = kaiming(D, He)
    enc_h = [kaiming(He, He) for _ in range(cfg["enc_n_hidden"])]
    w_eh = jnp.stack([w for w, _ in enc_h])
    b_eh = jnp.stack([b for _, b in enc_h])
    w_mu, b_mu = kaiming(He, L)
    w_lv, b_lv = kaiming(He, L)

    # FiLM mapping network
    w_f0, b_f0 = kaiming(L, Hf)
    film_h = [kaiming(Hf, Hf) for _ in range(cfg["film_n_hidden"])]
    w_fh = jnp.stack([w for w, _ in film_h])
    b_fh = jnp.stack([b for _, b in film_h])
    w_g, b_g = kaiming(Hf, Hs)
    w_be, b_be = kaiming(Hf, Hs)

    # SIREN decoder
    w_s0, b_s0 = siren_lin(1, Hs, w0, first=True)
    sir_h = [siren_lin(Hs, Hs, 1.0, first=False) for _ in range(cfg["siren_n_hidden"] - 1)]
    w_sh = jnp.stack([w for w, _ in sir_h])
    b_sh = jnp.stack([b for _, b in sir_h])
    w_sl, b_sl = siren_lin(Hs, nvar, 1.0, first=False)

    return (w_e0, b_e0, w_eh, b_eh, w_mu, b_mu, w_lv, b_lv,
            w_f0, b_f0, w_fh, b_fh, w_g, b_g, w_be, b_be,
            w_s0, b_s0, w_sh, b_sh, w_sl, b_sl)


# ---------------- pure-JAX reference for sanity checking ----------------
def beta_vae_reference(params, x, tau, eps, cfg):
    (w_e0, b_e0, w_eh, b_eh, w_mu, b_mu, w_lv, b_lv,
     w_f0, b_f0, w_fh, b_fh, w_g, b_g, w_be, b_be,
     w_s0, b_s0, w_sh, b_sh, w_sl, b_sl) = params
    B, nz, nvar = x.shape
    xf = jnp.transpose(x, (0, 2, 1)).reshape(B, nz * nvar)
    h = _lrelu(xf @ w_e0 + b_e0)
    for i in range(cfg["enc_n_hidden"]):
        h = _lrelu(h @ w_eh[i] + b_eh[i])
    mu = h @ w_mu + b_mu
    logvar = h @ w_lv + b_lv
    z = mu + eps * jnp.exp(0.5 * logvar) if cfg["beta"] != 0 else mu
    f = _lrelu(z @ w_f0 + b_f0)
    for i in range(cfg["film_n_hidden"]):
        f = _lrelu(f @ w_fh[i] + b_fh[i])
    gamma = f @ w_g + b_g
    fbeta = f @ w_be + b_be
    s = jnp.sin(cfg["siren_w0"] * (tau * w_s0[0] + b_s0))            # (B, T, Hs)
    s = gamma[:, None, :] * s + fbeta[:, None, :]
    for i in range(cfg["siren_n_hidden"] - 1):
        s = jnp.sin(1.0 * (jnp.einsum("btd,de->bte", s, w_sh[i]) + b_sh[i]))
        s = gamma[:, None, :] * s + fbeta[:, None, :]
    out = jnp.einsum("btd,de->bte", s, w_sl) + b_sl
    return out, z, mu, logvar


if __name__ == "__main__":
    cfg = dict(dim_in=8, dim_out=4, enc_n_hidden=1, enc_dim_hidden=32,
               latent_size=8, siren_n_hidden=3, siren_dim_hidden=32,
               siren_w0=30.0, film_n_hidden=1, film_dim_hidden=32, beta=1.0)
    B, T = 2, 16

    key = jax.random.PRNGKey(0)
    kx, kt, ke, kp = jax.random.split(key, 4)
    x = jax.random.normal(kx, (B, cfg["dim_in"], cfg["dim_out"]), jnp.float32)
    tau = jax.random.uniform(kt, (B, T, 1), jnp.float32, -1.0, 1.0)
    # torch.randn_like(std) equivalent: noise generated deterministically here, passed in.
    eps = jax.random.normal(ke, (B, cfg["latent_size"]), jnp.float32)
    params = init_params(kp, cfg)

    out, z, mu, logvar = beta_vae_forward(params, x, tau, eps, cfg)
    jax.block_until_ready((out, z, mu, logvar))

    out_r, z_r, mu_r, logvar_r = beta_vae_reference(params, x, tau, eps, cfg)
    assert out.shape == (B, T, cfg["dim_out"])
    assert z.shape == mu.shape == logvar.shape == (B, cfg["latent_size"])
    for a, b in ((out, out_r), (z, z_r), (mu, mu_r), (logvar, logvar_r)):
        assert jnp.allclose(a, b, rtol=1e-3, atol=1e-3), "mismatch vs reference"

    print("KERNEL_OK")
</pallas_src>

<mosaic_0001>
module attributes {stable_mosaic.version = 11 : i64} {
  func.func @beta_vae_kernel(%arg0: memref<2x32xf32, #tpu.memory_space<vmem>>, %arg1: memref<32x1xf32, #tpu.memory_space<vmem>>, %arg2: memref<2x8xf32, #tpu.memory_space<vmem>>, %arg3: memref<352x128xf32, #tpu.memory_space<vmem>>, %arg4: memref<40x128xf32, #tpu.memory_space<vmem>>) attributes {dimension_semantics = [], scalar_prefetch = 0 : i64, scratch_operands = 0 : i64, tpu.core_type = #tpu.core_type<tc>} {
    %c0 = arith.constant 0 : index
    %c0_0 = arith.constant 0 : index
    %0 = vector.load %arg0[%c0, %c0_0] : memref<2x32xf32, #tpu.memory_space<vmem>>, vector<2x32xf32>
    %c0_1 = arith.constant 0 : index
    %c0_2 = arith.constant 0 : index
    %1 = vector.load %arg3[%c0_1, %c0_2] : memref<352x128xf32, #tpu.memory_space<vmem>>, vector<32x32xf32>
    %cst = arith.constant dense<0.000000e+00> : vector<2x32xf32>
    %2 = tpu.matmul %0, %1, %cst {dimension_numbers = #tpu.dot_dimension_numbers<[1], [0], [0], [1], [0, 0, 1, 1], [], []>} : vector<2x32xf32>, vector<32x32xf32>, vector<2x32xf32> -> vector<2x32xf32>
    %c272 = arith.constant 272 : index
    %c0_3 = arith.constant 0 : index
    %3 = vector.load %arg3[%c272, %c0_3] : memref<352x128xf32, #tpu.memory_space<vmem>>, vector<1x32xf32>
    %4 = vector.broadcast %3 : vector<1x32xf32> to vector<2x32xf32>
    %5 = arith.addf %2, %4 : vector<2x32xf32>
    %cst_4 = arith.constant 0.000000e+00 : f32
    %6 = vector.broadcast %cst_4 : f32 to vector<2x32xf32>
    %7 = arith.cmpf ogt, %5, %6 : vector<2x32xf32>
    %cst_5 = arith.constant 2.000000e-01 : f32
    %8 = vector.broadcast %cst_5 : f32 to vector<2x32xf32>
    %9 = arith.mulf %8, %5 : vector<2x32xf32>
    %10 = arith.select %7, %5, %9 : vector<2x32xi1>, vector<2x32xf32>
    %c32 = arith.constant 32 : index
    %c0_6 = arith.constant 0 : index
    %11 = vector.load %arg3[%c32, %c0_6] : memref<352x128xf32, #tpu.memory_space<vmem>>, vector<32x32xf32>
    %cst_7 = arith.constant dense<0.000000e+00> : vector<2x32xf32>
    %12 = tpu.matmul %10, %11, %cst_7 {dimension_numbers = #tpu.dot_dimension_numbers<[1], [0], [0], [1], [0, 0, 1, 1], [], []>} : vector<2x32xf32>, vector<32x32xf32>, vector<2x32xf32> -> vector<2x32xf32>
    %c280 = arith.constant 280 : index
    %c0_8 = arith.constant 0 : index
    %13 = vector.load %arg3[%c280, %c0_8] : memref<352x128xf32, #tpu.memory_space<vmem>>, vector<1x32xf32>
    %14 = vector.broadcast %13 : vector<1x32xf32> to vector<2x32xf32>
    %15 = arith.addf %12, %14 : vector<2x32xf32>
    %cst_9 = arith.constant 0.000000e+00 : f32
    %16 = vector.broadcast %cst_9 : f32 to vector<2x32xf32>
    %17 = arith.cmpf ogt, %15, %16 : vector<2x32xf32>
    %cst_10 = arith.constant 2.000000e-01 : f32
    %18 = vector.broadcast %cst_10 : f32 to vector<2x32xf32>
    %19 = arith.mulf %18, %15 : vector<2x32xf32>
    %20 = arith.select %17, %15, %19 : vector<2x32xi1>, vector<2x32xf32>
    %c64 = arith.constant 64 : index
    %c0_11 = arith.constant 0 : index
    %21 = vector.load %arg3[%c64, %c0_11] : memref<352x128xf32, #tpu.memory_space<vmem>>, vector<32x16xf32>
    %cst_12 = arith.constant dense<0.000000e+00> : vector<2x16xf32>
    %22 = tpu.matmul %20, %21, %cst_12 {dimension_numbers = #tpu.dot_dimension_numbers<[1], [0], [0], [1], [0, 0, 1, 1], [], []>} : vector<2x32xf32>, vector<32x16xf32>, vector<2x16xf32> -> vector<2x16xf32>
    %c288 = arith.constant 288 : index
    %c0_13 = arith.constant 0 : index
    %23 = vector.load %arg3[%c288, %c0_13] : memref<352x128xf32, #tpu.memory_space<vmem>>, vector<1x16xf32>
    %24 = vector.broadcast %23 : vector<1x16xf32> to vector<2x16xf32>
    %25 = arith.addf %22, %24 : vector<2x16xf32>
    %26 = vector.extract_strided_slice %25 {offsets = [0, 0], sizes = [2, 8], strides = [1, 1]} : vector<2x16xf32> to vector<2x8xf32>
    %27 = vector.extract_strided_slice %25 {offsets = [0, 8], sizes = [2, 8], strides = [1, 1]} : vector<2x16xf32> to vector<2x8xf32>
    %c0_14 = arith.constant 0 : index
    %c0_15 = arith.constant 0 : index
    %28 = vector.load %arg2[%c0_14, %c0_15] : memref<2x8xf32, #tpu.memory_space<vmem>>, vector<2x8xf32>
    %cst_16 = arith.constant 5.000000e-01 : f32
    %29 = vector.broadcast %cst_16 : f32 to vector<2x8xf32>
    %30 = arith.mulf %29, %27 : vector<2x8xf32>
    %31 = math.exp %30 : vector<2x8xf32>
    %32 = arith.mulf %28, %31 : vector<2x8xf32>
    %33 = arith.addf %26, %32 : vector<2x8xf32>
    %c32_17 = arith.constant 32 : index
    %c0_18 = arith.constant 0 : index
    %34 = vector.load %arg4[%c32_17, %c0_18] : memref<40x128xf32, #tpu.memory_space<vmem>>, vector<2x16xf32>
    tpu.vector_store %arg4[%c32_17, %c0_18], %25 {strides = array<i32>} : memref<40x128xf32, #tpu.memory_space<vmem>>, vector<2x16xf32>,
    %c32_19 = arith.constant 32 : index
    %c16 = arith.constant 16 : index
    %35 = vector.load %arg4[%c32_19, %c16] : memref<40x128xf32, #tpu.memory_space<vmem>>, vector<2x8xf32>
    tpu.vector_store %arg4[%c32_19, %c16], %33 {strides = array<i32>} : memref<40x128xf32, #tpu.memory_space<vmem>>, vector<2x8xf32>,
    %c96 = arith.constant 96 : index
    %c0_20 = arith.constant 0 : index
    %36 = vector.load %arg3[%c96, %c0_20] : memref<352x128xf32, #tpu.memory_space<vmem>>, vector<8x32xf32>
    %cst_21 = arith.constant dense<0.000000e+00> : vector<2x32xf32>
    %37 = tpu.matmul %33, %36, %cst_21 {dimension_numbers = #tpu.dot_dimension_numbers<[1], [0], [0], [1], [0, 0, 1, 1], [], []>} : vector<2x8xf32>, vector<8x32xf32>, vector<2x32xf32> -> vector<2x32xf32>
    %c296 = arith.constant 296 : index
    %c0_22 = arith.constant 0 : index
    %38 = vector.load %arg3[%c296, %c0_22] : memref<352x128xf32, #tpu.memory_space<vmem>>, vector<1x32xf32>
    %39 = vector.broadcast %38 : vector<1x32xf32> to vector<2x32xf32>
    %40 = arith.addf %37, %39 : vector<2x32xf32>
    %cst_23 = arith.constant 0.000000e+00 : f32
    %41 = vector.broadcast %cst_23 : f32 to vector<2x32xf32>
    %42 = arith.cmpf ogt, %40, %41 : vector<2x32xf32>
    %cst_24 = arith.constant 2.000000e-01 : f32
    %43 = vector.broadcast %cst_24 : f32 to vector<2x32xf32>
    %44 = arith.mulf %43, %40 : vector<2x32xf32>
    %45 = arith.select %42, %40, %44 : vector<2x32xi1>, vector<2x32xf32>
    %c104 = arith.constant 104 : index
    %c0_25 = arith.constant 0 : index
    %46 = vector.load %arg3[%c104, %c0_25] : memref<352x128xf32, #tpu.memory_space<vmem>>, vector<32x32xf32>
    %cst_26 = arith.constant dense<0.000000e+00> : vector<2x32xf32>
    %47 = tpu.matmul %45, %46, %cst_26 {dimension_numbers = #tpu.dot_dimension_numbers<[1], [0], [0], [1], [0, 0, 1, 1], [], []>} : vector<2x32xf32>, vector<32x32xf32>, vector<2x32xf32> -> vector<2x32xf32>
    %c304 = arith.constant 304 : index
    %c0_27 = arith.constant 0 : index
    %48 = vector.load %arg3[%c304, %c0_27] : memref<352x128xf32, #tpu.memory_space<vmem>>, vector<1x32xf32>
    %49 = vector.broadcast %48 : vector<1x32xf32> to vector<2x32xf32>
    %50 = arith.addf %47, %49 : vector<2x32xf32>
    %cst_28 = arith.constant 0.000000e+00 : f32
    %51 = vector.broadcast %cst_28 : f32 to vector<2x32xf32>
    %52 = arith.cmpf ogt, %50, %51 : vector<2x32xf32>
    %cst_29 = arith.constant 2.000000e-01 : f32
    %53 = vector.broadcast %cst_29 : f32 to vector<2x32xf32>
    %54 = arith.mulf %53, %50 : vector<2x32xf32>
    %55 = arith.select %52, %50, %54 : vector<2x32xi1>, vector<2x32xf32>
    %c136 = arith.constant 136 : index
    %c0_30 = arith.constant 0 : index
    %56 = vector.load %arg3[%c136, %c0_30] : memref<352x128xf32, #tpu.memory_space<vmem>>, vector<32x64xf32>
    %cst_31 = arith.constant dense<0.000000e+00> : vector<2x64xf32>
    %57 = tpu.matmul %55, %56, %cst_31 {dimension_numbers = #tpu.dot_dimension_numbers<[1], [0], [0], [1], [0, 0, 1, 1], [], []>} : vector<2x32xf32>, vector<32x64xf32>, vector<2x64xf32> -> vector<2x64xf32>
    %c312 = arith.constant 312 : index
    %c0_32 = arith.constant 0 : index
    %58 = vector.load %arg3[%c312, %c0_32] : memref<352x128xf32, #tpu.memory_space<vmem>>, vector<1x64xf32>
    %59 = vector.broadcast %58 : vector<1x64xf32> to vector<2x64xf32>
    %60 = arith.addf %57, %59 : vector<2x64xf32>
    %61 = vector.extract_strided_slice %60 {offsets = [0, 0], sizes = [2, 32], strides = [1, 1]} : vector<2x64xf32> to vector<2x32xf32>
    %62 = vector.extract_strided_slice %60 {offsets = [0, 32], sizes = [2, 32], strides = [1, 1]} : vector<2x64xf32> to vector<2x32xf32>
    %63 = vector.shape_cast %61 : vector<2x32xf32> to vector<2x1x32xf32>
    %64 = vector.shape_cast %63 : vector<2x1x32xf32> to vector<2x1x32xf32>
    %65 = vector.broadcast %64 : vector<2x1x32xf32> to vector<2x16x32xf32>
    %66 = vector.shape_cast %65 : vector<2x16x32xf32> to vector<32x32xf32>
    %67 = vector.shape_cast %62 : vector<2x32xf32> to vector<2x1x32xf32>
    %68 = vector.shape_cast %67 : vector<2x1x32xf32> to vector<2x1x32xf32>
    %69 = vector.broadcast %68 : vector<2x1x32xf32> to vector<2x16x32xf32>
    %70 = vector.shape_cast %69 : vector<2x16x32xf32> to vector<32x32xf32>
    %c0_33 = arith.constant 0 : index
    %c0_34 = arith.constant 0 : index
    %71 = vector.load %arg1[%c0_33, %c0_34] : memref<32x1xf32, #tpu.memory_space<vmem>>, vector<32x1xf32>
    %c168 = arith.constant 168 : index
    %c0_35 = arith.constant 0 : index
    %72 = vector.load %arg3[%c168, %c0_35] : memref<352x128xf32, #tpu.memory_space<vmem>>, vector<1x32xf32>
    %73 = vector.broadcast %71 : vector<32x1xf32> to vector<32x32xf32>
    %74 = vector.broadcast %72 : vector<1x32xf32> to vector<32x32xf32>
    %75 = arith.mulf %73, %74 : vector<32x32xf32>
    %c320 = arith.constant 320 : index
    %c0_36 = arith.constant 0 : index
    %76 = vector.load %arg3[%c320, %c0_36] : memref<352x128xf32, #tpu.memory_space<vmem>>, vector<1x32xf32>
    %77 = vector.broadcast %76 : vector<1x32xf32> to vector<32x32xf32>
    %78 = arith.addf %75, %77 : vector<32x32xf32>
    %cst_37 = arith.constant 3.000000e+01 : f32
    %79 = vector.broadcast %cst_37 : f32 to vector<32x32xf32>
    %80 = arith.mulf %79, %78 : vector<32x32xf32>
    %81 = math.sin %80 : vector<32x32xf32>
    %82 = arith.mulf %66, %81 : vector<32x32xf32>
    %83 = arith.addf %82, %70 : vector<32x32xf32>
    %c176 = arith.constant 176 : index
    %c0_38 = arith.constant 0 : index
    %84 = vector.load %arg3[%c176, %c0_38] : memref<352x128xf32, #tpu.memory_space<vmem>>, vector<32x32xf32>
    %cst_39 = arith.constant dense<0.000000e+00> : vector<32x32xf32>
    %85 = tpu.matmul %83, %84, %cst_39 {dimension_numbers = #tpu.dot_dimension_numbers<[1], [0], [0], [1], [0, 0, 1, 1], [], []>} : vector<32x32xf32>, vector<32x32xf32>, vector<32x32xf32> -> vector<32x32xf32>
    %c328 = arith.constant 328 : index
    %c0_40 = arith.constant 0 : index
    %86 = vector.load %arg3[%c328, %c0_40] : memref<352x128xf32, #tpu.memory_space<vmem>>, vector<1x32xf32>
    %87 = vector.broadcast %86 : vector<1x32xf32> to vector<32x32xf32>
    %88 = arith.addf %85, %87 : vector<32x32xf32>
    %89 = math.sin %88 : vector<32x32xf32>
    %90 = arith.mulf %66, %89 : vector<32x32xf32>
    %91 = arith.addf %90, %70 : vector<32x32xf32>
    %c208 = arith.constant 208 : index
    %c0_41 = arith.constant 0 : index
    %92 = vector.load %arg3[%c208, %c0_41] : memref<352x128xf32, #tpu.memory_space<vmem>>, vector<32x32xf32>
    %cst_42 = arith.constant dense<0.000000e+00> : vector<32x32xf32>
    %93 = tpu.matmul %91, %92, %cst_42 {dimension_numbers = #tpu.dot_dimension_numbers<[1], [0], [0], [1], [0, 0, 1, 1], [], []>} : vector<32x32xf32>, vector<32x32xf32>, vector<32x32xf32> -> vector<32x32xf32>
    %c336 = arith.constant 336 : index
    %c0_43 = arith.constant 0 : index
    %94 = vector.load %arg3[%c336, %c0_43] : memref<352x128xf32, #tpu.memory_space<vmem>>, vector<1x32xf32>
    %95 = vector.broadcast %94 : vector<1x32xf32> to vector<32x32xf32>
    %96 = arith.addf %93, %95 : vector<32x32xf32>
    %97 = math.sin %96 : vector<32x32xf32>
    %98 = arith.mulf %66, %97 : vector<32x32xf32>
    %99 = arith.addf %98, %70 : vector<32x32xf32>
    %c240 = arith.constant 240 : index
    %c0_44 = arith.constant 0 : index
    %100 = vector.load %arg3[%c240, %c0_44] : memref<352x128xf32, #tpu.memory_space<vmem>>, vector<32x128xf32>
    %cst_45 = arith.constant dense<0.000000e+00> : vector<32x128xf32>
    %101 = tpu.matmul %99, %100, %cst_45 {dimension_numbers = #tpu.dot_dimension_numbers<[1], [0], [0], [1], [0, 0, 1, 1], [], []>} : vector<32x32xf32>, vector<32x128xf32>, vector<32x128xf32> -> vector<32x128xf32>
    %c344 = arith.constant 344 : index
    %c0_46 = arith.constant 0 : index
    %102 = vector.load %arg3[%c344, %c0_46] : memref<352x128xf32, #tpu.memory_space<vmem>>, vector<1x128xf32>
    %103 = vector.broadcast %102 : vector<1x128xf32> to vector<32x128xf32>
    %104 = arith.addf %101, %103 : vector<32x128xf32>
    %c0_47 = arith.constant 0 : index
    %c0_48 = arith.constant 0 : index
    %105 = vector.load %arg4[%c0_47, %c0_48] : memref<40x128xf32, #tpu.memory_space<vmem>>, vector<32x128xf32>
    tpu.vector_store %arg4[%c0_47, %c0_48], %104 {strides = array<i32>} : memref<40x128xf32, #tpu.memory_space<vmem>>, vector<32x128xf32>,
    return
  }
}

</mosaic_0001>

<bundles_post_ra>
// kernel: tpu_custom_call.1
= control target key start
LH: loop header
LB: loop body
LE: loop exit
PB: predicated region body
PF: predicated region fallthrough
CT: control target
= control target key end

     0   :  { %9 = vsyncpa [#allocation3], 0  ;;  %s4008_s0 = inlined_call_operand.vmem [shape: f32[2,32], index: 0, kind: input, shape index: {}]   ;;  %s4009_s1 = inlined_call_operand.vmem [shape: f32[32,1], index: 1, kind: input, shape index: {}]   ;;  %s4010_s2 = inlined_call_operand.vmem [shape: f32[2,8], index: 2, kind: input, shape index: {}]   ;;  %s4011_s3 = inlined_call_operand.hbm [shape: f32[352,128], index: 3, kind: input, shape index: {}]   ;;  %s4012_s4 = inlined_call_operand.hbm [shape: f32[40,128], index: 4, kind: output, shape index: {}]  }
   0x1   :  { %10 = vsyncpa [#allocation4], 0  ;;  %s21_s17 = sshll.u32 %s4011_s3, 4  ;;  %s2473_s18 = smov [#allocation2]   ;;  %s22_s17 = int_to_ptr.hbm [resolvable:$true] %s21_s17 }
   0x2   :  { %s23_s19 = sshll.u32 %s2473_s18, 4  ;;  %s2474_s20 = smov 128   ;;  %s24_s19 = int_to_ptr.vmem [resolvable:$true] %s23_s19 }
   0x3   :  { %s2475_s21 = smov 8  }
   0x4   :  { %29 = dma.hbm_to_vmem [thread:$0]  %s22_s17, 5632, %s24_s19, [#allocation3], %s2474_s20, %s2474_s20, %s2475_s21  }
   0x5   :  { %2469 = dma.done.wait [#allocation3], 5632  }
   0x6   :  { %2470 = vsyncadd [#allocation3], 4294961664  ;;  %v38_v0 = vld [vmem:[#allocation2 + $0x18] sm:$0xff]  ;;  %v37_v1 = vld [vmem:[#allocation2 + $0x10] sm:$0xff]  ;;  %vm41_vm0 = vcmask 261120   ;;  %vm139_vm3 = vcmask 123904  }
   0x7   :  { %57 = vmatpush.msra.mxu0 %v38_v0  ;;  %v36_v2 = vld [vmem:[#allocation2 + $0x8] sm:$0xff]  ;;  %v35_v3 = vld [vmem:[#allocation2] sm:$0xff]  ;;  %v71_v5 = vld [vmem:[#allocation2 + $0x38] sm:$0xff]  ;;  %vm150_vm4 = vcmask 64512   ;;  %v4016_v40 = vmov 0   ;;  %s2485_s6 = smov 16  }
   0x8   :  { %v34_v4 = vld [vmem:[%s4008_s0] sm:$0x3]  ;;  %v70_v6 = vld [vmem:[#allocation2 + $0x30] sm:$0xff]  ;;  %v69_v7 = vld [vmem:[#allocation2 + $0x28] sm:$0xff]  ;;  %s2476_s0 = smov 120   ;;  %2406 = vset.pattern.permute.xlu1 %v4016_v40  ;;  %2405 = vset.pattern.permute.xlu0 %v4016_v40  ;;  %s2486_s7 = smov [#allocation5]  }
   0x9   :  { %58 = vmatpush.msra.mxu0 %v37_v1  ;;  %v68_v8 = vld [vmem:[#allocation2 + $0x20] sm:$0xff]  ;;  %v103_v9 = vld [vmem:[#allocation2 + $0x58] sm:$0xff]  ;;  %v2408_v10 = vld [vmem:[#allocation2 + $0x110] ss:$0 sm:$0xff]  ;;  %2407 = vset.pattern.permute.xlu2 %v4016_v40  ;;  %s2322_s8 = sshll.u32 %s2486_s7, 4  ;;  %s2324_s11 = sshll.u32 %s4012_s4, 4  ;;  %s2323_s8 = int_to_ptr.vmem [resolvable:$true] %s2322_s8  ;;  %s2325_s11 = int_to_ptr.hbm [resolvable:$true] %s2324_s11 }
   0xa   :  { %121 = vmatpush.msra.mxu2 %v103_v9  ;;  %v102_v15 = vld [vmem:[#allocation2 + $0x50] sm:$0xff]  ;;  %v101_v16 = vld [vmem:[#allocation2 + $0x48] sm:$0xff]  ;;  %v100_v17 = vld [vmem:[#allocation2 + $0x40] sm:$0xff] }
   0xb   :  { %59 = vmatpush.msra.mxu0 %v36_v2  ;;  %v2409_v18 = vld [vmem:[#allocation2 + $0x118] ss:$0 sm:$0xff]  ;;  %v2410_v23 = vld [vmem:[#allocation2 + $0x120] ss:$0 sm:$0xff]  ;;  %v177_v36 = vld [vmem:[#allocation2 + $0x70] sm:$0xff] }
   0xc   :  { %122 = vmatpush.msra.mxu2 %v102_v15  ;;  %v147_v29 = vld [vmem:[#allocation2 + $0x60] sm:$0xff]  ;;  %v178_v35 = vld [vmem:[#allocation2 + $0x78] sm:$0xff]  ;;  %v176_v37 = vld [vmem:[#allocation2 + $0x68] sm:$0xff]  ;;  %v2478_v15 = vmov 920167782  }
   0xd   :  { %60 = vmatpush.msra.mxu0 %v35_v3  ;;  %168 = vmatpush.msra.mxu3 %v147_v29  ;;  %v179_v30 = vld [vmem:[#allocation2 + $0x80] sm:$0xff]  ;;  %v244_v38 = vld [vmem:[%s4009_s1 + $0x8] sm:$0xff]  ;;  %v246_v41 = vld [vmem:[%s4009_s1 + $0x18] sm:$0xff] }
   0xe   :  { %2337 = vmatmul.msk.f32.vlgmr.msra.gmra.mxu0 %vm41_vm0, %v34_v4  ;;  %123 = vmatpush.msra.mxu2 %v101_v16  ;;  %v129_v31 = vld [vmem:[%s4010_s2] sm:$0x3]  ;;  %v245_v43 = vld [vmem:[%s4009_s1 + $0x10] sm:$0xff]  ;;  %v2411_v44 = vld [vmem:[#allocation2 + $0x128] ss:$0 sm:$0xff] }
   0xf   :  { %89 = vmatpush.msrb.mxu0 %v71_v5  ;;  %v243_v39 = vld [vmem:[%s4009_s1] sm:$0xff]  ;;  %255 = vperm.xlu1 %2406, %v244_v38   ;;  %v210_v49 = vld [vmem:[#allocation2 + $0x98] sm:$0xff]  ;;  %v209_v50 = vld [vmem:[#allocation2 + $0x90] sm:$0xff]  ;;  %s2484_s1 = smov 96  }
  0x10   :  { %124 = vmatpush.msra.mxu2 %v100_v17  ;;  %v211_v42 = vld [vmem:[#allocation2 + $0xa0] sm:$0xff]  ;;  %265 = vperm.xlu2 %2407, %v246_v41   ;;  %v208_v51 = vld [vmem:[#allocation2 + $0x88] sm:$0xff]  ;;  %v2412_v59 = vld [vmem:[#allocation2 + $0x130] ss:$0 sm:$0xff]  ;;  %v2479_v17 = vmov 1326507024  }
  0x11   :  { %90 = vmatpush.msrb.mxu0 %v70_v6  ;;  %v2546_v52 = vld [vmem:[#allocation2 + $0xa8] ss:$0 sm:$0xff]  ;;  %v2548_v54 = vld [vmem:[#allocation2 + $0x140] ss:$0 sm:$0xff]  ;;  %v4023_v41 = vmov 683565275  }
  0x13   :  { %91 = vmatpush.msrb.mxu0 %v69_v7 }
  0x15   :  { %92 = vmatpush.msrb.mxu0 %v68_v8 }
  0x17   :  { %197 = vmatpush.msra.mxu0 %v179_v30  ;;  %260 = vperm.xlu1 %2406, %v245_v43  }
  0x19   :  { %198 = vmatpush.msra.mxu0 %v178_v35 }
  0x1b   :  { %199 = vmatpush.msra.mxu0 %v177_v36 }
  0x1d   :  { %200 = vmatpush.msra.mxu0 %v176_v37 }
  0x81   :  { %v256_v53 = vpop.permute.xlu1 %255 }
  0x82   :  { %v270_v55 = vmul.f32 %v2546_v52, %v256_v53 }
  0x84   :  { %v276_v56 = vadd.f32 %v2548_v54, %v270_v55 }
  0x86   :  { %v2552_v57 = vmul.f32 30.0, %v276_v56 }
  0x88   :  { %v441_v58 = vand.u32 2139095040, %v2552_v57 }
  0x8a   :  { %v442_v61 = vshrl.u32 %v441_v58, 23 }
  0x8b   :  { %v62_v11 = vpop.f32.mrf.mxu0 }
  0x8c   :  { %v63_v12 = vadd.f32 %v2408_v10, %v62_v11  ;;  %v2346_v2 = vadd.s32 4294967169, %v442_v61 }
  0x8e   :  { %vm65_vm1 = vcmp.gt.f32.partialorder %v63_v12, 0.0  ;;  %v66_v13 = vmul.f32 0.2, %v63_v12  ;;  %v448_v5 = vadd.s32 1, %v2346_v2 }
  0x90   :  { %v67_v14 = vsel %vm65_vm1, %v63_v12, %v66_v13  ;;  %vm449_vm7 = vcmp.gt.s32.totalorder %v448_v5, 0 }
  0x91   :  { %2338 = vmatmul.msk.f32.vlgmr.msrb.gmra.mxu0 %vm41_vm0, %v67_v14  ;;  %v450_v9 = vsel %vm449_vm7, %v448_v5, 0  ;;  %v4014_v14 = vand.u32 2147483647, %v2552_v57 }
  0x92   :  { %229 = vmatpush.msrb.mxu0 %v211_v42  ;;  %v452_v11 = vand.u32 31, %v450_v9 }
  0x93   :  { %v445_v29 = vand.u32 8388607, %v4014_v14 }
  0x94   :  { %230 = vmatpush.msrb.mxu0 %v210_v49  ;;  %v2561_v13 = vsub.s32 32, %v452_v11  ;;  %v467_v16 = vshll.u32 %v2478_v15, %v452_v11  ;;  %v455_v42 = vshll.u32 %v4023_v41, %v452_v11 }
  0x95   :  { %v446_v38 = vor.u32 8388608, %v445_v29 }
  0x96   :  { %231 = vmatpush.msrb.mxu0 %v209_v50 }
  0x98   :  { %232 = vmatpush.msrb.mxu0 %v208_v51 }
 0x10e   :  { %v94_v19 = vpop.f32.mrf.mxu0 }
 0x10f   :  { %v95_v20 = vadd.f32 %v2409_v18, %v94_v19  ;;  %v468_v18 = vshrl.u32 %v2479_v17, %v2561_v13 }
 0x111   :  { %v98_v21 = vmul.f32 0.2, %v95_v20  ;;  %vm97_vm2 = vcmp.gt.f32.partialorder %v95_v20, 0.0  ;;  %v469_v30 = vor.u32 %v468_v18, %v467_v16 }
 0x113   :  { %v99_v22 = vsel %vm97_vm2, %v95_v20, %v98_v21  ;;  %v2567_v20 = vshrl.u32 %v450_v9, 5  ;;  %v4018_v21 = vmov 2475754826  }
 0x114   :  { %2339 = vmatmul.msk.f32.vlgmr.msra.gmra.mxu2 %vm41_vm0, %v99_v22  ;;  %v458_v22 = vshll.u32 %v4018_v21, %v452_v11  ;;  %v456_v43 = vshrl.u32 %v4018_v21, %v2561_v13 }
 0x115   :  { %vm473_vm9 = vcmp.lt.s32.totalorder %v2567_v20, 4  ;;  %vm470_vm10 = vcmp.lt.s32.totalorder %v2567_v20, 1  ;;  %vm472_vm11 = vcmp.lt.s32.totalorder %v2567_v20, 3  ;;  %vm471_vm12 = vcmp.lt.s32.totalorder %v2567_v20, 2 }
 0x116   :  { %v2611_v56 = vor.u32 %v456_v43, %v455_v42 }
 0x197   :  { %v126_v24 = vpop.f32.mrf.mxu2 }
 0x198   :  { %v127_v25 = vadd.f32 %v2410_v23, %v126_v24  ;;  %v4021_v23 = vmov 2131351028  }
 0x199   :  { %v459_v24 = vshrl.u32 %v4021_v23, %v2561_v13 }
 0x19a   :  { %v130_v26 = vmul.f32 0.5, %v127_v25  ;;  %140 = vst.msk [vmem:[#allocation5 + $0x20] sm:$0x3] %vm139_vm3, %v127_v25 }
 0x19b   :  { %v2581_v35 = vor.u32 %v459_v24, %v458_v22 }
 0x19c   :  { %v131_v27 = vmul.f32 1.442695, %v130_v26  ;;  %v4025_v26 = vmov 2102212464  }
 0x19e   :  { %2419 = vpow2.f32 %v131_v27  ;;  %v462_v27 = vshrl.u32 %v4025_v26, %v2561_v13 }
 0x1a4   :  { %v2420_v28 = vpop.eup %2419 }
 0x1a5   :  { %134 = vrot.lane.b32.xlu0 %v2420_v28, %s2476_s0 }
 0x1ad   :  { %250 = vperm.xlu0 %2405, %v243_v39   ;;  %v483_v39 = vsel %vm473_vm9, %v469_v30, 1326507024 }
 0x217   :  { %v135_v32 = vpop.permute.xlu0 %134 }
 0x218   :  { %v137_v33 = vmul.f32 %v135_v32, %v129_v31  ;;  %v464_v31 = vshll.u32 %v4025_v26, %v452_v11  ;;  %v465_v32 = vshrl.u32 %v2478_v15, %v2561_v13 }
 0x21a   :  { %v2527_v34 = vadd.f32 %v137_v33, %v127_v25  ;;  %v461_v25 = vshll.u32 %v4021_v23, %v452_v11  ;;  %v266_v33 = vpop.permute.xlu2 %265  ;;  %v261_v11 = vpop.permute.xlu1 %260 }
 0x21b   :  { %v271_v29 = vmul.f32 %v2546_v52, %v261_v11 }
 0x21c   :  { %2340 = vmatmul.msk.f32.vlgmr.msra.gmra.mxu3 %vm150_vm4, %v2527_v34  ;;  %v2583_v36 = vor.u32 %v462_v27, %v461_v25 }
 0x21f   :  { %v251_v63 = vpop.permute.xlu0 %250 }
 0x220   :  { %v269_v0 = vmul.f32 %v2546_v52, %v251_v63 }
 0x222   :  { %v275_v4 = vadd.f32 %v2548_v54, %v269_v0 }
 0x224   :  { %v2558_v6 = vmul.f32 30.0, %v275_v4 }
 0x226   :  { %v286_v7 = vand.u32 2139095040, %v2558_v6  ;;  %v4015_v50 = vand.u32 2147483647, %v2558_v6 }
 0x228   :  { %v287_v8 = vshrl.u32 %v286_v7, 23  ;;  %v290_v5 = vand.u32 8388607, %v4015_v50 }
 0x22a   :  { %v2343_v10 = vadd.s32 4294967169, %v287_v8  ;;  %v478_v8 = vsel %vm470_vm10, %v2611_v56, %v2581_v35  ;;  %v291_v27 = vor.u32 8388608, %v290_v5 }
 0x22c   :  { %v293_v12 = vadd.s32 1, %v2343_v10 }
 0x22e   :  { %vm294_vm8 = vcmp.gt.s32.totalorder %v293_v12, 0 }
 0x22f   :  { %v295_v19 = vsel %vm294_vm8, %v293_v12, 0 }
 0x230   :  { %v297_v28 = vand.u32 31, %v295_v19  ;;  %v2606_v51 = vshrl.u32 %v295_v19, 5 }
 0x232   :  { %v2585_v37 = vsub.s32 32, %v297_v28  ;;  %v309_v53 = vshll.u32 %v4025_v26, %v297_v28  ;;  %v303_v61 = vshll.u32 %v4018_v21, %v297_v28  ;;  %v306_v63 = vshll.u32 %v4021_v23, %v297_v28 }
 0x233   :  { %v300_v2 = vshll.u32 %v4023_v41, %v297_v28  ;;  %vm318_vm13 = vcmp.lt.s32.totalorder %v2606_v51, 4  ;;  %vm315_vm14 = vcmp.lt.s32.totalorder %v2606_v51, 1  ;;  %vm317_vm15 = vcmp.lt.s32.totalorder %v2606_v51, 3 }
 0x234   :  { %v313_v49 = vshrl.u32 %v2479_v17, %v2585_v37  ;;  %v310_v55 = vshrl.u32 %v2478_v15, %v2585_v37  ;;  %v307_v0 = vshrl.u32 %v4025_v26, %v2585_v37  ;;  %vm316_vm1 = vcmp.lt.s32.totalorder %v2606_v51, 2 }
 0x236   :  { %v311_v7 = vor.u32 %v310_v55, %v309_v53  ;;  %v2647_v19 = vor.u32 %v307_v0, %v306_v63 }
 0x29f   :  { %v170_v45 = vpop.f32.mrf.mxu3 }
 0x2a0   :  { %v171_v46 = vadd.f32 %v2411_v44, %v170_v45  ;;  %v466_v44 = vor.u32 %v465_v32, %v464_v31  ;;  %v272_v45 = vmul.f32 %v2546_v52, %v266_v33 }
 0x2a2   :  { %vm173_vm5 = vcmp.gt.f32.partialorder %v171_v46, 0.0  ;;  %v174_v47 = vmul.f32 0.2, %v171_v46  ;;  %v479_v58 = vsel %vm473_vm9, %v466_v44, 920167782 }
 0x2a3   :  { %v480_v9 = vsel %vm472_vm11, %v2583_v36, %v479_v58 }
 0x2a4   :  { %v175_v48 = vsel %vm173_vm5, %v171_v46, %v174_v47  ;;  %v482_v46 = vsel %vm470_vm10, %v2581_v35, %v2583_v36  ;;  %v484_v47 = vsel %vm472_vm11, %v466_v44, %v483_v39  ;;  %v481_v25 = vsel %vm471_vm12, %v478_v8, %v480_v9 }
 0x2a5   :  { %2341 = vmatmul.msk.f32.vlgmr.msra.gmra.mxu0 %vm41_vm0, %v175_v48  ;;  %v312_v48 = vshll.u32 %v2478_v15, %v297_v28  ;;  %v324_v28 = vsel %vm318_vm13, %v311_v7, 920167782  ;;  %v512_v42 = vshrl.u32 %v481_v25, 16  ;;  %v2679_v44 = vshll.u32 %v291_v27, 8 }
 0x2a6   :  { %v325_v43 = vsel %vm317_vm15, %v2647_v19, %v324_v28  ;;  %v475_v28 = vsel %vm473_vm9, %v2583_v36, 2102212464 }
 0x2a7   :  { %v314_v4 = vor.u32 %v313_v49, %v312_v48  ;;  %v511_v48 = vand.u32 65535, %v481_v25 }
 0x2a9   :  { %v328_v24 = vsel %vm318_vm13, %v314_v4, 1326507024 }
 0x322   :  { %v202_v60 = vpop.f32.mrf.mxu0 }
 0x323   :  { %v203_v62 = vadd.f32 %v2412_v59, %v202_v60  ;;  %v2615_v59 = vshll.u32 %v446_v38, 8  ;;  %v278_v60 = vadd.f32 %v2548_v54, %v272_v45  ;;  %v329_v38 = vsel %vm317_vm15, %v311_v7, %v328_v24 }
 0x324   :  { %v277_v45 = vadd.f32 %v2548_v54, %v271_v29  ;;  %v333_v7 = vshrl.u32 %v2679_v44, 16 }
 0x325   :  { %vm205_vm6 = vcmp.gt.f32.partialorder %v203_v62, 0.0  ;;  %v206_v1 = vmul.f32 0.2, %v203_v62  ;;  %v2641_v10 = vmul.f32 30.0, %v278_v60  ;;  %v487_v12 = vand.u32 65535, %v2615_v59 }
 0x326   :  { %v488_v30 = vshrl.u32 %v2615_v59, 16  ;;  %v2692_v63 = vmul.f32 30.0, %v277_v45 }
 0x327   :  { %v207_v3 = vsel %vm205_vm6, %v203_v62, %v206_v1  ;;  %v304_v62 = vshrl.u32 %v4021_v23, %v2585_v37  ;;  %v2626_v1 = vsel %vm471_vm12, %v482_v46, %v484_v47  ;;  %v751_v31 = vand.u32 2139095040, %v2641_v10 }
 0x328   :  { %2342 = vmatmul.msk.f32.vlgmr.msrb.gmra.mxu0 %vm41_vm0, %v207_v3  ;;  %v301_v3 = vshrl.u32 %v4018_v21, %v2585_v37  ;;  %v490_v16 = vshrl.u32 %v2626_v1, 16  ;;  %v489_v32 = vand.u32 65535, %v2626_v1  ;;  %v2689_v60 = vmul.u32 %v512_v42, %v487_v12 }
 0x329   :  { %v2645_v18 = vor.u32 %v304_v62, %v303_v61  ;;  %v752_v47 = vshrl.u32 %v751_v31, 23  ;;  %v332_v61 = vand.u32 65535, %v2679_v44  ;;  %v513_v1 = vmul.u32 %v511_v48, %v487_v12 }
 0x32a   :  { %v2649_v22 = vor.u32 %v301_v3, %v300_v2  ;;  %v2670_v39 = vmul.u32 %v490_v16, %v487_v12  ;;  %v491_v53 = vmul.u32 %v489_v32, %v487_v12  ;;  %v2686_v55 = vmul.u32 %v489_v32, %v488_v30 }
 0x32b   :  { %v327_v33 = vsel %vm315_vm14, %v2645_v18, %v2647_v19  ;;  %v2352_v0 = vadd.s32 4294967169, %v752_v47  ;;  %v2694_v2 = vmul.u32 %v511_v48, %v488_v30  ;;  %v517_v5 = vshll.u32 %v2689_v60, 16 }
 0x32c   :  { %v323_v52 = vsel %vm315_vm14, %v2649_v22, %v2645_v18  ;;  %v330_v46 = vsel %vm316_vm1, %v327_v33, %v329_v38  ;;  %v495_v58 = vshll.u32 %v2670_v39, 16  ;;  %v497_v3 = vshll.u32 %v2686_v55, 16 }
 0x32d   :  { %v326_v49 = vsel %vm316_vm1, %v323_v52, %v325_v43  ;;  %v335_v62 = vshrl.u32 %v330_v46, 16  ;;  %v334_v8 = vand.u32 65535, %v330_v46  ;;  %v596_v11 = vand.u32 2139095040, %v2692_v63 }
 0x32e   :  { %v357_v54 = vshrl.u32 %v326_v49, 16  ;;  %vm499_vm2 = vc.u32 %v491_v53, %v495_v58  ;;  %v501_v4 = vadd.s32 %v495_v58, %v491_v53  ;;  %v356_v24 = vand.u32 65535, %v326_v49 }
 0x32f   :  { %v2699_v9 = vmul.u32 %v335_v62, %v332_v61  ;;  %v758_v27 = vadd.s32 1, %v2352_v0  ;;  %v454_v12 = vshrl.u32 %v4023_v41, %v2561_v13  ;;  %v494_v29 = vmul.u32 %v490_v16, %v488_v30 }
 0x330   :  { %v2702_v25 = vmul.u32 %v357_v54, %v332_v61  ;;  %v519_v31 = vshll.u32 %v2694_v2, 16  ;;  %v500_v32 = vsel %vm499_vm2, 1, %v4016_v40  ;;  %vm2711_vm3 = vc.u32 %v501_v4, %v497_v3 }
 0x331   :  { %vm2715_vm4 = vc.u32 %v513_v1, %v517_v5  ;;  %v2719_v52 = vadd.s32 %v517_v5, %v513_v1  ;;  %v336_v13 = vmul.u32 %v334_v8, %v332_v61  ;;  %v2721_v43 = vmul.u32 %v334_v8, %v333_v7 }
 0x332   :  { %v340_v36 = vshll.u32 %v2699_v9, 16  ;;  %v597_v16 = vshrl.u32 %v596_v11, 23  ;;  %v358_v45 = vmul.u32 %v356_v24, %v332_v61  ;;  %v2724_v46 = vmul.u32 %v356_v24, %v333_v7 }
 0x333   :  { %v362_v47 = vshll.u32 %v2702_v25, 16  ;;  %vm759_vm5 = vcmp.gt.s32.totalorder %v758_v27, 0  ;;  %v2730_v48 = vsel %vm470_vm10, %v454_v12, %v2611_v56  ;;  %v2735_v49 = vsel %vm472_vm11, %v2581_v35, %v475_v28 }
 0x334   :  { %v502_v53 = vadd.s32 %v500_v32, %v494_v29  ;;  %v516_v58 = vmul.u32 %v512_v42, %v488_v30  ;;  %v496_v0 = vshrl.u32 %v2670_v39, 16  ;;  %v504_v61 = vsel %vm2711_vm3, 1, %v4016_v40 }
 0x335   :  { %v522_v1 = vsel %vm2715_vm4, 1, %v4016_v40  ;;  %vm525_vm6 = vc.u32 %v2719_v52, %v519_v31  ;;  %v342_v56 = vshll.u32 %v2721_v43, 16  ;;  %vm344_vm7 = vc.u32 %v336_v13, %v340_v36 }
 0x336   :  { %v346_v35 = vadd.s32 %v340_v36, %v336_v13  ;;  %v760_v3 = vsel %vm759_vm5, %v758_v27, 0  ;;  %v364_v30 = vshll.u32 %v2724_v46, 16  ;;  %vm366_vm8 = vc.u32 %v358_v45, %v362_v47 }
 0x337   :  { %v368_v39 = vadd.s32 %v362_v47, %v358_v45  ;;  %v2349_v42 = vadd.s32 4294967169, %v597_v16  ;;  %v506_v4 = vadd.s32 %v504_v61, %v502_v53  ;;  %v524_v5 = vadd.s32 %v522_v1, %v516_v58 }
 0x338   :  { %v526_v8 = vsel %vm525_vm6, 1, %v4016_v40  ;;  %v339_v11 = vmul.u32 %v335_v62, %v333_v7  ;;  %v299_v24 = vshrl.u32 %v4023_v41, %v2585_v37  ;;  %v345_v12 = vsel %vm344_vm7, 1, %v4016_v40 }
 0x339   :  { %v361_v28 = vmul.u32 %v357_v54, %v333_v7  ;;  %v762_v29 = vand.u32 31, %v760_v3  ;;  %v498_v32 = vshrl.u32 %v2686_v55, 16  ;;  %vm348_vm9 = vc.u32 %v346_v35, %v342_v56 }
 0x33a   :  { %v367_v27 = vsel %vm366_vm8, 1, %v4016_v40  ;;  %v4013_v33 = vand.u32 2147483647, %v2641_v10  ;;  %v518_v38 = vshrl.u32 %v2689_v60, 16  ;;  %v320_v62 = vsel %vm318_vm13, %v2647_v19, 2102212464 }
 0x33b   :  { %vm370_vm10 = vc.u32 %v368_v39, %v364_v30  ;;  %v603_v13 = vadd.s32 1, %v2349_v42  ;;  %v2760_v37 = vadd.s32 %v506_v4, %v496_v0  ;;  %v520_v54 = vshrl.u32 %v2694_v2, 16 }
 0x33c   :  { %v2763_v7 = vadd.s32 %v526_v8, %v524_v5  ;;  %v347_v36 = vadd.s32 %v345_v12, %v339_v11  ;;  %v2768_v16 = vsel %vm315_vm14, %v299_v24, %v2649_v22  ;;  %v349_v45 = vsel %vm348_vm9, 1, %v4016_v40 }
 0x33d   :  { %v369_v47 = vadd.s32 %v367_v27, %v361_v28  ;;  %v2771_v53 = vsub.s32 32, %v762_v29  ;;  %v2776_v19 = vsel %vm317_vm15, %v2645_v18, %v320_v62  ;;  %v363_v58 = vshrl.u32 %v2702_v25, 16 }
 0x33e   :  { %v371_v0 = vsel %vm370_vm10, 1, %v4016_v40  ;;  %v2782_v61 = vand.u32 8388607, %v4013_v33  ;;  %v341_v22 = vshrl.u32 %v2699_v9, 16  ;;  %v343_v1 = vshrl.u32 %v2721_v43, 16 }
 0x33f   :  { %v365_v56 = vshrl.u32 %v2724_v46, 16  ;;  %vm604_vm11 = vcmp.gt.s32.totalorder %v603_v13, 0  ;;  %v351_v35 = vadd.s32 %v349_v45, %v347_v36  ;;  %v2787_v42 = vadd.s32 %v368_v39, %v364_v30 }
 0x340   :  { %v4020_v18 = vand.u32 2147483647, %v2692_v63  ;;  %v605_v4 = vsel %vm604_vm11, %v603_v13, 0  ;;  %v373_v25 = vadd.s32 %v371_v0, %v369_v47  ;;  %v765_v5 = vshll.u32 %v4023_v41, %v762_v29 }
 0x341   :  { %v766_v8 = vshrl.u32 %v4018_v21, %v2771_v53  ;;  %v607_v11 = vand.u32 31, %v605_v4  ;;  %v756_v9 = vor.u32 8388608, %v2782_v61  ;;  %v2794_v24 = vshrl.u32 %v760_v3, 5 }
 0x342   :  { %v768_v46 = vshll.u32 %v4018_v21, %v762_v29  ;;  %v769_v30 = vshrl.u32 %v4021_v23, %v2771_v53  ;;  %v771_v39 = vshll.u32 %v4021_v23, %v762_v29  ;;  %v772_v12 = vshrl.u32 %v4025_v26, %v2771_v53 }
 0x343   :  { %v774_v28 = vshll.u32 %v4025_v26, %v762_v29  ;;  %v2803_v27 = vsub.s32 32, %v607_v11  ;;  %v775_v62 = vshrl.u32 %v2478_v15, %v2771_v53  ;;  %v777_v3 = vshll.u32 %v2478_v15, %v762_v29 }
 0x344   :  { %v778_v13 = vshrl.u32 %v2479_v17, %v2771_v53  ;;  %v600_v36 = vand.u32 8388607, %v4020_v18  ;;  %v374_v45 = vadd.s32 %v373_v25, %v363_v58  ;;  %v2812_v47 = vor.u32 %v766_v8, %v765_v5 }
 0x345   :  { %v610_v0 = vshll.u32 %v4023_v41, %v607_v11  ;;  %v613_v61 = vshll.u32 %v4018_v21, %v607_v11  ;;  %v2816_v33 = vor.u32 %v769_v30, %v768_v46  ;;  %v611_v14 = vshrl.u32 %v4018_v21, %v2803_v27 }
 0x346   :  { %v614_v29 = vshrl.u32 %v4021_v23, %v2803_v27  ;;  %v616_v50 = vshll.u32 %v4021_v23, %v607_v11  ;;  %v2823_v40 = vshrl.u32 %v605_v4, 5  ;;  %v617_v58 = vshrl.u32 %v4025_v26, %v2803_v27 }
 0x347   :  { %v619_v25 = vshll.u32 %v4025_v26, %v607_v11  ;;  %v620_v5 = vshrl.u32 %v2478_v15, %v2803_v27  ;;  %v2830_v8 = vor.u32 %v772_v12, %v771_v39  ;;  %v776_v46 = vor.u32 %v775_v62, %v774_v28 }
 0x348   :  { %v779_v30 = vor.u32 %v778_v13, %v777_v3  ;;  %v601_v21 = vor.u32 8388608, %v600_v36  ;;  %vm783_vm13 = vcmp.lt.s32.totalorder %v2794_v24, 4  ;;  %v2833_v18 = vor.u32 %v611_v14, %v610_v0 }
 0x349   :  { %v2835_v23 = vor.u32 %v614_v29, %v613_v61  ;;  %v621_v4 = vor.u32 %v620_v5, %v619_v25  ;;  %vm780_vm14 = vcmp.lt.s32.totalorder %v2794_v24, 1  ;;  %v2838_v41 = vor.u32 %v617_v58, %v616_v50 }
 0x34a   :  { %v622_v26 = vshll.u32 %v2478_v15, %v607_v11  ;;  %v623_v39 = vshrl.u32 %v2479_v17, %v2803_v27  ;;  %vm782_vm15 = vcmp.lt.s32.totalorder %v2794_v24, 3  ;;  %vm625_vm2 = vcmp.lt.s32.totalorder %v2823_v40, 1 }
 0x34b   :  { %vm627_vm3 = vcmp.lt.s32.totalorder %v2823_v40, 3  ;;  %vm628_vm4 = vcmp.lt.s32.totalorder %v2823_v40, 4  ;;  %v789_v14 = vsel %vm783_vm13, %v776_v46, 920167782  ;;  %vm626_vm5 = vcmp.lt.s32.totalorder %v2823_v40, 2 }
 0x34c   :  { %v624_v12 = vor.u32 %v623_v39, %v622_v26  ;;  %v2850_v50 = vshll.u32 %v601_v21, 8  ;;  %v352_v11 = vadd.s32 %v351_v35, %v341_v22  ;;  %v793_v28 = vsel %vm783_vm13, %v779_v30, 1326507024 }
 0x34d   :  { %v633_v62 = vsel %vm625_vm2, %v2833_v18, %v2835_v23  ;;  %v634_v3 = vsel %vm628_vm4, %v621_v4, 920167782  ;;  %v375_v13 = vadd.s32 %v374_v45, %v365_v56  ;;  %vm781_vm6 = vcmp.lt.s32.totalorder %v2794_v24, 2 }
 0x34e   :  { %v635_v21 = vsel %vm627_vm3, %v2838_v41, %v634_v3  ;;  %v637_v26 = vsel %vm625_vm2, %v2835_v23, %v2838_v41  ;;  %v788_v22 = vsel %vm780_vm14, %v2812_v47, %v2816_v33  ;;  %v790_v56 = vsel %vm782_vm15, %v2830_v8, %v789_v14 }
 0x34f   :  { %v636_v35 = vsel %vm626_vm5, %v633_v62, %v635_v21  ;;  %v638_v36 = vsel %vm628_vm4, %v624_v12, 1326507024  ;;  %v792_v45 = vsel %vm780_vm14, %v2816_v33, %v2830_v8  ;;  %v794_v0 = vsel %vm782_vm15, %v776_v46, %v793_v28 }
 0x350   :  { %v639_v61 = vsel %vm627_vm3, %v621_v4, %v638_v36  ;;  %v642_v29 = vand.u32 65535, %v2850_v50  ;;  %v2890_v58 = vadd.s32 %v352_v11, %v343_v1  ;;  %v2892_v25 = vshll.u32 %v756_v9, 8 }
 0x351   :  { %v640_v5 = vsel %vm626_vm5, %v637_v26, %v639_v61  ;;  %v667_v30 = vshrl.u32 %v636_v35, 16  ;;  %v2898_v39 = vsel %vm781_vm6, %v788_v22, %v790_v56  ;;  %v643_v46 = vshrl.u32 %v2850_v50, 16 }
 0x352   :  { %v645_v14 = vshrl.u32 %v640_v5, 16  ;;  %v666_v4 = vand.u32 65535, %v636_v35  ;;  %v2904_v43 = vadd.s32 %v2719_v52, %v519_v31  ;;  %v2908_v1 = vsel %vm781_vm6, %v792_v45, %v794_v0 }
 0x353   :  { %v644_v9 = vand.u32 65535, %v640_v5  ;;  %v2910_v12 = vmul.u32 %v667_v30, %v642_v29  ;;  %v529_v11 = vadd.s32 %v2763_v7, %v518_v38  ;;  %v322_v28 = vsel %vm316_vm1, %v2768_v16, %v2776_v19 }
 0x354   :  { %v379_v62 = vadd.s32 1, %v375_v13  ;;  %v2919_v3 = vmul.u32 %v645_v14, %v642_v29  ;;  %v2924_v31 = vadd.s32 %v2760_v37, %v498_v32  ;;  %vm378_vm7 = vc.u32 %v2890_v58, %v2787_v42 }
 0x355   :  { %v797_v60 = vand.u32 65535, %v2892_v25  ;;  %v822_v52 = vshrl.u32 %v2898_v39, 16  ;;  %v800_v38 = vshrl.u32 %v2908_v1, 16  ;;  %v668_v7 = vmul.u32 %v666_v4, %v642_v29 }
 0x356   :  { %v2931_v51 = vmul.u32 %v666_v4, %v643_v46  ;;  %v672_v16 = vshll.u32 %v2910_v12, 16  ;;  %v376_v19 = vmul.u32 %v2679_v44, %v322_v28  ;;  %v646_v55 = vmul.u32 %v644_v9, %v642_v29 }
 0x357   :  { %v2935_v21 = vmul.u32 %v644_v9, %v643_v46  ;;  %v650_v32 = vshll.u32 %v2919_v3, 16  ;;  %v530_v37 = vadd.s32 %v529_v11, %v520_v54  ;;  %v380_v26 = vsel %vm378_vm7, %v379_v62, %v375_v13 }
 0x358   :  { %v798_v22 = vshrl.u32 %v2892_v25, 16  ;;  %v821_v56 = vand.u32 65535, %v2898_v39  ;;  %v477_v35 = vsel %vm471_vm12, %v2730_v48, %v2735_v49  ;;  %vm533_vm1 = vc.u32 %v2924_v31, %v2904_v43 }
 0x359   :  { %v799_v44 = vand.u32 65535, %v2908_v1  ;;  %v2949_v36 = vmul.u32 %v822_v52, %v797_v60  ;;  %v2951_v45 = vmul.u32 %v800_v38, %v797_v60  ;;  %v674_v2 = vshll.u32 %v2931_v51, 16 }
 0x35a   :  { %vm676_vm8 = vc.u32 %v668_v7, %v672_v16  ;;  %v2954_v54 = vadd.s32 %v672_v16, %v668_v7  ;;  %v381_v13 = vadd.s32 %v380_v26, %v376_v19  ;;  %v652_v0 = vshll.u32 %v2935_v21, 16 }
 0x35b   :  { %vm654_vm9 = vc.u32 %v646_v55, %v650_v32  ;;  %v656_v20 = vadd.s32 %v650_v32, %v646_v55  ;;  %v534_v48 = vadd.s32 1, %v530_v37  ;;  %v823_v49 = vmul.u32 %v821_v56, %v797_v60 }
 0x35c   :  { %v2957_v61 = vmul.u32 %v821_v56, %v798_v22  ;;  %v671_v29 = vmul.u32 %v667_v30, %v643_v46  ;;  %v801_v5 = vmul.u32 %v799_v44, %v797_v60  ;;  %v827_v39 = vshll.u32 %v2949_v36, 16 }
 0x35d   :  { %v649_v4 = vmul.u32 %v645_v14, %v643_v46  ;;  %v4031_v1 = vmov 0   ;;  %v2961_v11 = vmul.u32 %v799_v44, %v798_v22  ;;  %v805_v28 = vshll.u32 %v2951_v45, 16 }
 0x35e   :  { %v677_v9 = vsel %vm676_vm8, 1, %v4031_v1  ;;  %v655_v62 = vsel %vm654_vm9, 1, %v4031_v1  ;;  %vm680_vm12 = vc.u32 %v2954_v54, %v674_v2  ;;  %v531_v7 = vmul.u32 %v2615_v59, %v477_v35 }
 0x35f   :  { %v382_v16 = vadd.s32 536870912, %v381_v13  ;;  %vm658_vm10 = vc.u32 %v656_v20, %v652_v0  ;;  %v535_v30 = vsel %vm533_vm1, %v534_v48, %v530_v37  ;;  %v829_v46 = vshll.u32 %v2957_v61, 16 }
 0x360   :  { %v679_v14 = vadd.s32 %v677_v9, %v671_v29  ;;  %vm831_vm11 = vc.u32 %v823_v49, %v827_v39  ;;  %v2973_v60 = vadd.s32 %v827_v39, %v823_v49  ;;  %v657_v19 = vadd.s32 %v655_v62, %v649_v4 }
 0x361   :  { %v681_v55 = vsel %vm680_vm12, 1, %v4031_v1  ;;  %v807_v32 = vshll.u32 %v2961_v11, 16  ;;  %vm809_vm7 = vc.u32 %v801_v5, %v805_v28  ;;  %v811_v26 = vadd.s32 %v805_v28, %v801_v5 }
 0x362   :  { %v659_v59 = vsel %vm658_vm10, 1, %v4031_v1  ;;  %v536_v56 = vadd.s32 %v535_v30, %v531_v7  ;;  %v2978_v35 = vshrl.u32 %v382_v16, 30  ;;  %v826_v44 = vmul.u32 %v822_v52, %v798_v22  ;;  %v920_v30 = vld [vmem:[#allocation2 + $0xc8] sm:$0xff] }
 0x363   :  { %v804_v37 = vmul.u32 %v800_v38, %v798_v22  ;;  %v832_v0 = vsel %vm831_vm11, 1, %v4031_v1  ;;  %v673_v20 = vshrl.u32 %v2910_v12, 16  ;;  %v683_v48 = vadd.s32 %v681_v55, %v679_v14  ;;  %v919_v14 = vld [vmem:[#allocation2 + $0xc0] sm:$0xff]  ;;  %947 = vmatpush.msra.mxu1 %v920_v30 }
 0x364   :  { %v810_v49 = vsel %vm809_vm7, 1, %v4031_v1  ;;  %vm835_vm1 = vc.u32 %v2973_v60, %v829_v46  ;;  %v651_v29 = vshrl.u32 %v2919_v3, 16  ;;  %v661_v5 = vadd.s32 %v659_v59, %v657_v19  ;;  %v918_v59 = vld [vmem:[#allocation2 + $0xb8] sm:$0xff] }
 0x365   :  { %vm813_vm8 = vc.u32 %v811_v26, %v807_v32  ;;  %v537_v39 = vadd.s32 536870912, %v536_v56  ;;  %v384_v4 = vshll.u32 %v2978_v35, 30  ;;  %v834_v52 = vadd.s32 %v832_v0, %v826_v44  ;;  %948 = vmatpush.msra.mxu1 %v919_v14 }
 0x366   :  { %v812_v38 = vadd.s32 %v810_v49, %v804_v37  ;;  %v836_v22 = vsel %vm835_vm1, 1, %v4031_v1  ;;  %v675_v12 = vshrl.u32 %v2931_v51, 16  ;;  %v684_v9 = vadd.s32 %v683_v48, %v673_v20 }
 0x367   :  { %v814_v28 = vsel %vm813_vm8, 1, %v4031_v1  ;;  %v4032_v62 = vmov 683565275   ;;  %v653_v16 = vshrl.u32 %v2935_v21, 16  ;;  %v662_v3 = vadd.s32 %v661_v5, %v651_v29  ;;  %949 = vmatpush.msra.mxu1 %v918_v59 }
 0x368   :  { %v609_v7 = vshrl.u32 %v4032_v62, %v2803_v27  ;;  %v630_v19 = vsel %vm628_vm4, %v2838_v41, 2102212464  ;;  %v2997_v55 = vshrl.u32 %v537_v39, 30  ;;  %v828_v32 = vshrl.u32 %v2949_v36, 16 }
 0x369   :  { %v838_v26 = vadd.s32 %v836_v22, %v834_v52  ;;  %v3000_v44 = vsub.s32 %v381_v13, %v384_v4  ;;  %v806_v27 = vshrl.u32 %v2951_v45, 16  ;;  %v816_v37 = vadd.s32 %v814_v28, %v812_v38  ;;  %v2415_v52 = vld [vmem:[#allocation2 + $0x138] ss:$0 sm:$0xff] }
 0x36a   :  { %v685_v21 = vadd.s32 %v684_v9, %v675_v12  ;;  %v629_v0 = vsel %vm625_vm2, %v609_v7, %v2833_v18  ;;  %v631_v41 = vsel %vm627_vm3, %v2835_v23, %v630_v19  ;;  %v3009_v20 = vadd.s32 %v662_v3, %v653_v16 }
 0x36b   :  { %v3014_v36 = vadd.s32 %v2954_v54, %v674_v2  ;;  %v539_v45 = vshll.u32 %v2997_v55, 30  ;;  %v764_v13 = vshrl.u32 %v4032_v62, %v2771_v53  ;;  %v830_v48 = vshrl.u32 %v2957_v61, 16 }
 0x36c   :  { %v839_v18 = vadd.s32 %v838_v26, %v828_v32  ;;  %v808_v49 = vshrl.u32 %v2961_v11, 16  ;;  %v817_v29 = vadd.s32 %v816_v37, %v806_v27  ;;  %v632_v23 = vsel %vm626_vm5, %v629_v0, %v631_v41 }
 0x36d   :  { %v689_v5 = vadd.s32 1, %v685_v21  ;;  %v387_v51 = vsub.s32 0, %v3000_v44  ;;  %v785_v2 = vsel %vm783_vm13, %v2830_v8, 2102212464  ;;  %vm688_vm2 = vc.u32 %v3009_v20, %v3014_v36 }
 0x36e   :  { %vm386_vm3 = vcmp.lt.s32.totalorder %v3000_v44, 0  ;;  %v3030_v53 = vsub.s32 %v536_v56, %v539_v45  ;;  %v784_v54 = vsel %vm780_vm14, %v764_v13, %v2812_v47  ;;  %v840_v40 = vadd.s32 %v839_v18, %v830_v48 }
 0x36f   :  { %v686_v11 = vmul.u32 %v2850_v50, %v632_v23  ;;  %v786_v39 = vsel %vm782_vm15, %v2816_v33, %v785_v2  ;;  %v3039_v4 = vadd.s32 %v817_v29, %v808_v49  ;;  %v3044_v8 = vadd.s32 %v2973_v60, %v829_v46 }
 0x370   :  { %v690_v56 = vsel %vm688_vm2, %v689_v5, %v685_v21  ;;  %v388_v38 = vsel %vm386_vm3, %v387_v51, %v3000_v44  ;;  %v542_v47 = vsub.s32 0, %v3030_v53  ;;  %v787_v50 = vsel %vm781_vm6, %v784_v54, %v786_v39 }
 0x371   :  { %v844_v22 = vadd.s32 1, %v840_v40  ;;  %v691_v12 = vadd.s32 %v690_v56, %v686_v11  ;;  %vm541_vm13 = vcmp.lt.s32.totalorder %v3030_v53, 0  ;;  %v389_v33 = vclz %v388_v38 }
 0x372   :  { %vm843_vm14 = vc.u32 %v3039_v4, %v3044_v8  ;;  %v841_v46 = vmul.u32 %v2892_v25, %v787_v50  ;;  %v543_v7 = vsel %vm541_vm13, %v542_v47, %v3030_v53  ;;  %v377_v45 = vadd.s32 %v2787_v42, %v2890_v58 }
 0x373   :  { %v845_v16 = vsel %vm843_vm14, %v844_v22, %v840_v40  ;;  %v692_v24 = vadd.s32 536870912, %v691_v12  ;;  %v2344_v3 = vadd.s32 4294967294, %v389_v33  ;;  %v544_v14 = vclz %v543_v7 }
 0x374   :  { %v846_v19 = vadd.s32 %v845_v16, %v841_v46  ;;  %v532_v42 = vadd.s32 %v2904_v43, %v2924_v31  ;;  %vm285_vm12 = vcmp.lt.s32.totalorder %v2558_v6, 0  ;;  %vm440_vm7 = vcmp.lt.s32.totalorder %v2552_v57, 0 }
 0x375   :  { %v3061_v32 = vshrl.u32 %v692_v24, 30  ;;  %vm2345_vm15 = vcmp.lt.s32.totalorder %v2344_v3, 0  ;;  %v2347_v25 = vadd.s32 4294967294, %v544_v14  ;;  %vm595_vm8 = vcmp.lt.s32.totalorder %v2692_v63, 0 }
 0x376   :  { %v847_v26 = vadd.s32 536870912, %v846_v19  ;;  %v392_v59 = vsel %vm2345_vm15, 0, %v2344_v3  ;;  %v4033_v3 = vand.u32 2147483647, %v2558_v6  ;;  %vm750_vm3 = vcmp.lt.s32.totalorder %v2641_v10, 0 }
 0x377   :  { %v694_v27 = vshll.u32 %v3061_v32, 30  ;;  %vm2348_vm4 = vcmp.lt.s32.totalorder %v2347_v25, 0  ;;  %v397_v37 = vsub.s32 4294967266, %v392_v59  ;;  %v393_v13 = vsub.s32 32, %v392_v59 }
 0x378   :  { %v3065_v21 = vshrl.u32 %v847_v26, 30  ;;  %v547_v41 = vsel %vm2348_vm4, 0, %v2347_v25  ;;  %vm3087_vm11 = vcmp.le.f32.partialorder %v4033_v3, 0.7853982  ;;  %v687_v26 = vadd.s32 %v3014_v36, %v3009_v20 }
 0x379   :  { %v3067_v0 = vsub.s32 %v691_v12, %v694_v27  ;;  %v398_v48 = vadd.s32 127, %v397_v37  ;;  %v552_v29 = vsub.s32 4294967266, %v547_v41  ;;  %v395_v23 = vshrl.u32 %v377_v45, %v393_v13 }
 0x37a   :  { %v849_v18 = vshll.u32 %v3065_v21, 30  ;;  %v548_v58 = vsub.s32 32, %v547_v41  ;;  %v4036_v20 = vand.u32 2147483647, %v2552_v57  ;;  %v4042_v14 = vand.u32 2147483647, %v2641_v10 }
 0x37b   :  { %v697_v49 = vsub.s32 0, %v3067_v0  ;;  %vm696_vm5 = vcmp.lt.s32.totalorder %v3067_v0, 0  ;;  %v399_v5 = vshll.u32 %v398_v48, 23  ;;  %v553_v54 = vadd.s32 127, %v552_v29 }
 0x37c   :  { %v3075_v51 = vsub.s32 %v846_v19, %v849_v18  ;;  %vm3106_vm1 = vcmp.le.f32.partialorder %v4036_v20, 0.7853982  ;;  %vm3148_vm13 = vcmp.le.f32.partialorder %v4042_v14, 0.7853982 }
 0x37d   :  { %v698_v2 = vsel %vm696_vm5, %v697_v49, %v3067_v0  ;;  %v400_v11 = vor.u32 4788187, %v399_v5  ;;  %v554_v38 = vshll.u32 %v553_v54, 23  ;;  %vm426_vm5 = vweird.f32 %v2558_v6 }
 0x37e   :  { %v852_v39 = vsub.s32 0, %v3075_v51  ;;  %v699_v56 = vclz %v698_v2  ;;  %vm851_vm6 = vcmp.lt.s32.totalorder %v3075_v51, 0 }
 0x37f   :  { %v401_v47 = vand.u32 2147483647, %v400_v11  ;;  %v555_v43 = vor.u32 4788187, %v554_v38 }
 0x380   :  { %v853_v22 = vsel %vm851_vm6, %v852_v39, %v3075_v51  ;;  %v2350_v12 = vadd.s32 4294967294, %v699_v56 }
 0x381   :  { %v854_v31 = vclz %v853_v22 }
 0x382   :  { %vm2351_vm9 = vcmp.lt.s32.totalorder %v2350_v12, 0 }
 0x383   :  { %v702_v7 = vsel %vm2351_vm9, 0, %v2350_v12 }
 0x384   :  { %v704_v48 = vshll.u32 %v3067_v0, %v702_v7 }
 0x3a5   :  { %v234_v9 = vpop.f32.mrf.mxu0 }
 0x3a6   :  { %v235_v61 = vadd.f32 %v2415_v52, %v234_v9  ;;  %v550_v52 = vshrl.u32 %v532_v42, %v548_v58 }
 0x3a8   :  { %v238_v60 = vrot.slane %v235_v61, 1  ;;  %v3054_v28 = vperm.slane %v235_v61, 0  ;;  %v556_v61 = vand.u32 2147483647, %v555_v43 }
 0x3aa   :  { %v3057_v30 = vperm.slane %v238_v60, 0  ;;  %907 = vrot.lane.b32.xlu2 %v3054_v28, %s2484_s1  ;;  %v2353_v60 = vadd.s32 4294967294, %v854_v31 }
 0x3ac   :  { %909 = vrot.lane.b32.xlu1 %v3057_v30, %s2484_s1  ;;  %vm2354_vm10 = vcmp.lt.s32.totalorder %v2353_v60, 0 }
 0x3ad   :  { %v857_v25 = vsel %vm2354_vm10, 0, %v2353_v60  ;;  %vm581_vm10 = vweird.f32 %v2552_v57 }
 0x3ae   :  { %v862_v45 = vsub.s32 4294967266, %v857_v25 }
 0x3b0   :  { %v863_v5 = vadd.s32 127, %v862_v45 }
 0x3b2   :  { %142 = vrot.lane.b32.xlu2 %v2527_v34, %s2485_s6  ;;  %v394_v34 = vshll.u32 %v3000_v44, %v392_v59  ;;  %v549_v44 = vshll.u32 %v3030_v53, %v547_v41  ;;  %v707_v53 = vsub.s32 4294967266, %v702_v7  ;;  %v703_v59 = vsub.s32 32, %v702_v7 }
 0x3b3   :  { %v864_v39 = vshll.u32 %v863_v5, 23 }
 0x3b4   :  { %v396_v40 = vor.u32 %v395_v23, %v394_v34  ;;  %v551_v9 = vor.u32 %v550_v52, %v549_v44  ;;  %v708_v27 = vadd.s32 127, %v707_v53  ;;  %v705_v18 = vshrl.u32 %v687_v26, %v703_v59 }
 0x3b5   :  { %v842_v34 = vadd.s32 %v3044_v8, %v3039_v4  ;;  %v858_v23 = vsub.s32 32, %v857_v25  ;;  %v865_v38 = vor.u32 4788187, %v864_v39  ;;  %v4039_v53 = vand.u32 2147483647, %v2692_v63 }
 0x3b6   :  { %v403_v50 = vcvt.s32.f32 %v396_v40  ;;  %v558_v46 = vcvt.s32.f32 %v551_v9  ;;  %v709_v49 = vshll.u32 %v708_v27, 23  ;;  %v706_v2 = vor.u32 %v705_v18, %v704_v48  ;;  %v917_v9 = vld [vmem:[#allocation2 + $0xb0] sm:$0xff] }
 0x3b7   :  { %v859_v40 = vshll.u32 %v3075_v51, %v857_v25  ;;  %v860_v11 = vshrl.u32 %v842_v34, %v858_v23  ;;  %v866_v43 = vand.u32 2147483647, %v865_v38  ;;  %950 = vmatpush.msra.mxu1 %v917_v9  ;;  %vm3126_vm2 = vcmp.le.f32.partialorder %v4039_v53, 0.7853982 }
 0x3b8   :  { %v404_v33 = vmul.f32 %v403_v50, %v401_v47  ;;  %v559_v24 = vmul.f32 %v558_v46, %v556_v61  ;;  %v710_v42 = vor.u32 4788187, %v709_v49  ;;  %v713_v44 = vcvt.s32.f32 %v706_v2 }
 0x3b9   :  { %v861_v52 = vor.u32 %v860_v11, %v859_v40  ;;  %v562_v48 = vsub.s32 4, %v2997_v55 }
 0x3ba   :  { %v405_v16 = vxor.u32 2147483648, %v404_v33  ;;  %v560_v37 = vxor.u32 2147483648, %v559_v24  ;;  %v711_v56 = vand.u32 2147483647, %v710_v42 }
 0x3bb   :  { %v868_v31 = vcvt.s32.f32 %v861_v52  ;;  %v563_v2 = vsel %vm440_vm7, %v562_v48, %v2997_v55 }
 0x3bc   :  { %v406_v19 = vsel %vm285_vm12, %v405_v16, %v404_v33  ;;  %v561_v29 = vsel %vm440_vm7, %v560_v37, %v559_v24  ;;  %v714_v47 = vmul.f32 %v713_v44, %v711_v56  ;;  %v407_v33 = vsub.s32 4, %v2978_v35 }
 0x3bd   :  { %v3098_v41 = vsel %vm3087_vm11, %v2558_v6, %v406_v19  ;;  %v3117_v0 = vsel %vm3106_vm1, %v2552_v57, %v561_v29  ;;  %v869_v16 = vmul.f32 %v868_v31, %v866_v43  ;;  %v565_v56 = vsel %vm3106_vm1, 0, %v563_v2 }
 0x3be   :  { %v411_v13 = vmul.f32 %v3098_v41, %v3098_v41  ;;  %v566_v54 = vmul.f32 %v3117_v0, %v3117_v0  ;;  %v715_v51 = vxor.u32 2147483648, %v714_v47  ;;  %v408_v3 = vsel %vm285_vm12, %v407_v33, %v2978_v35 }
 0x3bf   :  { %v410_v37 = vsel %vm3087_vm11, 0, %v408_v3  ;;  %v870_v49 = vxor.u32 2147483648, %v869_v16  ;;  %vm145_vm11 = vcmask 189568  }
 0x3c0   :  { %v419_v58 = vmul.f32 -0.00019511016, %v411_v13  ;;  %v412_v4 = vmul.f32 -0.001358992, %v411_v13  ;;  %v574_v12 = vmul.f32 -0.00019511016, %v566_v54  ;;  %v716_v25 = vsel %vm595_vm8, %v715_v51, %v714_v47 }
 0x3c1   :  { %v567_v61 = vmul.f32 -0.001358992, %v566_v54  ;;  %v3140_v45 = vsel %vm3126_vm2, %v2692_v63, %v716_v25  ;;  %v427_v34 = vadd.s32 3, %v410_v37  ;;  %v582_v47 = vadd.s32 3, %v565_v56 }
 0x3c2   :  { %v420_v8 = vadd.f32 0.008332121, %v419_v58  ;;  %v413_v50 = vadd.f32 0.041655596, %v412_v4  ;;  %v575_v7 = vadd.f32 0.008332121, %v574_v12  ;;  %v721_v23 = vmul.f32 %v3140_v45, %v3140_v45 }
 0x3c3   :  { %v568_v19 = vadd.f32 0.041655596, %v567_v61  ;;  %v428_v39 = vand.u32 3, %v427_v34  ;;  %v583_v31 = vand.u32 3, %v582_v47  ;;  %v872_v34 = vsub.s32 4, %v3065_v21 }
 0x3c4   :  { %v421_v22 = vmul.f32 %v420_v8, %v411_v13  ;;  %v414_v46 = vmul.f32 %v413_v50, %v411_v13  ;;  %v576_v27 = vmul.f32 %v575_v7, %v566_v54  ;;  %v729_v44 = vmul.f32 -0.00019511016, %v721_v23 }
 0x3c5   :  { %v569_v18 = vmul.f32 %v568_v19, %v566_v54  ;;  %vm430_vm14 = vcmp.eq.s32.totalorder %v428_v39, 0  ;;  %vm433_vm15 = vcmp.eq.s32.totalorder %v428_v39, 2  ;;  %v722_v50 = vmul.f32 -0.001358992, %v721_v23 }
 0x3c6   :  { %v422_v60 = vadd.f32 -0.16666654, %v421_v22  ;;  %v415_v26 = vadd.f32 -0.4999988, %v414_v46  ;;  %v577_v29 = vadd.f32 -0.16666654, %v576_v27  ;;  %v873_v57 = vsel %vm750_vm3, %v872_v34, %v3065_v21 }
 0x3c7   :  { %v570_v42 = vadd.f32 -0.4999988, %v569_v18  ;;  %v730_v22 = vadd.f32 0.008332121, %v729_v44  ;;  %vm429_vm4 = vcmp.lt.s32.totalorder %v428_v39, 2  ;;  %vm585_vm6 = vcmp.eq.s32.totalorder %v583_v31, 0 }
 0x3c8   :  { %v423_v59 = vmul.f32 %v422_v60, %v411_v13  ;;  %v416_v35 = vmul.f32 %v415_v26, %v411_v13  ;;  %v871_v13 = vsel %vm750_vm3, %v870_v49, %v869_v16  ;;  %v578_v11 = vmul.f32 %v577_v29, %v566_v54 }
 0x3c9   :  { %v3163_v4 = vsel %vm3148_vm13, %v2641_v10, %v871_v13  ;;  %v571_v8 = vmul.f32 %v570_v42, %v566_v54  ;;  %v723_v33 = vadd.f32 0.041655596, %v722_v50  ;;  %v731_v54 = vmul.f32 %v730_v22, %v721_v23 }
 0x3ca   :  { %v424_v20 = vadd.f32 1.0, %v423_v59  ;;  %v417_v58 = vadd.f32 1.0, %v416_v35  ;;  %v579_v38 = vadd.f32 1.0, %v578_v11  ;;  %vm588_vm9 = vcmp.eq.s32.totalorder %v583_v31, 2 }
 0x3cb   :  { %v572_v36 = vadd.f32 1.0, %v571_v8  ;;  %v717_v7 = vsub.s32 4, %v3061_v32  ;;  %v724_v3 = vmul.f32 %v723_v33, %v721_v23  ;;  %v732_v19 = vadd.f32 -0.16666654, %v731_v54 }
 0x3cc   :  { %v425_v40 = vmul.f32 %v424_v20, %v3098_v41  ;;  %v434_v52 = vxor.u32 2147483648, %v417_v58  ;;  %v876_v41 = vmul.f32 %v3163_v4, %v3163_v4  ;;  %v580_v43 = vmul.f32 %v579_v38, %v3117_v0 }
 0x3cd   :  { %v589_v60 = vxor.u32 2147483648, %v572_v36  ;;  %vm584_vm12 = vcmp.lt.s32.totalorder %v583_v31, 2  ;;  %v718_v6 = vsel %vm595_vm8, %v717_v7, %v3061_v32  ;;  %v725_v48 = vadd.f32 -0.4999988, %v724_v3 }
 0x3ce   :  { %v431_v55 = vxor.u32 2147483648, %v425_v40  ;;  %v435_v9 = vsel %vm433_vm15, %v434_v52, %v425_v40  ;;  %v884_v61 = vmul.f32 -0.00019511016, %v876_v41  ;;  %v586_v46 = vxor.u32 2147483648, %v580_v43 }
 0x3cf   :  { %v877_v16 = vmul.f32 -0.001358992, %v876_v41  ;;  %v590_v26 = vsel %vm588_vm9, %v589_v60, %v580_v43  ;;  %v733_v18 = vmul.f32 %v732_v19, %v721_v23  ;;  %v720_v29 = vsel %vm3126_vm2, 0, %v718_v6 }
 0x3d0   :  { %v432_v12 = vsel %vm430_vm14, %v417_v58, %v431_v55  ;;  %v885_v25 = vadd.f32 0.008332121, %v884_v61  ;;  %v587_v0 = vsel %vm585_vm6, %v572_v36, %v586_v46  ;;  %v726_v2 = vmul.f32 %v725_v48, %v721_v23 }
 0x3d1   :  { %v436_v51 = vsel %vm429_vm4, %v432_v12, %v435_v9  ;;  %v878_v27 = vadd.f32 0.041655596, %v877_v16  ;;  %v591_v20 = vsel %vm584_vm12, %v587_v0, %v590_v26  ;;  %v734_v42 = vadd.f32 1.0, %v733_v18  ;;  %v3202_v16 = vld [vmem:[#allocation2 + $0x148] ss:$0 sm:$0xff] }
 0x3d2   :  { %v437_v53 = vsel %vm426_vm5, nan, %v436_v51  ;;  %v886_v49 = vmul.f32 %v885_v25, %v876_v41  ;;  %v592_v32 = vsel %vm581_vm10, nan, %v591_v20  ;;  %v737_v58 = vadd.s32 3, %v720_v29 }
 0x3d3   :  { %v903_v59 = vmul.f32 %v437_v53, %v3054_v28  ;;  %v879_v14 = vmul.f32 %v878_v27, %v876_v41  ;;  %v904_v40 = vmul.f32 %v592_v32, %v3054_v28  ;;  %v727_v24 = vadd.f32 1.0, %v726_v2 }
 0x3d4   :  { %v887_v13 = vadd.f32 -0.16666654, %v886_v49  ;;  %v735_v39 = vmul.f32 %v734_v42, %v3140_v45  ;;  %v738_v23 = vand.u32 3, %v737_v58  ;;  %v875_v55 = vsel %vm3148_vm13, 0, %v873_v57 }
 0x3d5   :  { %v880_v56 = vadd.f32 -0.4999988, %v879_v14  ;;  %v744_v38 = vxor.u32 2147483648, %v727_v24  ;;  %v892_v21 = vadd.s32 3, %v875_v55  ;;  %vm736_vm2 = vweird.f32 %v2692_v63 }
 0x3d6   :  { %v888_v44 = vmul.f32 %v887_v13, %v876_v41  ;;  %v741_v52 = vxor.u32 2147483648, %v735_v39  ;;  %vm740_vm7 = vcmp.eq.s32.totalorder %v738_v23, 0  ;;  %vm743_vm1 = vcmp.eq.s32.totalorder %v738_v23, 2 }
 0x3d7   :  { %v881_v47 = vmul.f32 %v880_v56, %v876_v41  ;;  %vm739_vm8 = vcmp.lt.s32.totalorder %v738_v23, 2  ;;  %v745_v22 = vsel %vm743_vm1, %v744_v38, %v735_v39  ;;  %v893_v9 = vand.u32 3, %v892_v21 }
 0x3d8   :  { %v889_v50 = vadd.f32 1.0, %v888_v44  ;;  %v742_v45 = vsel %vm740_vm7, %v727_v24, %v741_v52  ;;  %vm891_vm15 = vweird.f32 %v2641_v10  ;;  %v4045_v58 = vmov 2475754826  }
 0x3d9   :  { %v882_v36 = vadd.f32 1.0, %v881_v47  ;;  %v746_v5 = vsel %vm739_vm8, %v742_v45, %v745_v22  ;;  %vm895_vm3 = vcmp.eq.s32.totalorder %v893_v9, 0  ;;  %vm898_vm13 = vcmp.eq.s32.totalorder %v893_v9, 2 }
 0x3da   :  { %v890_v12 = vmul.f32 %v889_v50, %v3163_v4  ;;  %v747_v33 = vsel %vm736_vm2, nan, %v746_v5  ;;  %vm894_vm14 = vcmp.lt.s32.totalorder %v893_v9, 2  ;;  %v4046_v24 = vmov 2131351028  }
 0x3db   :  { %v899_v31 = vxor.u32 2147483648, %v882_v36  ;;  %v905_v61 = vmul.f32 %v747_v33, %v3057_v30  ;;  %v4047_v44 = vmov 2102212464  }
 0x3dc   :  { %v896_v43 = vxor.u32 2147483648, %v890_v12 }
 0x3dd   :  { %v900_v54 = vsel %vm898_vm13, %v899_v31, %v890_v12 }
 0x3de   :  { %v897_v41 = vsel %vm895_vm3, %v882_v36, %v896_v43 }
 0x3df   :  { %v901_v4 = vsel %vm894_vm14, %v897_v41, %v900_v54 }
 0x3e0   :  { %v902_v63 = vsel %vm891_vm15, nan, %v901_v4 }
 0x3e1   :  { %v906_v60 = vmul.f32 %v902_v63, %v3057_v30 }
 0x404   :  { %v3174_v37 = vpop.permute.xlu2 %907 }
 0x405   :  { %v913_v35 = vadd.f32 %v3174_v37, %v903_v59  ;;  %v914_v8 = vadd.f32 %v3174_v37, %v904_v40 }
 0x407   :  { %2355 = vmatmul.msk.f32.vlgmr.msra.gmra.mxu1 %vm41_vm0, %v913_v35 }
 0x40c   :  { %v143_v11 = vpop.permute.xlu2 %142 }
 0x40d   :  { %146 = vst.msk [vmem:[#allocation5 + $0x20] sm:$0x3] %vm145_vm11, %v143_v11 }
 0x40f   :  { %2356 = vmatmul.msk.f32.gmra.mxu1 %vm41_vm0, %v914_v8 }
 0x41e   :  { %v3194_v51 = vpop.permute.xlu1 %909 }
 0x41f   :  { %v915_v46 = vadd.f32 %v3194_v51, %v905_v61  ;;  %v916_v7 = vadd.f32 %v3194_v51, %v906_v60 }
 0x421   :  { %2357 = vmatmul.msk.f32.gmra.mxu1 %vm41_vm0, %v915_v46 }
 0x429   :  { %2358 = vmatmul.msk.f32.gmra.mxu1 %vm41_vm0, %v916_v7 }
 0x484   :  { %v952_v53 = vpop.f32.mrf.mxu1 }
 0x485   :  { %v3205_v3 = vadd.f32 %v3202_v16, %v952_v53 }
 0x487   :  { %v964_v19 = vand.u32 2147483647, %v3205_v3  ;;  %v967_v10 = vand.u32 2139095040, %v3205_v3 }
 0x489   :  { %v968_v25 = vshrl.u32 %v967_v10, 23  ;;  %v971_v0 = vand.u32 8388607, %v964_v19 }
 0x48b   :  { %v2359_v26 = vadd.s32 4294967169, %v968_v25  ;;  %v972_v59 = vor.u32 8388608, %v971_v0 }
 0x48c   :  { %v955_v6 = vpop.f32.mrf.mxu1 }
 0x48d   :  { %v974_v27 = vadd.s32 1, %v2359_v26  ;;  %v3212_v48 = vadd.f32 %v3202_v16, %v955_v6  ;;  %v3214_v18 = vshll.u32 %v972_v59, 8 }
 0x48f   :  { %vm975_vm4 = vcmp.gt.s32.totalorder %v974_v27, 0  ;;  %v1119_v35 = vand.u32 2147483647, %v3212_v48  ;;  %v1122_v20 = vand.u32 2139095040, %v3212_v48  ;;  %v1013_v14 = vand.u32 65535, %v3214_v18 }
 0x490   :  { %v976_v49 = vsel %vm975_vm4, %v974_v27, 0  ;;  %v1014_v32 = vshrl.u32 %v3214_v18, 16 }
 0x491   :  { %v978_v29 = vand.u32 31, %v976_v49  ;;  %v1123_v2 = vshrl.u32 %v1122_v20, 23  ;;  %v977_v42 = vshrl.u32 %v976_v49, 5  ;;  %v3224_v57 = vand.u32 8388607, %v1119_v35 }
 0x493   :  { %v979_v34 = vsub.s32 32, %v978_v29  ;;  %v981_v13 = vshll.u32 %v4032_v62, %v978_v29  ;;  %v984_v40 = vshll.u32 %v4045_v58, %v978_v29  ;;  %v987_v56 = vshll.u32 %v4046_v24, %v978_v29 }
 0x494   :  { %v990_v23 = vshll.u32 %v4047_v44, %v978_v29  ;;  %v993_v52 = vshll.u32 %v2478_v15, %v978_v29  ;;  %v2362_v45 = vadd.s32 4294967169, %v1123_v2  ;;  %vm996_vm5 = vcmp.lt.s32.totalorder %v977_v42, 1 }
 0x495   :  { %v982_v11 = vshrl.u32 %v4045_v58, %v979_v34  ;;  %v985_v39 = vshrl.u32 %v4046_v24, %v979_v34  ;;  %v988_v8 = vshrl.u32 %v4047_v44, %v979_v34  ;;  %v991_v55 = vshrl.u32 %v2478_v15, %v979_v34 }
 0x496   :  { %v994_v38 = vshrl.u32 %v2479_v17, %v979_v34  ;;  %vm999_vm6 = vcmp.lt.s32.totalorder %v977_v42, 4  ;;  %v980_v12 = vshrl.u32 %v4032_v62, %v979_v34  ;;  %vm998_vm9 = vcmp.lt.s32.totalorder %v977_v42, 3 }
 0x497   :  { %v983_v47 = vor.u32 %v982_v11, %v981_v13  ;;  %v986_v50 = vor.u32 %v985_v39, %v984_v40  ;;  %v989_v21 = vor.u32 %v988_v8, %v987_v56  ;;  %v992_v22 = vor.u32 %v991_v55, %v990_v23 }
 0x498   :  { %v995_v36 = vor.u32 %v994_v38, %v993_v52  ;;  %v1129_v41 = vadd.s32 1, %v2362_v45  ;;  %vm997_vm12 = vcmp.lt.s32.totalorder %v977_v42, 2  ;;  %v1127_v0 = vor.u32 8388608, %v3224_v57 }
 0x499   :  { %v1001_v9 = vsel %vm999_vm6, %v989_v21, 2102212464  ;;  %v1004_v5 = vsel %vm996_vm5, %v983_v47, %v986_v50  ;;  %v1008_v43 = vsel %vm996_vm5, %v986_v50, %v989_v21  ;;  %v1005_v31 = vsel %vm999_vm6, %v992_v22, 920167782 }
 0x49a   :  { %v1009_v33 = vsel %vm999_vm6, %v995_v36, 1326507024  ;;  %v1000_v54 = vsel %vm996_vm5, %v980_v12, %v983_v47  ;;  %v1006_v61 = vsel %vm998_vm9, %v989_v21, %v1005_v31  ;;  %v1002_v4 = vsel %vm998_vm9, %v986_v50, %v1001_v9 }
 0x49b   :  { %v1010_v46 = vsel %vm998_vm9, %v992_v22, %v1009_v33  ;;  %v1007_v63 = vsel %vm997_vm12, %v1004_v5, %v1006_v61  ;;  %vm1130_vm10 = vcmp.gt.s32.totalorder %v1129_v41, 0  ;;  %v3236_v26 = vsel %vm997_vm12, %v1000_v54, %v1002_v4 }
 0x49c   :  { %v1011_v60 = vsel %vm997_vm12, %v1008_v43, %v1010_v46  ;;  %v1037_v10 = vand.u32 65535, %v1007_v63  ;;  %v1038_v25 = vshrl.u32 %v1007_v63, 16  ;;  %v1131_v27 = vsel %vm1130_vm10, %v1129_v41, 0 }
 0x49d   :  { %v1015_v7 = vand.u32 65535, %v1011_v60  ;;  %v1016_v53 = vshrl.u32 %v1011_v60, 16  ;;  %v1133_v55 = vand.u32 31, %v1131_v27  ;;  %v3243_v22 = vshrl.u32 %v1131_v27, 5 }
 0x49e   :  { %v1040_v29 = vmul.u32 %v1038_v25, %v1013_v14  ;;  %v1041_v34 = vmul.u32 %v1037_v10, %v1014_v32  ;;  %v1039_v13 = vmul.u32 %v1037_v10, %v1013_v14  ;;  %v1042_v40 = vmul.u32 %v1038_v25, %v1014_v32 }
 0x49f   :  { %v1018_v59 = vmul.u32 %v1016_v53, %v1013_v14  ;;  %v1019_v6 = vmul.u32 %v1015_v7, %v1014_v32  ;;  %v1017_v49 = vmul.u32 %v1015_v7, %v1013_v14  ;;  %v1020_v20 = vmul.u32 %v1016_v53, %v1014_v32 }
 0x4a0   :  { %v1043_v56 = vshll.u32 %v1040_v29, 16  ;;  %v1044_v8 = vshrl.u32 %v1040_v29, 16  ;;  %v1045_v57 = vshll.u32 %v1041_v34, 16  ;;  %v1046_v38 = vshrl.u32 %v1041_v34, 16 }
 0x4a1   :  { %v1021_v2 = vshll.u32 %v1018_v59, 16  ;;  %v1022_v42 = vshrl.u32 %v1018_v59, 16  ;;  %v1023_v11 = vshll.u32 %v1019_v6, 16  ;;  %v1024_v39 = vshrl.u32 %v1019_v6, 16 }
 0x4a2   :  { %vm1047_vm7 = vc.u32 %v1039_v13, %v1043_v56  ;;  %v1049_v47 = vadd.s32 %v1043_v56, %v1039_v13  ;;  %v3240_v45 = vsub.s32 32, %v1133_v55  ;;  %v1136_v5 = vshll.u32 %v4032_v62, %v1133_v55 }
 0x4a3   :  { %vm1025_vm11 = vc.u32 %v1017_v49, %v1021_v2  ;;  %v1027_v23 = vadd.s32 %v1021_v2, %v1017_v49  ;;  %v1048_v21 = vsel %vm1047_vm7, 1, %v4031_v1  ;;  %v1139_v33 = vshll.u32 %v4045_v58, %v1133_v55 }
 0x4a4   :  { %v1026_v52 = vsel %vm1025_vm11, 1, %v4031_v1  ;;  %v1050_v32 = vadd.s32 %v1048_v21, %v1042_v40  ;;  %vm1051_vm8 = vc.u32 %v1049_v47, %v1045_v57  ;;  %v3246_v9 = vadd.s32 %v1049_v47, %v1045_v57  ;;  %v958_v21 = vpop.f32.mrf.mxu1 }
 0x4a5   :  { %v1028_v50 = vadd.s32 %v1026_v52, %v1020_v20  ;;  %vm1029_vm1 = vc.u32 %v1027_v23, %v1023_v11  ;;  %v1052_v12 = vsel %vm1051_vm8, 1, %v4031_v1  ;;  %v1137_v31 = vshrl.u32 %v4045_v58, %v3240_v45 }
 0x4a6   :  { %v1030_v14 = vsel %vm1029_vm1, 1, %v4031_v1  ;;  %v1054_v43 = vadd.s32 %v1052_v12, %v1050_v32  ;;  %v1140_v41 = vshrl.u32 %v4046_v24, %v3240_v45  ;;  %v1142_v61 = vshll.u32 %v4046_v24, %v1133_v55 }
 0x4a7   :  { %v1032_v36 = vadd.s32 %v1030_v14, %v1028_v50  ;;  %v1143_v46 = vshrl.u32 %v4047_v44, %v3240_v45  ;;  %v1145_v4 = vshll.u32 %v4047_v44, %v1133_v55  ;;  %v3258_v60 = vor.u32 %v1137_v31, %v1136_v5 }
 0x4a8   :  { %v1055_v63 = vadd.s32 %v1054_v43, %v1044_v8  ;;  %v3260_v7 = vor.u32 %v1140_v41, %v1139_v33  ;;  %v1146_v53 = vshrl.u32 %v2478_v15, %v3240_v45  ;;  %v1148_v59 = vshll.u32 %v2478_v15, %v1133_v55 }
 0x4a9   :  { %v1033_v54 = vadd.s32 %v1032_v36, %v1022_v42  ;;  %v1144_v25 = vor.u32 %v1143_v46, %v1142_v61  ;;  %v1149_v6 = vshrl.u32 %v2479_v17, %v3240_v45  ;;  %vm1151_vm3 = vcmp.lt.s32.totalorder %v3243_v22, 1 }
 0x4aa   :  { %v1056_v27 = vadd.s32 %v1055_v63, %v1046_v38  ;;  %v1147_v49 = vor.u32 %v1146_v53, %v1145_v4  ;;  %v3272_v29 = vshll.u32 %v1127_v0, 8  ;;  %v1057_v34 = vmul.u32 %v3214_v18, %v3236_v26 }
 0x4ab   :  { %v3264_v10 = vadd.s32 %v1033_v54, %v1024_v39  ;;  %v1150_v20 = vor.u32 %v1149_v6, %v1148_v59  ;;  %vm1154_vm13 = vcmp.lt.s32.totalorder %v3243_v22, 4  ;;  %v1159_v42 = vsel %vm1151_vm3, %v3258_v60, %v3260_v7 }
 0x4ac   :  { %v1060_v2 = vadd.s32 1, %v1056_v27  ;;  %vm1153_vm14 = vcmp.lt.s32.totalorder %v3243_v22, 3  ;;  %v1160_v13 = vsel %vm1154_vm13, %v1147_v49, 920167782  ;;  %v1163_v0 = vsel %vm1151_vm3, %v3260_v7, %v1144_v25 }
 0x4ad   :  { %vm1059_vm2 = vc.u32 %v3264_v10, %v3246_v9  ;;  %v1164_v18 = vsel %vm1154_vm13, %v1150_v20, 1326507024  ;;  %vm1152_vm15 = vcmp.lt.s32.totalorder %v3243_v22, 2  ;;  %v1161_v40 = vsel %vm1153_vm14, %v1144_v25, %v1160_v13 }
 0x4ae   :  { %v1061_v26 = vsel %vm1059_vm2, %v1060_v2, %v1056_v27  ;;  %v1165_v11 = vsel %vm1153_vm14, %v1147_v49, %v1164_v18  ;;  %v1162_v56 = vsel %vm1152_vm15, %v1159_v42, %v1161_v40  ;;  %v1168_v23 = vand.u32 65535, %v3272_v29 }
 0x4af   :  { %v1062_v39 = vadd.s32 %v1061_v26, %v1057_v34  ;;  %v1166_v8 = vsel %vm1152_vm15, %v1163_v0, %v1165_v11  ;;  %v1169_v57 = vshrl.u32 %v3272_v29, 16  ;;  %v1193_v38 = vshrl.u32 %v1162_v56, 16 }
 0x4b0   :  { %v1170_v55 = vand.u32 65535, %v1166_v8  ;;  %v1171_v52 = vshrl.u32 %v1166_v8, 16  ;;  %v1192_v50 = vand.u32 65535, %v1162_v56  ;;  %v3301_v31 = vadd.f32 %v3202_v16, %v958_v21 }
 0x4b1   :  { %v1063_v47 = vadd.s32 536870912, %v1062_v39  ;;  %v1195_v12 = vmul.u32 %v1193_v38, %v1168_v23  ;;  %v1135_v59 = vshrl.u32 %v4032_v62, %v3240_v45  ;;  %v1156_v6 = vsel %vm1154_vm13, %v1144_v25, 2102212464 }
 0x4b2   :  { %v1173_v14 = vmul.u32 %v1171_v52, %v1168_v23  ;;  %v1174_v32 = vmul.u32 %v1170_v55, %v1169_v57  ;;  %v1172_v5 = vmul.u32 %v1170_v55, %v1168_v23  ;;  %v1175_v41 = vmul.u32 %v1171_v52, %v1169_v57 }
 0x4b3   :  { %v1064_v36 = vshrl.u32 %v1063_v47, 30  ;;  %v1194_v54 = vmul.u32 %v1192_v50, %v1168_v23  ;;  %v1198_v61 = vshll.u32 %v1195_v12, 16  ;;  %v1196_v63 = vmul.u32 %v1192_v50, %v1169_v57 }
 0x4b4   :  { %v1176_v43 = vshll.u32 %v1173_v14, 16  ;;  %v1178_v46 = vshll.u32 %v1174_v32, 16  ;;  %v1177_v49 = vshrl.u32 %v1173_v14, 16  ;;  %v1197_v42 = vmul.u32 %v1193_v38, %v1169_v57 }
 0x4b5   :  { %v1065_v33 = vshll.u32 %v1064_v36, 30  ;;  %vm1202_vm6 = vc.u32 %v1194_v54, %v1198_v61  ;;  %v1200_v0 = vshll.u32 %v1196_v63, 16  ;;  %v1204_v26 = vadd.s32 %v1198_v61, %v1194_v54 }
 0x4b6   :  { %vm1180_vm4 = vc.u32 %v1172_v5, %v1176_v43  ;;  %v1182_v4 = vadd.s32 %v1176_v43, %v1172_v5  ;;  %v1203_v18 = vsel %vm1202_vm6, 1, %v4031_v1  ;;  %v1274_v25 = vand.u32 2147483647, %v3301_v31 }
 0x4b7   :  { %v1066_v53 = vsub.s32 %v1062_v39, %v1065_v33  ;;  %v1181_v27 = vsel %vm1180_vm4, 1, %v4031_v1  ;;  %v1205_v40 = vadd.s32 %v1203_v18, %v1197_v42  ;;  %v1277_v11 = vand.u32 2139095040, %v3301_v31 }
 0x4b8   :  { %v1183_v20 = vadd.s32 %v1181_v27, %v1175_v41  ;;  %vm1184_vm5 = vc.u32 %v1182_v4, %v1178_v46  ;;  %v1155_v56 = vsel %vm1151_vm3, %v1135_v59, %v3258_v60  ;;  %vm1206_vm12 = vc.u32 %v1204_v26, %v1200_v0 }
 0x4b9   :  { %vm1067_vm9 = vcmp.lt.s32.totalorder %v1066_v53, 0  ;;  %v1068_v34 = vsub.s32 0, %v1066_v53  ;;  %v1185_v2 = vsel %vm1184_vm5, 1, %v4031_v1  ;;  %v1157_v23 = vsel %vm1153_vm14, %v3260_v7, %v1156_v6 }
 0x4ba   :  { %v1187_v13 = vadd.s32 %v1185_v2, %v1183_v20  ;;  %v1179_v57 = vshrl.u32 %v1174_v32, 16  ;;  %v1207_v55 = vsel %vm1206_vm12, 1, %v4031_v1  ;;  %v1278_v52 = vshrl.u32 %v1277_v11, 23  ;;  %v961_v20 = vpop.f32.mrf.mxu1 }
 0x4bb   :  { %v1069_v45 = vsel %vm1067_vm9, %v1068_v34, %v1066_v53  ;;  %v1088_v47 = vsub.s32 4, %v1064_v36  ;;  %v1199_v50 = vshrl.u32 %v1195_v12, 16  ;;  %v1209_v21 = vadd.s32 %v1207_v55, %v1205_v40 }
 0x4bc   :  { %v1070_v39 = vclz %v1069_v45  ;;  %v1188_v8 = vadd.s32 %v1187_v13, %v1177_v49  ;;  %vm966_vm10 = vcmp.lt.s32.totalorder %v3205_v3, 0  ;;  %v2365_v5 = vadd.s32 4294967169, %v1278_v52 }
 0x4bd   :  { %v1281_v60 = vand.u32 8388607, %v1274_v25  ;;  %v1058_v43 = vadd.s32 %v3246_v9, %v3264_v10  ;;  %v1201_v7 = vshrl.u32 %v1196_v63, 16  ;;  %v1210_v32 = vadd.s32 %v1209_v21, %v1199_v50 }
 0x4be   :  { %v2360_v38 = vadd.s32 4294967294, %v1070_v39  ;;  %v1189_v14 = vadd.s32 %v1188_v8, %v1179_v57  ;;  %v1158_v41 = vsel %vm1152_vm15, %v1155_v56, %v1157_v23  ;;  %v1208_v54 = vadd.s32 %v1204_v26, %v1200_v0 }
 0x4bf   :  { %v1284_v12 = vadd.s32 1, %v2365_v5  ;;  %v1089_v4 = vsel %vm966_vm10, %v1088_v47, %v1064_v36  ;;  %v1211_v59 = vadd.s32 %v1210_v32, %v1201_v7  ;;  %v1282_v27 = vor.u32 8388608, %v1281_v60 }
 0x4c0   :  { %vm2361_vm11 = vcmp.lt.s32.totalorder %v2360_v38, 0  ;;  %vm1214_vm7 = vc.u32 %v1189_v14, %v1208_v54  ;;  %vm3330_vm8 = vcmp.le.f32.partialorder %v964_v19, 0.7853982  ;;  %v1212_v34 = vmul.u32 %v3272_v29, %v1158_v41 }
 0x4c1   :  { %v1073_v33 = vsel %vm2361_vm11, 0, %v2360_v38  ;;  %vm1285_vm1 = vcmp.gt.s32.totalorder %v1284_v12, 0  ;;  %v1215_v63 = vadd.s32 1, %v1211_v59  ;;  %v3337_v26 = vshll.u32 %v1282_v27, 8 }
 0x4c2   :  { %v1074_v61 = vsub.s32 32, %v1073_v33  ;;  %v1078_v46 = vsub.s32 4294967266, %v1073_v33  ;;  %v1075_v6 = vshll.u32 %v1066_v53, %v1073_v33  ;;  %v1286_v49 = vsel %vm1285_vm1, %v1284_v12, 0 }
 0x4c3   :  { %v1288_v2 = vand.u32 31, %v1286_v49  ;;  %v1091_v53 = vsel %vm3330_vm8, 0, %v1089_v4  ;;  %v1216_v13 = vsel %vm1214_vm7, %v1215_v63, %v1211_v59  ;;  %v3340_v45 = vadd.f32 %v3202_v16, %v961_v20 }
 0x4c4   :  { %v1076_v9 = vshrl.u32 %v1058_v43, %v1074_v61  ;;  %v1079_v10 = vadd.s32 127, %v1078_v46  ;;  %v1217_v0 = vadd.s32 %v1216_v13, %v1212_v34  ;;  %v3342_v40 = vshrl.u32 %v1286_v49, 5 }
 0x4c5   :  { %v1289_v18 = vsub.s32 32, %v1288_v2  ;;  %v1291_v11 = vshll.u32 %v4032_v62, %v1288_v2  ;;  %v1294_v29 = vshll.u32 %v4045_v58, %v1288_v2  ;;  %v1300_v52 = vshll.u32 %v4047_v44, %v1288_v2 }
 0x4c6   :  { %v1077_v36 = vor.u32 %v1076_v9, %v1075_v6  ;;  %v1080_v42 = vshll.u32 %v1079_v10, 23  ;;  %v1218_v56 = vadd.s32 536870912, %v1217_v0  ;;  %v1297_v47 = vshll.u32 %v4046_v24, %v1288_v2 }
 0x4c7   :  { %v1292_v8 = vshrl.u32 %v4045_v58, %v1289_v18  ;;  %v1295_v23 = vshrl.u32 %v4046_v24, %v1289_v18  ;;  %v1298_v55 = vshrl.u32 %v4047_v44, %v1289_v18  ;;  %v1301_v16 = vshrl.u32 %v2478_v15, %v1289_v18 }
 0x4c8   :  { %v1081_v19 = vor.u32 4788187, %v1080_v42  ;;  %v1084_v39 = vcvt.s32.f32 %v1077_v36  ;;  %v3351_v38 = vshrl.u32 %v1218_v56, 30  ;;  %v1303_v50 = vshll.u32 %v2478_v15, %v1288_v2 }
 0x4c9   :  { %v1304_v21 = vshrl.u32 %v2479_v17, %v1289_v18  ;;  %v3356_v60 = vor.u32 %v1292_v8, %v1291_v11  ;;  %v3358_v43 = vor.u32 %v1295_v23, %v1294_v29  ;;  %v1302_v7 = vor.u32 %v1301_v16, %v1300_v52 }
 0x4ca   :  { %v1082_v57 = vand.u32 2147483647, %v1081_v19  ;;  %v3360_v32 = vadd.s32 3, %v1091_v53  ;;  %v1220_v33 = vshll.u32 %v3351_v38, 30  ;;  %v1299_v41 = vor.u32 %v1298_v55, %v1297_v47 }
 0x4cb   :  { %v1429_v12 = vand.u32 2147483647, %v3340_v45  ;;  %v1213_v46 = vadd.s32 %v1208_v54, %v1189_v14  ;;  %v1305_v4 = vor.u32 %v1304_v21, %v1303_v50  ;;  %v1323_v59 = vand.u32 65535, %v3337_v26 }
 0x4cc   :  { %v1085_v5 = vmul.f32 %v1084_v39, %v1082_v57  ;;  %v3365_v6 = vsub.s32 %v1217_v0, %v1220_v33  ;;  %vm1306_vm2 = vcmp.lt.s32.totalorder %v3342_v40, 1  ;;  %vm1309_vm3 = vcmp.lt.s32.totalorder %v3342_v40, 4 }
 0x4cd   :  { %v1432_v27 = vand.u32 2139095040, %v3340_v45  ;;  %vm1308_vm13 = vcmp.lt.s32.totalorder %v3342_v40, 3  ;;  %v1314_v14 = vsel %vm1306_vm2, %v3356_v60, %v3358_v43  ;;  %v1315_v54 = vsel %vm1309_vm3, %v1302_v7, 920167782 }
 0x4ce   :  { %v1086_v61 = vxor.u32 2147483648, %v1085_v5  ;;  %vm1222_vm14 = vcmp.lt.s32.totalorder %v3365_v6, 0  ;;  %v1223_v63 = vsub.s32 0, %v3365_v6  ;;  %v1318_v49 = vsel %vm1306_vm2, %v3358_v43, %v1299_v41 }
 0x4cf   :  { %vm1307_vm15 = vcmp.lt.s32.totalorder %v3342_v40, 2  ;;  %v1316_v34 = vsel %vm1308_vm13, %v1299_v41, %v1315_v54  ;;  %v1319_v22 = vsel %vm1309_vm3, %v1305_v4, 1326507024  ;;  %v1433_v53 = vshrl.u32 %v1432_v27, 23 }
 0x4d0   :  { %v1087_v9 = vsel %vm966_vm10, %v1086_v61, %v1085_v5  ;;  %v1224_v2 = vsel %vm1222_vm14, %v1223_v63, %v3365_v6  ;;  %v1317_v36 = vsel %vm1307_vm15, %v1314_v14, %v1316_v34  ;;  %v1320_v42 = vsel %vm1308_vm13, %v1302_v7, %v1319_v22 }
 0x4d1   :  { %v3382_v10 = vsel %vm3330_vm8, %v3205_v3, %v1087_v9  ;;  %v1225_v0 = vclz %v1224_v2  ;;  %v1321_v19 = vsel %vm1307_vm15, %v1318_v49, %v1320_v42  ;;  %v1347_v11 = vand.u32 65535, %v1317_v36 }
 0x4d2   :  { %v3391_v20 = vmul.f32 %v3382_v10, %v3382_v10  ;;  %v1324_v29 = vshrl.u32 %v3337_v26, 16  ;;  %v1325_v39 = vand.u32 65535, %v1321_v19  ;;  %v1326_v56 = vshrl.u32 %v1321_v19, 16 }
 0x4d3   :  { %v1348_v8 = vshrl.u32 %v1317_v36, 16  ;;  %v2363_v57 = vadd.s32 4294967294, %v1225_v0  ;;  %v1243_v55 = vsub.s32 4, %v3351_v38  ;;  %v1290_v52 = vshrl.u32 %v4032_v62, %v1289_v18 }
 0x4d4   :  { %v1100_v13 = vmul.f32 -0.00019511016, %v3391_v20  ;;  %v1311_v16 = vsel %vm1309_vm3, %v1299_v41, 2102212464  ;;  %v1328_v47 = vmul.u32 %v1326_v56, %v1323_v59  ;;  %v1329_v50 = vmul.u32 %v1325_v39, %v1324_v29 }
 0x4d5   :  { %v2368_v21 = vadd.s32 4294967169, %v1433_v53  ;;  %vm2364_vm4 = vcmp.lt.s32.totalorder %v2363_v57, 0  ;;  %v1349_v7 = vmul.u32 %v1347_v11, %v1323_v59  ;;  %v1350_v33 = vmul.u32 %v1348_v8, %v1323_v59 }
 0x4d6   :  { %v1101_v23 = vadd.f32 0.008332121, %v1100_v13  ;;  %v1228_v61 = vsel %vm2364_vm4, 0, %v2363_v57  ;;  %v1327_v4 = vmul.u32 %v1325_v39, %v1323_v59  ;;  %v1331_v27 = vshll.u32 %v1328_v47, 16 }
 0x4d7   :  { %v1351_v9 = vmul.u32 %v1347_v11, %v1324_v29  ;;  %v1229_v54 = vsub.s32 32, %v1228_v61  ;;  %v1233_v63 = vsub.s32 4294967266, %v1228_v61  ;;  %v1330_v49 = vmul.u32 %v1326_v56, %v1324_v29 }
 0x4d8   :  { %v1102_v5 = vmul.f32 %v1101_v23, %v3391_v20  ;;  %v1333_v18 = vshll.u32 %v1329_v50, 16  ;;  %vm1335_vm5 = vc.u32 %v1327_v4, %v1331_v27  ;;  %v1337_v34 = vadd.s32 %v1331_v27, %v1327_v4 }
 0x4d9   :  { %v1353_v41 = vshll.u32 %v1350_v33, 16  ;;  %v1230_v22 = vshll.u32 %v3365_v6, %v1228_v61  ;;  %v1231_v2 = vshrl.u32 %v1213_v46, %v1229_v54  ;;  %v1234_v36 = vadd.s32 127, %v1233_v63 }
 0x4da   :  { %v1103_v14 = vadd.f32 -0.16666654, %v1102_v5  ;;  %v1336_v42 = vsel %vm1335_vm5, 1, %v4031_v1  ;;  %vm1121_vm6 = vcmp.lt.s32.totalorder %v3212_v48, 0  ;;  %v1332_v53 = vshrl.u32 %v1328_v47, 16 }
 0x4db   :  { %v1338_v59 = vadd.s32 %v1336_v42, %v1330_v49  ;;  %vm1339_vm9 = vc.u32 %v1337_v34, %v1333_v18  ;;  %v1352_v13 = vmul.u32 %v1348_v8, %v1324_v29  ;;  %v1232_v19 = vor.u32 %v1231_v2, %v1230_v22 }
 0x4dc   :  { %v1104_v0 = vmul.f32 %v1103_v14, %v3391_v20  ;;  %v1235_v11 = vshll.u32 %v1234_v36, 23  ;;  %v1340_v39 = vsel %vm1339_vm9, 1, %v4031_v1  ;;  %v1355_v23 = vshll.u32 %v1351_v9, 16 }
 0x4dd   :  { %v1342_v56 = vadd.s32 %v1340_v39, %v1338_v59  ;;  %vm1357_vm12 = vc.u32 %v1349_v7, %v1353_v41  ;;  %v1359_v6 = vadd.s32 %v1353_v41, %v1349_v7  ;;  %vm3419_vm10 = vcmp.le.f32.partialorder %v1119_v35, 0.7853982 }
 0x4de   :  { %v1236_v57 = vor.u32 4788187, %v1235_v11  ;;  %v1310_v29 = vsel %vm1306_vm2, %v1290_v52, %v3356_v60  ;;  %v1312_v8 = vsel %vm1308_vm13, %v3358_v43, %v1311_v16  ;;  %v1358_v47 = vsel %vm1357_vm12, 1, %v4031_v1 }
 0x4df   :  { %v1334_v5 = vshrl.u32 %v1329_v50, 16  ;;  %v1343_v61 = vadd.s32 %v1342_v56, %v1332_v53  ;;  %v1360_v7 = vadd.s32 %v1358_v47, %v1352_v13  ;;  %vm1361_vm11 = vc.u32 %v1359_v6, %v1355_v23 }
 0x4e0   :  { %v1237_v4 = vand.u32 2147483647, %v1236_v57  ;;  %v1239_v35 = vcvt.s32.f32 %v1232_v19  ;;  %v1362_v27 = vsel %vm1361_vm11, 1, %v4031_v1  ;;  %v1439_v14 = vadd.s32 1, %v2368_v21 }
 0x4e1   :  { %v1105_v54 = vadd.f32 1.0, %v1104_v0  ;;  %v1354_v63 = vshrl.u32 %v1350_v33, 16  ;;  %v1364_v49 = vadd.s32 %v1362_v27, %v1360_v7  ;;  %v1436_v60 = vand.u32 8388607, %v1429_v12 }
 0x4e2   :  { %v1240_v52 = vmul.f32 %v1239_v35, %v1237_v4  ;;  %v1313_v43 = vsel %vm1307_vm15, %v1310_v29, %v1312_v8  ;;  %v1344_v16 = vadd.s32 %v1343_v61, %v1334_v5  ;;  %vm1440_vm7 = vcmp.gt.s32.totalorder %v1439_v14, 0 }
 0x4e3   :  { %v3436_v50 = vand.u32 3, %v3360_v32  ;;  %v1356_v18 = vshrl.u32 %v1351_v9, 16  ;;  %v1365_v34 = vadd.s32 %v1364_v49, %v1354_v63  ;;  %v1441_v41 = vsel %vm1440_vm7, %v1439_v14, 0 }
 0x4e4   :  { %v1241_v22 = vxor.u32 2147483648, %v1240_v52  ;;  %v3443_v21 = vsel %vm1121_vm6, %v1243_v55, %v3351_v38  ;;  %v1363_v33 = vadd.s32 %v1359_v6, %v1355_v23  ;;  %v1443_v2 = vand.u32 31, %v1441_v41 }
 0x4e5   :  { %v3446_v40 = vmul.f32 %v1105_v54, %v3382_v10  ;;  %v1366_v36 = vadd.s32 %v1365_v34, %v1356_v18  ;;  %v1367_v32 = vmul.u32 %v3337_v26, %v1313_v43  ;;  %v1437_v42 = vor.u32 8388608, %v1436_v60 }
 0x4e6   :  { %v1242_v9 = vsel %vm1121_vm6, %v1241_v22, %v1240_v52  ;;  %vm1369_vm1 = vc.u32 %v1344_v16, %v1363_v33  ;;  %v3451_v53 = vshrl.u32 %v1441_v41, 5  ;;  %v1444_v59 = vsub.s32 32, %v1443_v2 }
 0x4e7   :  { %v3456_v38 = vsel %vm3419_vm10, %v3212_v48, %v1242_v9  ;;  %v1370_v55 = vadd.s32 1, %v1366_v36  ;;  %v1446_v10 = vshll.u32 %v4032_v62, %v1443_v2  ;;  %v1449_v13 = vshll.u32 %v4045_v58, %v1443_v2 }
 0x4e8   :  { %v3462_v26 = vmul.f32 %v3456_v38, %v3456_v38  ;;  %v1447_v0 = vshrl.u32 %v4045_v58, %v1444_v59  ;;  %v1450_v19 = vshrl.u32 %v4046_v24, %v1444_v59  ;;  %v1452_v11 = vshll.u32 %v4046_v24, %v1443_v2 }
 0x4e9   :  { %v1371_v39 = vsel %vm1369_vm1, %v1370_v55, %v1366_v36  ;;  %v1453_v56 = vshrl.u32 %v4047_v44, %v1444_v59  ;;  %v1455_v23 = vshll.u32 %v4047_v44, %v1443_v2  ;;  %v1456_v6 = vshrl.u32 %v2478_v15, %v1444_v59 }
 0x4ea   :  { %v1255_v57 = vmul.f32 -0.00019511016, %v3462_v26  ;;  %v1372_v29 = vadd.s32 %v1371_v39, %v1367_v32  ;;  %v1448_v8 = vor.u32 %v1447_v0, %v1446_v10  ;;  %v1451_v47 = vor.u32 %v1450_v19, %v1449_v13 }
 0x4eb   :  { %v1454_v5 = vor.u32 %v1453_v56, %v1452_v11  ;;  %v1457_v61 = vor.u32 %v1456_v6, %v1455_v23  ;;  %v1458_v7 = vshll.u32 %v2478_v15, %v1443_v2  ;;  %v1459_v4 = vshrl.u32 %v2479_v17, %v1444_v59 }
 0x4ec   :  { %v1112_v35 = vxor.u32 2147483648, %v3446_v40  ;;  %v1256_v27 = vadd.f32 0.008332121, %v1255_v57  ;;  %v1373_v14 = vadd.s32 536870912, %v1372_v29  ;;  %v3474_v54 = vshll.u32 %v1437_v42, 8 }
 0x4ed   :  { %v1460_v63 = vor.u32 %v1459_v4, %v1458_v7  ;;  %vm1461_vm8 = vcmp.lt.s32.totalorder %v3451_v53, 1  ;;  %vm1463_vm2 = vcmp.lt.s32.totalorder %v3451_v53, 3  ;;  %vm1464_vm3 = vcmp.lt.s32.totalorder %v3451_v53, 4 }
 0x4ee   :  { %v1257_v49 = vmul.f32 %v1256_v27, %v3462_v26  ;;  %v3480_v60 = vshrl.u32 %v1373_v14, 30  ;;  %v1469_v52 = vsel %vm1461_vm8, %v1448_v8, %v1451_v47  ;;  %v1470_v43 = vsel %vm1464_vm3, %v1457_v61, 920167782 }
 0x4ef   :  { %v3484_v18 = vadd.s32 %v1363_v33, %v1344_v16  ;;  %v1471_v34 = vsel %vm1463_vm2, %v1454_v5, %v1470_v43  ;;  %v1473_v41 = vsel %vm1461_vm8, %v1451_v47, %v1454_v5  ;;  %v1474_v22 = vsel %vm1464_vm3, %v1460_v63, 1326507024 }
 0x4f0   :  { %v1258_v2 = vadd.f32 -0.16666654, %v1257_v49  ;;  %v1375_v36 = vshll.u32 %v3480_v60, 30  ;;  %vm1462_vm13 = vcmp.lt.s32.totalorder %v3451_v53, 2  ;;  %v1478_v32 = vand.u32 65535, %v3474_v54 }
 0x4f1   :  { %v1466_v42 = vsel %vm1464_vm3, %v1454_v5, 2102212464  ;;  %v1472_v9 = vsel %vm1462_vm13, %v1469_v52, %v1471_v34  ;;  %v1475_v16 = vsel %vm1463_vm2, %v1457_v61, %v1474_v22  ;;  %v1479_v33 = vshrl.u32 %v3474_v54, 16 }
 0x4f2   :  { %v1259_v55 = vmul.f32 %v1258_v2, %v3462_v26  ;;  %v3499_v10 = vsub.s32 %v1372_v29, %v1375_v36  ;;  %v1476_v13 = vsel %vm1462_vm13, %v1473_v41, %v1475_v16  ;;  %v1093_v0 = vmul.f32 -0.001358992, %v3391_v20 }
 0x4f3   :  { %v1445_v19 = vshrl.u32 %v4032_v62, %v1444_v59  ;;  %v1480_v11 = vand.u32 65535, %v1476_v13  ;;  %v1481_v39 = vshrl.u32 %v1476_v13, 16  ;;  %v1503_v56 = vshrl.u32 %v1472_v9, 16 }
 0x4f4   :  { %vm1377_vm14 = vcmp.lt.s32.totalorder %v3499_v10, 0  ;;  %v1378_v23 = vsub.s32 0, %v3499_v10  ;;  %v1502_v6 = vand.u32 65535, %v1472_v9  ;;  %v1246_v57 = vsel %vm3419_vm10, 0, %v3443_v21 }
 0x4f5   :  { %v3512_v29 = vsel %vm1461_vm8, %v1445_v19, %v1448_v8  ;;  %v3516_v5 = vsel %vm1463_vm2, %v1451_v47, %v1466_v42  ;;  %v1483_v59 = vmul.u32 %v1481_v39, %v1478_v32  ;;  %v1484_v61 = vmul.u32 %v1480_v11, %v1479_v33 }
 0x4f6   :  { %v3518_v7 = vadd.f32 1.0, %v1259_v55  ;;  %v1379_v4 = vsel %vm1377_vm14, %v1378_v23, %v3499_v10  ;;  %v1505_v27 = vmul.u32 %v1503_v56, %v1478_v32  ;;  %v1094_v14 = vadd.f32 0.041655596, %v1093_v0  ;;  %v1595_v55 = vld [vmem:[#allocation2 + $0xe8] sm:$0xff] }
 0x4f7   :  { %v1380_v63 = vclz %v1379_v4  ;;  %v1482_v49 = vmul.u32 %v1480_v11, %v1478_v32  ;;  %v1485_v46 = vmul.u32 %v1481_v39, %v1479_v33  ;;  %v1486_v21 = vshll.u32 %v1483_v59, 16  ;;  %1622 = vmatpush.msrb.mxu2 %v1595_v55 }
 0x4f8   :  { %v1487_v52 = vshrl.u32 %v1483_v59, 16  ;;  %v1504_v43 = vmul.u32 %v1502_v6, %v1478_v32  ;;  %v1506_v8 = vmul.u32 %v1502_v6, %v1479_v33  ;;  %v1508_v34 = vshll.u32 %v1505_v27, 16  ;;  %v1594_v59 = vld [vmem:[#allocation2 + $0xe0] sm:$0xff] }
 0x4f9   :  { %v2366_v41 = vadd.s32 4294967294, %v1380_v63  ;;  %v1488_v22 = vshll.u32 %v1484_v61, 16  ;;  %vm1490_vm15 = vc.u32 %v1482_v49, %v1486_v21  ;;  %v1492_v47 = vadd.s32 %v1486_v21, %v1482_v49  ;;  %1623 = vmatpush.msrb.mxu2 %v1594_v59 }
 0x4fa   :  { %v1491_v2 = vsel %vm1490_vm15, 1, %v4031_v1  ;;  %v1507_v36 = vmul.u32 %v1503_v56, %v1479_v33  ;;  %v1510_v42 = vshll.u32 %v1506_v8, 16  ;;  %vm1512_vm4 = vc.u32 %v1504_v43, %v1508_v34 }
 0x4fb   :  { %vm2367_vm5 = vcmp.lt.s32.totalorder %v2366_v41, 0  ;;  %v1493_v9 = vadd.s32 %v1491_v2, %v1485_v46  ;;  %vm1494_vm6 = vc.u32 %v1492_v47, %v1488_v22  ;;  %v1513_v16 = vsel %vm1512_vm4, 1, %v4031_v1 }
 0x4fc   :  { %v1383_v13 = vsel %vm2367_vm5, 0, %v2366_v41  ;;  %v1495_v32 = vsel %vm1494_vm6, 1, %v4031_v1  ;;  %v1514_v0 = vadd.s32 %v1508_v34, %v1504_v43  ;;  %v1515_v19 = vadd.s32 %v1513_v16, %v1507_v36  ;;  %v1593_v43 = vld [vmem:[#allocation2 + $0xd8] sm:$0xff]  ;;  %v1592_v36 = vld [vmem:[#allocation2 + $0xd0] sm:$0xff] }
 0x4fd   :  { %v1384_v11 = vsub.s32 32, %v1383_v13  ;;  %v1388_v39 = vsub.s32 4294967266, %v1383_v13  ;;  %v1489_v23 = vshrl.u32 %v1484_v61, 16  ;;  %v1497_v6 = vadd.s32 %v1495_v32, %v1493_v9  ;;  %1624 = vmatpush.msrb.mxu2 %v1593_v43 }
 0x4fe   :  { %v1385_v33 = vshll.u32 %v3499_v10, %v1383_v13  ;;  %vm1516_vm9 = vc.u32 %v1514_v0, %v1510_v42  ;;  %v1095_v56 = vmul.f32 %v1094_v14, %v3391_v20  ;;  %v1248_v4 = vmul.f32 -0.001358992, %v3462_v26 }
 0x4ff   :  { %v1386_v63 = vshrl.u32 %v3484_v18, %v1384_v11  ;;  %v1389_v49 = vadd.s32 127, %v1388_v39  ;;  %v1498_v46 = vadd.s32 %v1497_v6, %v1487_v52  ;;  %v1517_v21 = vsel %vm1516_vm9, 1, %v4031_v1  ;;  %1625 = vmatpush.msrb.mxu2 %v1592_v36 }
 0x500   :  { %v1509_v34 = vshrl.u32 %v1505_v27, 16  ;;  %v1519_v41 = vadd.s32 %v1517_v21, %v1515_v19  ;;  %v1096_v61 = vadd.f32 -0.4999988, %v1095_v56  ;;  %v1249_v22 = vadd.f32 0.041655596, %v1248_v4 }
 0x501   :  { %v1387_v47 = vor.u32 %v1386_v63, %v1385_v33  ;;  %v1390_v10 = vshll.u32 %v1389_v49, 23  ;;  %v3529_v2 = vadd.s32 %v1498_v46, %v1489_v23  ;;  %vm1107_vm12 = vweird.f32 %v3205_v3 }
 0x502   :  { %v1263_v14 = vadd.s32 3, %v1246_v57  ;;  %vm1276_vm10 = vcmp.lt.s32.totalorder %v3301_v31, 0  ;;  %v1511_v18 = vshrl.u32 %v1506_v8, 16  ;;  %v1520_v52 = vadd.s32 %v1519_v41, %v1509_v34 }
 0x503   :  { %v1097_v9 = vmul.f32 %v1096_v61, %v3391_v20  ;;  %v1250_v27 = vmul.f32 %v1249_v22, %v3462_v26  ;;  %vm3537_vm11 = vcmp.le.f32.partialorder %v1274_v25, 0.7853982  ;;  %v1391_v55 = vor.u32 4788187, %v1390_v10 }
 0x504   :  { %v1468_v57 = vsel %vm1462_vm13, %v3512_v29, %v3516_v5  ;;  %v3545_v13 = vadd.s32 %v1514_v0, %v1510_v42  ;;  %vm1111_vm7 = vcmp.eq.s32.totalorder %v3436_v50, 0  ;;  %v1261_v20 = vmul.f32 %v3518_v7, %v3456_v38 }
 0x505   :  { %v1521_v8 = vadd.s32 %v1520_v52, %v1511_v18  ;;  %v1098_v32 = vadd.f32 1.0, %v1097_v9  ;;  %v1251_v19 = vadd.f32 -0.4999988, %v1250_v27  ;;  %v1392_v25 = vand.u32 2147483647, %v1391_v55 }
 0x506   :  { %v1394_v11 = vcvt.s32.f32 %v1387_v47  ;;  %vm1524_vm1 = vc.u32 %v3529_v2, %v3545_v13  ;;  %v1264_v39 = vand.u32 3, %v1263_v14  ;;  %v1522_v0 = vmul.u32 %v3474_v54, %v1468_v57 }
 0x507   :  { %v1525_v23 = vadd.s32 1, %v1521_v8  ;;  %v1113_v53 = vsel %vm1111_vm7, %v1098_v32, %v1112_v35  ;;  %v1115_v29 = vxor.u32 2147483648, %v1098_v32  ;;  %v1252_v5 = vmul.f32 %v1251_v19, %v3462_v26 }
 0x508   :  { %v1395_v42 = vmul.f32 %v1394_v11, %v1392_v25  ;;  %vm1114_vm8 = vcmp.eq.s32.totalorder %v3436_v50, 2  ;;  %vm1262_vm2 = vweird.f32 %v3212_v48  ;;  %vm1110_vm3 = vcmp.lt.s32.totalorder %v3436_v50, 2 }
 0x509   :  { %v1526_v38 = vsel %vm1524_vm1, %v1525_v23, %v1521_v8  ;;  %v1116_v7 = vsel %vm1114_vm8, %v1115_v29, %v3446_v40  ;;  %v1253_v6 = vadd.f32 1.0, %v1252_v5  ;;  %v1398_v33 = vsub.s32 4, %v3480_v60 }
 0x50a   :  { %v1396_v59 = vxor.u32 2147483648, %v1395_v42  ;;  %v1527_v35 = vadd.s32 %v1526_v38, %v1522_v0  ;;  %v1117_v56 = vsel %vm1110_vm3, %v1113_v53, %v1116_v7  ;;  %vm1266_vm13 = vcmp.eq.s32.totalorder %v1264_v39, 0 }
 0x50b   :  { %v1118_v26 = vsel %vm1107_vm12, nan, %v1117_v56  ;;  %v1267_v54 = vxor.u32 2147483648, %v1261_v20  ;;  %v1270_v4 = vxor.u32 2147483648, %v1253_v6  ;;  %vm1269_vm14 = vcmp.eq.s32.totalorder %v1264_v39, 2 }
 0x50c   :  { %v1397_v63 = vsel %vm1276_vm10, %v1396_v59, %v1395_v42  ;;  %v1528_v49 = vadd.s32 536870912, %v1527_v35  ;;  %v1584_v50 = vmul.f32 %v1118_v26, %v3054_v28  ;;  %vm1265_vm15 = vcmp.lt.s32.totalorder %v1264_v39, 2 }
 0x50d   :  { %v1400_v40 = vsel %vm3537_vm11, %v3301_v31, %v1397_v63  ;;  %v1268_v46 = vsel %vm1266_vm13, %v1253_v6, %v1267_v54  ;;  %v1271_v21 = vsel %vm1269_vm14, %v1270_v4, %v1261_v20  ;;  %v1399_v22 = vsel %vm1276_vm10, %v1398_v33, %v3480_v60 }
 0x50e   :  { %v1402_v43 = vmul.f32 %v1400_v40, %v1400_v40  ;;  %v3569_v3 = vshrl.u32 %v1528_v49, 30  ;;  %v1588_v34 = vadd.f32 %v1584_v50, %v3174_v37  ;;  %v1272_v41 = vsel %vm1265_vm15, %v1268_v46, %v1271_v21 }
 0x50f   :  { %v1273_v61 = vsel %vm1262_vm2, nan, %v1272_v41  ;;  %v1401_v9 = vsel %vm3537_vm11, 0, %v1399_v22  ;;  %v1523_v0 = vadd.s32 %v3545_v13, %v3529_v2  ;;  %vm1417_vm10 = vweird.f32 %v3301_v31 }
 0x510   :  { %v1410_v47 = vmul.f32 -0.00019511016, %v1402_v43  ;;  %v1530_v10 = vshll.u32 %v3569_v3, 30  ;;  %2371 = vmatmul.msk.f32.vlgmr.msrb.gmra.mxu2 %vm41_vm0, %v1588_v34  ;;  %v1585_v36 = vmul.f32 %v1273_v61, %v3054_v28  ;;  %v1403_v14 = vmul.f32 -0.001358992, %v1402_v43 }
 0x511   :  { %v1418_v32 = vadd.s32 3, %v1401_v9  ;;  %vm1431_vm11 = vcmp.lt.s32.totalorder %v3340_v45, 0  ;;  %vm1430_vm7 = vcmp.le.f32.partialorder %v1429_v12, 0.7853982  ;;  %v1553_v31 = vsub.s32 4, %v3569_v3 }
 0x512   :  { %v1411_v18 = vadd.f32 0.008332121, %v1410_v47  ;;  %v1531_v52 = vsub.s32 %v1527_v35, %v1530_v10  ;;  %v1404_v27 = vadd.f32 0.041655596, %v1403_v14  ;;  %v1589_v57 = vadd.f32 %v1585_v36, %v3174_v37 }
 0x513   :  { %v1419_v16 = vand.u32 3, %v1418_v32  ;;  %v1554_v36 = vsel %vm1431_vm11, %v1553_v31, %v3569_v3  ;;  %vm1572_vm3 = vweird.f32 %v3340_v45 }
 0x514   :  { %v1412_v48 = vmul.f32 %v1411_v18, %v1402_v43  ;;  %vm1532_vm4 = vcmp.lt.s32.totalorder %v1531_v52, 0  ;;  %v1533_v55 = vsub.s32 0, %v1531_v52  ;;  %v1405_v60 = vmul.f32 %v1404_v27, %v1402_v43 }
 0x515   :  { %vm1421_vm6 = vcmp.eq.s32.totalorder %v1419_v16, 0  ;;  %vm1424_vm9 = vcmp.eq.s32.totalorder %v1419_v16, 2  ;;  %vm1420_vm12 = vcmp.lt.s32.totalorder %v1419_v16, 2  ;;  %v1556_v9 = vsel %vm1430_vm7, 0, %v1554_v36 }
 0x516   :  { %v1413_v20 = vadd.f32 -0.16666654, %v1412_v48  ;;  %v1534_v8 = vsel %vm1532_vm4, %v1533_v55, %v1531_v52  ;;  %v1406_v25 = vadd.f32 -0.4999988, %v1405_v60 }
 0x517   :  { %v1535_v19 = vclz %v1534_v8 }
 0x518   :  { %v1414_v11 = vmul.f32 %v1413_v20, %v1402_v43  ;;  %2372 = vmatmul.msk.f32.gmra.mxu2 %vm41_vm0, %v1589_v57  ;;  %v1407_v23 = vmul.f32 %v1406_v25, %v1402_v43  ;;  %v1573_v57 = vadd.s32 3, %v1556_v9 }
 0x519   :  { %v2369_v39 = vadd.s32 4294967294, %v1535_v19 }
 0x51a   :  { %v1415_v53 = vadd.f32 1.0, %v1414_v11  ;;  %v1408_v29 = vadd.f32 1.0, %v1407_v23  ;;  %v1574_v32 = vand.u32 3, %v1573_v57 }
 0x51b   :  { %vm2370_vm5 = vcmp.lt.s32.totalorder %v2369_v39, 0 }
 0x51c   :  { %v1416_v5 = vmul.f32 %v1415_v53, %v1400_v40  ;;  %v1538_v42 = vsel %vm2370_vm5, 0, %v2369_v39  ;;  %v1425_v6 = vxor.u32 2147483648, %v1408_v29  ;;  %vm1576_vm1 = vcmp.eq.s32.totalorder %v1574_v32, 0 }
 0x51d   :  { %v1539_v38 = vsub.s32 32, %v1538_v42  ;;  %v1543_v7 = vsub.s32 4294967266, %v1538_v42  ;;  %v1540_v33 = vshll.u32 %v1531_v52, %v1538_v42  ;;  %vm1579_vm8 = vcmp.eq.s32.totalorder %v1574_v32, 2 }
 0x51e   :  { %v1422_v59 = vxor.u32 2147483648, %v1416_v5  ;;  %v1426_v54 = vsel %vm1424_vm9, %v1425_v6, %v1416_v5  ;;  %vm1575_vm2 = vcmp.lt.s32.totalorder %v1574_v32, 2  ;;  %v3600_v5 = vld [vmem:[#allocation2 + $0x150] ss:$0 sm:$0xff] }
 0x51f   :  { %v1541_v35 = vshrl.u32 %v1523_v0, %v1539_v38  ;;  %v1544_v56 = vadd.s32 127, %v1543_v7 }
 0x520   :  { %v1423_v26 = vsel %vm1421_vm6, %v1408_v29, %v1422_v59 }
 0x521   :  { %v1542_v4 = vor.u32 %v1541_v35, %v1540_v33  ;;  %v1545_v63 = vshll.u32 %v1544_v56, 23  ;;  %v1427_v49 = vsel %vm1420_vm12, %v1423_v26, %v1426_v54 }
 0x522   :  { %v1428_v50 = vsel %vm1417_vm10, nan, %v1427_v49 }
 0x523   :  { %v1546_v40 = vor.u32 4788187, %v1545_v63  ;;  %v1586_v2 = vmul.f32 %v1428_v50, %v3057_v30  ;;  %v1549_v46 = vcvt.s32.f32 %v1542_v4 }
 0x525   :  { %v1547_v13 = vand.u32 2147483647, %v1546_v40  ;;  %v1590_v21 = vadd.f32 %v1586_v2, %v3194_v51 }
 0x527   :  { %v1550_v43 = vmul.f32 %v1549_v46, %v1547_v13  ;;  %2373 = vmatmul.msk.f32.gmra.mxu2 %vm41_vm0, %v1590_v21 }
 0x529   :  { %v1551_v34 = vxor.u32 2147483648, %v1550_v43 }
 0x52b   :  { %v1552_v41 = vsel %vm1431_vm11, %v1551_v34, %v1550_v43 }
 0x52c   :  { %v1555_v61 = vsel %vm1430_vm7, %v3340_v45, %v1552_v41 }
 0x52d   :  { %v1557_v22 = vmul.f32 %v1555_v61, %v1555_v61 }
 0x52f   :  { %v1565_v47 = vmul.f32 -0.00019511016, %v1557_v22  ;;  %v1558_v10 = vmul.f32 -0.001358992, %v1557_v22 }
 0x531   :  { %v1566_v14 = vadd.f32 0.008332121, %v1565_v47  ;;  %v1559_v18 = vadd.f32 0.041655596, %v1558_v10 }
 0x533   :  { %v1567_v52 = vmul.f32 %v1566_v14, %v1557_v22  ;;  %v1560_v27 = vmul.f32 %v1559_v18, %v1557_v22 }
 0x535   :  { %v1568_v48 = vadd.f32 -0.16666654, %v1567_v52  ;;  %v1561_v55 = vadd.f32 -0.4999988, %v1560_v27 }
 0x537   :  { %v1569_v60 = vmul.f32 %v1568_v48, %v1557_v22  ;;  %v1562_v12 = vmul.f32 %v1561_v55, %v1557_v22 }
 0x539   :  { %v1570_v20 = vadd.f32 1.0, %v1569_v60  ;;  %v1563_v8 = vadd.f32 1.0, %v1562_v12 }
 0x53b   :  { %v1571_v19 = vmul.f32 %v1570_v20, %v1555_v61  ;;  %v1580_v25 = vxor.u32 2147483648, %v1563_v8 }
 0x53d   :  { %v1577_v11 = vxor.u32 2147483648, %v1571_v19  ;;  %v1581_v39 = vsel %vm1579_vm8, %v1580_v25, %v1571_v19 }
 0x53f   :  { %v1578_v3 = vsel %vm1576_vm1, %v1563_v8, %v1577_v11 }
 0x540   :  { %v1582_v23 = vsel %vm1575_vm2, %v1578_v3, %v1581_v39 }
 0x541   :  { %v1583_v53 = vsel %vm1572_vm3, nan, %v1582_v23 }
 0x542   :  { %v1587_v16 = vmul.f32 %v1583_v53, %v3057_v30 }
 0x544   :  { %v1591_v29 = vadd.f32 %v1587_v16, %v3194_v51 }
 0x546   :  { %2374 = vmatmul.msk.f32.gmra.mxu2 %vm41_vm0, %v1591_v29 }
 0x593   :  { %v1627_v42 = vpop.f32.mrf.mxu2 }
 0x594   :  { %v3603_v0 = vadd.f32 %v3600_v5, %v1627_v42 }
 0x596   :  { %v1642_v38 = vand.u32 2139095040, %v3603_v0  ;;  %v1639_v45 = vand.u32 2147483647, %v3603_v0 }
 0x598   :  { %v1643_v7 = vshrl.u32 %v1642_v38, 23  ;;  %v1646_v33 = vand.u32 8388607, %v1639_v45 }
 0x59a   :  { %v2375_v6 = vadd.s32 4294967169, %v1643_v7  ;;  %v1647_v54 = vor.u32 8388608, %v1646_v33 }
 0x59c   :  { %v1649_v59 = vadd.s32 1, %v2375_v6  ;;  %v3622_v10 = vshll.u32 %v1647_v54, 8 }
 0x59e   :  { %vm1650_vm13 = vcmp.gt.s32.totalorder %v1649_v59, 0  ;;  %v1688_v57 = vand.u32 65535, %v3622_v10  ;;  %v1689_v60 = vshrl.u32 %v3622_v10, 16 }
 0x59f   :  { %v1651_v35 = vsel %vm1650_vm13, %v1649_v59, 0 }
 0x5a0   :  { %v1653_v56 = vand.u32 31, %v1651_v35  ;;  %v3609_v4 = vshrl.u32 %v1651_v35, 5 }
 0x5a2   :  { %v1654_v26 = vsub.s32 32, %v1653_v56  ;;  %v1656_v63 = vshll.u32 %v4032_v62, %v1653_v56  ;;  %v1659_v49 = vshll.u32 %v4045_v58, %v1653_v56  ;;  %v1662_v2 = vshll.u32 %v4046_v24, %v1653_v56 }
 0x5a3   :  { %v1665_v46 = vshll.u32 %v4047_v44, %v1653_v56  ;;  %v1668_v43 = vshll.u32 %v2478_v15, %v1653_v56  ;;  %vm1671_vm14 = vcmp.lt.s32.totalorder %v3609_v4, 1  ;;  %vm1674_vm15 = vcmp.lt.s32.totalorder %v3609_v4, 4 }
 0x5a4   :  { %v1657_v50 = vshrl.u32 %v4045_v58, %v1654_v26  ;;  %v1660_v40 = vshrl.u32 %v4046_v24, %v1654_v26  ;;  %v1663_v13 = vshrl.u32 %v4047_v44, %v1654_v26  ;;  %v1666_v21 = vshrl.u32 %v2478_v15, %v1654_v26 }
 0x5a5   :  { %v1669_v34 = vshrl.u32 %v2479_v17, %v1654_v26  ;;  %vm1673_vm4 = vcmp.lt.s32.totalorder %v3609_v4, 3  ;;  %vm1672_vm5 = vcmp.lt.s32.totalorder %v3609_v4, 2  ;;  %v1655_v35 = vshrl.u32 %v4032_v62, %v1654_v26 }
 0x5a6   :  { %v1658_v41 = vor.u32 %v1657_v50, %v1656_v63  ;;  %v1661_v31 = vor.u32 %v1660_v40, %v1659_v49  ;;  %v1664_v61 = vor.u32 %v1663_v13, %v1662_v2  ;;  %v1667_v22 = vor.u32 %v1666_v21, %v1665_v46  ;;  %v1630_v40 = vpop.f32.mrf.mxu2 }
 0x5a7   :  { %v1670_v47 = vor.u32 %v1669_v34, %v1668_v43  ;;  %v3653_v21 = vadd.f32 %v3600_v5, %v1630_v40 }
 0x5a8   :  { %v1679_v36 = vsel %vm1671_vm14, %v1658_v41, %v1661_v31  ;;  %v1683_v14 = vsel %vm1671_vm14, %v1661_v31, %v1664_v61  ;;  %v1680_v18 = vsel %vm1674_vm15, %v1667_v22, 920167782  ;;  %v1676_v63 = vsel %vm1674_vm15, %v1664_v61, 2102212464 }
 0x5a9   :  { %v1684_v52 = vsel %vm1674_vm15, %v1670_v47, 1326507024  ;;  %v1681_v9 = vsel %vm1673_vm4, %v1664_v61, %v1680_v18  ;;  %v1675_v26 = vsel %vm1671_vm14, %v1655_v35, %v1658_v41  ;;  %v1677_v61 = vsel %vm1673_vm4, %v1661_v31, %v1676_v63 }
 0x5aa   :  { %v1685_v27 = vsel %vm1673_vm4, %v1667_v22, %v1684_v52  ;;  %v1682_v48 = vsel %vm1672_vm5, %v1679_v36, %v1681_v9  ;;  %v1797_v36 = vand.u32 2139095040, %v3653_v21  ;;  %vm1641_vm14 = vcmp.lt.s32.totalorder %v3603_v0, 0 }
 0x5ab   :  { %v1686_v55 = vsel %vm1672_vm5, %v1683_v14, %v1685_v27  ;;  %v1712_v8 = vand.u32 65535, %v1682_v48  ;;  %v1713_v32 = vshrl.u32 %v1682_v48, 16  ;;  %v1678_v48 = vsel %vm1672_vm5, %v1675_v26, %v1677_v61 }
 0x5ac   :  { %v1690_v12 = vand.u32 65535, %v1686_v55  ;;  %v1691_v20 = vshrl.u32 %v1686_v55, 16  ;;  %v1798_v27 = vshrl.u32 %v1797_v36, 23  ;;  %vm3731_vm5 = vcmp.le.f32.partialorder %v1639_v45, 0.7853982 }
 0x5ad   :  { %v1715_v11 = vmul.u32 %v1713_v32, %v1688_v57  ;;  %v1716_v3 = vmul.u32 %v1712_v8, %v1689_v60  ;;  %v1714_v16 = vmul.u32 %v1712_v8, %v1688_v57  ;;  %v1717_v7 = vmul.u32 %v1713_v32, %v1689_v60 }
 0x5ae   :  { %v1693_v19 = vmul.u32 %v1691_v20, %v1688_v57  ;;  %v1694_v25 = vmul.u32 %v1690_v12, %v1689_v60  ;;  %v1692_v39 = vmul.u32 %v1690_v12, %v1688_v57  ;;  %v1695_v53 = vmul.u32 %v1691_v20, %v1689_v60 }
 0x5af   :  { %v1718_v29 = vshll.u32 %v1715_v11, 16  ;;  %v1720_v59 = vshll.u32 %v1716_v3, 16  ;;  %v1719_v43 = vshrl.u32 %v1715_v11, 16  ;;  %v1721_v14 = vshrl.u32 %v1716_v3, 16 }
 0x5b0   :  { %v1696_v23 = vshll.u32 %v1693_v19, 16  ;;  %v1698_v42 = vshll.u32 %v1694_v25, 16  ;;  %v1697_v2 = vshrl.u32 %v1693_v19, 16  ;;  %v1699_v22 = vshrl.u32 %v1694_v25, 16 }
 0x5b1   :  { %vm1722_vm9 = vc.u32 %v1714_v16, %v1718_v29  ;;  %v1724_v33 = vadd.s32 %v1718_v29, %v1714_v16  ;;  %v2378_v55 = vadd.s32 4294967169, %v1798_v27  ;;  %v1794_v57 = vand.u32 2147483647, %v3653_v21 }
 0x5b2   :  { %vm1700_vm6 = vc.u32 %v1692_v39, %v1696_v23  ;;  %v1702_v38 = vadd.s32 %v1696_v23, %v1692_v39  ;;  %v1723_v54 = vsel %vm1722_vm9, 1, %v4031_v1  ;;  %v1732_v60 = vmul.u32 %v3622_v10, %v1678_v48 }
 0x5b3   :  { %v1701_v6 = vsel %vm1700_vm6, 1, %v4031_v1  ;;  %v1725_v50 = vadd.s32 %v1723_v54, %v1717_v7  ;;  %vm1726_vm10 = vc.u32 %v1724_v33, %v1720_v59  ;;  %v3662_v9 = vadd.s32 %v1724_v33, %v1720_v59 }
 0x5b4   :  { %v1703_v56 = vadd.s32 %v1701_v6, %v1695_v53  ;;  %vm1704_vm12 = vc.u32 %v1702_v38, %v1698_v42  ;;  %v1727_v46 = vsel %vm1726_vm10, 1, %v4031_v1  ;;  %v1804_v12 = vadd.s32 1, %v2378_v55 }
 0x5b5   :  { %v1705_v49 = vsel %vm1704_vm12, 1, %v4031_v1  ;;  %v1729_v34 = vadd.s32 %v1727_v46, %v1725_v50  ;;  %v1801_v32 = vand.u32 8388607, %v1794_v57 }
 0x5b6   :  { %v1707_v13 = vadd.s32 %v1705_v49, %v1703_v56  ;;  %vm1805_vm7 = vcmp.gt.s32.totalorder %v1804_v12, 0 }
 0x5b7   :  { %v1730_v18 = vadd.s32 %v1729_v34, %v1719_v43  ;;  %v1806_v19 = vsel %vm1805_vm7, %v1804_v12, 0  ;;  %v1802_v39 = vor.u32 8388608, %v1801_v32 }
 0x5b8   :  { %v1708_v47 = vadd.s32 %v1707_v13, %v1697_v2  ;;  %v1808_v25 = vand.u32 31, %v1806_v19  ;;  %v3672_v23 = vshrl.u32 %v1806_v19, 5 }
 0x5b9   :  { %v1731_v41 = vadd.s32 %v1730_v18, %v1721_v14  ;;  %v3688_v40 = vshll.u32 %v1802_v39, 8  ;;  %v1633_v14 = vpop.f32.mrf.mxu2 }
 0x5ba   :  { %v3660_v52 = vadd.s32 %v1708_v47, %v1699_v22  ;;  %v1809_v3 = vsub.s32 32, %v1808_v25  ;;  %v1811_v53 = vshll.u32 %v4032_v62, %v1808_v25  ;;  %v1814_v16 = vshll.u32 %v4045_v58, %v1808_v25 }
 0x5bb   :  { %v1735_v31 = vadd.s32 1, %v1731_v41  ;;  %v1817_v42 = vshll.u32 %v4046_v24, %v1808_v25  ;;  %v1820_v38 = vshll.u32 %v4047_v44, %v1808_v25  ;;  %v1823_v54 = vshll.u32 %v2478_v15, %v1808_v25 }
 0x5bc   :  { %vm1734_vm11 = vc.u32 %v3660_v52, %v3662_v9  ;;  %v1812_v29 = vshrl.u32 %v4045_v58, %v1809_v3  ;;  %v1815_v7 = vshrl.u32 %v4046_v24, %v1809_v3  ;;  %v1818_v6 = vshrl.u32 %v4047_v44, %v1809_v3 }
 0x5bd   :  { %v1736_v20 = vsel %vm1734_vm11, %v1735_v31, %v1731_v41  ;;  %v1821_v59 = vshrl.u32 %v2478_v15, %v1809_v3  ;;  %v1824_v33 = vshrl.u32 %v2479_v17, %v1809_v3  ;;  %vm1826_vm8 = vcmp.lt.s32.totalorder %v3672_v23, 1 }
 0x5be   :  { %v1737_v8 = vadd.s32 %v1736_v20, %v1732_v60  ;;  %v3683_v56 = vor.u32 %v1812_v29, %v1811_v53  ;;  %v3686_v63 = vor.u32 %v1815_v7, %v1814_v16  ;;  %v1819_v49 = vor.u32 %v1818_v6, %v1817_v42 }
 0x5bf   :  { %v1822_v50 = vor.u32 %v1821_v59, %v1820_v38  ;;  %v1825_v13 = vor.u32 %v1824_v33, %v1823_v54  ;;  %vm1829_vm2 = vcmp.lt.s32.totalorder %v3672_v23, 4  ;;  %vm1828_vm3 = vcmp.lt.s32.totalorder %v3672_v23, 3 }
 0x5c0   :  { %v1738_v4 = vadd.s32 536870912, %v1737_v8  ;;  %v1834_v46 = vsel %vm1826_vm8, %v3683_v56, %v3686_v63  ;;  %v1838_v26 = vsel %vm1826_vm8, %v3686_v63, %v1819_v49  ;;  %vm1827_vm13 = vcmp.lt.s32.totalorder %v3672_v23, 2 }
 0x5c1   :  { %v1835_v34 = vsel %vm1829_vm2, %v1822_v50, 920167782  ;;  %v1839_v61 = vsel %vm1829_vm2, %v1825_v13, 1326507024  ;;  %v1843_v48 = vand.u32 65535, %v3688_v40  ;;  %v1844_v12 = vshrl.u32 %v3688_v40, 16 }
 0x5c2   :  { %v1739_v11 = vshrl.u32 %v1738_v4, 30  ;;  %v1836_v47 = vsel %vm1828_vm3, %v1819_v49, %v1835_v34  ;;  %v1840_v36 = vsel %vm1828_vm3, %v1822_v50, %v1839_v61  ;;  %v3717_v20 = vadd.f32 %v3600_v5, %v1633_v14 }
 0x5c3   :  { %v1837_v18 = vsel %vm1827_vm13, %v1834_v46, %v1836_v47  ;;  %v1841_v27 = vsel %vm1827_vm13, %v1838_v26, %v1840_v36  ;;  %v1733_v4 = vadd.s32 %v3662_v9, %v3660_v52  ;;  %v1810_v39 = vshrl.u32 %v4032_v62, %v1809_v3 }
 0x5c4   :  { %v1740_v10 = vshll.u32 %v1739_v11, 30  ;;  %v1763_v55 = vsub.s32 4, %v1739_v11  ;;  %v1845_v31 = vand.u32 65535, %v1841_v27  ;;  %v1846_v60 = vshrl.u32 %v1841_v27, 16 }
 0x5c5   :  { %v1867_v32 = vand.u32 65535, %v1837_v18  ;;  %v1868_v19 = vshrl.u32 %v1837_v18, 16  ;;  %v1831_v42 = vsel %vm1829_vm2, %v1819_v49, 2102212464  ;;  %v1949_v59 = vand.u32 2147483647, %v3717_v20 }
 0x5c6   :  { %v1741_v35 = vsub.s32 %v1737_v8, %v1740_v10  ;;  %v1848_v8 = vmul.u32 %v1846_v60, %v1843_v48  ;;  %v1849_v53 = vmul.u32 %v1845_v31, %v1844_v12  ;;  %v3724_v29 = vsel %vm1641_vm14, %v1763_v55, %v1739_v11 }
 0x5c7   :  { %v1847_v7 = vmul.u32 %v1845_v31, %v1843_v48  ;;  %v1870_v9 = vmul.u32 %v1868_v19, %v1843_v48  ;;  %v1871_v54 = vmul.u32 %v1867_v32, %v1844_v12  ;;  %v1850_v3 = vmul.u32 %v1846_v60, %v1844_v12 }
 0x5c8   :  { %vm1742_vm1 = vcmp.lt.s32.totalorder %v1741_v35, 0  ;;  %v1743_v2 = vsub.s32 0, %v1741_v35  ;;  %v1851_v6 = vshll.u32 %v1848_v8, 16  ;;  %v1853_v50 = vshll.u32 %v1849_v53, 16 }
 0x5c9   :  { %v1873_v46 = vshll.u32 %v1870_v9, 16  ;;  %v1852_v26 = vshrl.u32 %v1848_v8, 16  ;;  %v1869_v34 = vmul.u32 %v1867_v32, %v1843_v48  ;;  %v1636_v61 = vpop.f32.mrf.mxu2  ;;  %v1872_v36 = vmul.u32 %v1868_v19, %v1844_v12 }
 0x5ca   :  { %v1744_v43 = vsel %vm1742_vm1, %v1743_v2, %v1741_v35  ;;  %vm1855_vm4 = vc.u32 %v1847_v7, %v1851_v6  ;;  %v1857_v2 = vadd.s32 %v1851_v6, %v1847_v7  ;;  %v1875_v14 = vshll.u32 %v1871_v54, 16 }
 0x5cb   :  { %v1745_v22 = vclz %v1744_v43  ;;  %v1856_v13 = vsel %vm1855_vm4, 1, %v4031_v1  ;;  %vm1877_vm9 = vc.u32 %v1869_v34, %v1873_v46  ;;  %v1879_v45 = vadd.s32 %v1873_v46, %v1869_v34 }
 0x5cc   :  { %v1858_v43 = vadd.s32 %v1856_v13, %v1850_v3  ;;  %vm1859_vm6 = vc.u32 %v1857_v2, %v1853_v50  ;;  %v1952_v27 = vand.u32 2139095040, %v3717_v20  ;;  %v1878_v31 = vsel %vm1877_vm9, 1, %v4031_v1 }
 0x5cd   :  { %v2376_v41 = vadd.s32 4294967294, %v1745_v22  ;;  %v1860_v47 = vsel %vm1859_vm6, 1, %v4031_v1  ;;  %v3740_v60 = vadd.f32 %v3600_v5, %v1636_v61  ;;  %v1830_v48 = vsel %vm1826_vm8, %v1810_v39, %v3683_v56 }
 0x5ce   :  { %v1862_v18 = vadd.s32 %v1860_v47, %v1858_v43  ;;  %v1880_v32 = vadd.s32 %v1878_v31, %v1872_v36  ;;  %vm1881_vm12 = vc.u32 %v1879_v45, %v1875_v14  ;;  %v1854_v19 = vshrl.u32 %v1849_v53, 16 }
 0x5cf   :  { %vm2377_vm15 = vcmp.lt.s32.totalorder %v2376_v41, 0  ;;  %v1956_v5 = vand.u32 8388607, %v1949_v59  ;;  %v2107_v39 = vand.u32 2139095040, %v3740_v60  ;;  %v1766_v53 = vsel %vm3731_vm5, 0, %v3724_v29 }
 0x5d0   :  { %v1748_v25 = vsel %vm2377_vm15, 0, %v2376_v41  ;;  %v1863_v8 = vadd.s32 %v1862_v18, %v1852_v26  ;;  %v1783_v43 = vadd.s32 3, %v1766_v53  ;;  %vm1796_vm6 = vcmp.lt.s32.totalorder %v3653_v21, 0 }
 0x5d1   :  { %v1749_v16 = vsub.s32 32, %v1748_v25  ;;  %v1753_v10 = vsub.s32 4294967266, %v1748_v25  ;;  %v1750_v38 = vshll.u32 %v1741_v35, %v1748_v25  ;;  %v1953_v25 = vshrl.u32 %v1952_v27, 23 }
 0x5d2   :  { %v1864_v6 = vadd.s32 %v1863_v8, %v1854_v19 }
 0x5d3   :  { %v1751_v33 = vshrl.u32 %v1733_v4, %v1749_v16  ;;  %v1754_v52 = vadd.s32 127, %v1753_v10  ;;  %v1882_v4 = vsel %vm1881_vm12, 1, %v4031_v1  ;;  %v1832_v16 = vsel %vm1828_vm3, %v3686_v63, %v1831_v42 }
 0x5d4   :  { %v1874_v10 = vshrl.u32 %v1870_v9, 16  ;;  %v2381_v56 = vadd.s32 4294967169, %v1953_v25  ;;  %v1833_v63 = vsel %vm1827_vm13, %v1830_v48, %v1832_v16  ;;  %v1883_v42 = vadd.s32 %v1879_v45, %v1875_v14 }
 0x5d5   :  { %v1752_v49 = vor.u32 %v1751_v33, %v1750_v38  ;;  %v1755_v35 = vshll.u32 %v1754_v52, 23  ;;  %v1884_v38 = vadd.s32 %v1882_v4, %v1880_v32  ;;  %v1876_v33 = vshrl.u32 %v1871_v54, 16 }
 0x5d6   :  { %v1959_v9 = vadd.s32 1, %v2381_v56  ;;  %vm1889_vm10 = vc.u32 %v1864_v6, %v1883_v42  ;;  %v2108_v54 = vshrl.u32 %v2107_v39, 23  ;;  %v1887_v26 = vmul.u32 %v3688_v40, %v1833_v63 }
 0x5d7   :  { %v1756_v22 = vor.u32 4788187, %v1755_v35  ;;  %v1759_v55 = vcvt.s32.f32 %v1752_v49  ;;  %v1885_v52 = vadd.s32 %v1884_v38, %v1874_v10  ;;  %v1957_v49 = vor.u32 8388608, %v1956_v5 }
 0x5d8   :  { %v2104_v35 = vand.u32 2147483647, %v3740_v60  ;;  %vm1960_vm11 = vcmp.gt.s32.totalorder %v1959_v9, 0  ;;  %v2384_v18 = vadd.s32 4294967169, %v2108_v54  ;;  %v3790_v39 = vand.u32 3, %v1783_v43 }
 0x5d9   :  { %v1757_v41 = vand.u32 2147483647, %v1756_v22  ;;  %v1886_v2 = vadd.s32 %v1885_v52, %v1876_v33  ;;  %v1961_v13 = vsel %vm1960_vm11, %v1959_v9, 0  ;;  %v3771_v61 = vshll.u32 %v1957_v49, 8 }
 0x5da   :  { %v1963_v11 = vand.u32 31, %v1961_v13  ;;  %v2111_v22 = vand.u32 8388607, %v2104_v35  ;;  %v3775_v36 = vshrl.u32 %v1961_v13, 5  ;;  %v1888_v53 = vadd.s32 %v1883_v42, %v1864_v6 }
 0x5db   :  { %v1760_v12 = vmul.f32 %v1759_v55, %v1757_v41  ;;  %v1890_v23 = vadd.s32 1, %v1886_v2  ;;  %v1998_v52 = vand.u32 65535, %v3771_v61  ;;  %v2114_v63 = vadd.s32 1, %v2384_v18 }
 0x5dc   :  { %v1964_v14 = vsub.s32 32, %v1963_v11  ;;  %v1966_v27 = vshll.u32 %v4032_v62, %v1963_v11  ;;  %v1969_v41 = vshll.u32 %v4045_v58, %v1963_v11  ;;  %v1972_v40 = vshll.u32 %v4046_v24, %v1963_v11 }
 0x5dd   :  { %v1761_v7 = vxor.u32 2147483648, %v1760_v12  ;;  %v1891_v34 = vsel %vm1889_vm10, %v1890_v23, %v1886_v2  ;;  %v1975_v48 = vshll.u32 %v4047_v44, %v1963_v11  ;;  %v1978_v8 = vshll.u32 %v2478_v15, %v1963_v11 }
 0x5de   :  { %v1892_v47 = vadd.s32 %v1891_v34, %v1887_v26  ;;  %v1967_v31 = vshrl.u32 %v4045_v58, %v1964_v14  ;;  %v1970_v32 = vshrl.u32 %v4046_v24, %v1964_v14  ;;  %v1976_v19 = vshrl.u32 %v2478_v15, %v1964_v14 }
 0x5df   :  { %v1762_v3 = vsel %vm1641_vm14, %v1761_v7, %v1760_v12  ;;  %v1973_v12 = vshrl.u32 %v4047_v44, %v1964_v14  ;;  %v1979_v4 = vshrl.u32 %v2479_v17, %v1964_v14  ;;  %vm1981_vm7 = vcmp.lt.s32.totalorder %v3775_v36, 1 }
 0x5e0   :  { %v3762_v50 = vsel %vm3731_vm5, %v3603_v0, %v1762_v3  ;;  %v1893_v55 = vadd.s32 536870912, %v1892_v47  ;;  %v1968_v16 = vor.u32 %v1967_v31, %v1966_v27  ;;  %v1971_v10 = vor.u32 %v1970_v32, %v1969_v41 }
 0x5e1   :  { %v3767_v29 = vmul.f32 %v3762_v50, %v3762_v50  ;;  %v1974_v38 = vor.u32 %v1973_v12, %v1972_v40  ;;  %v1977_v5 = vor.u32 %v1976_v19, %v1975_v48  ;;  %v1980_v7 = vor.u32 %v1979_v4, %v1978_v8 }
 0x5e2   :  { %v3787_v25 = vshrl.u32 %v1893_v55, 30  ;;  %v2112_v3 = vor.u32 8388608, %v2111_v22  ;;  %v1965_v2 = vshrl.u32 %v4032_v62, %v1964_v14  ;;  %vm1984_vm1 = vcmp.lt.s32.totalorder %v3775_v36, 4 }
 0x5e3   :  { %v1775_v46 = vmul.f32 -0.00019511016, %v3767_v29  ;;  %v1989_v49 = vsel %vm1981_vm7, %v1968_v16, %v1971_v10  ;;  %v1986_v54 = vsel %vm1984_vm1, %v1974_v38, 2102212464  ;;  %v1990_v23 = vsel %vm1984_vm1, %v1977_v5, 920167782 }
 0x5e4   :  { %v1895_v33 = vshll.u32 %v3787_v25, 30  ;;  %v1993_v6 = vsel %vm1981_vm7, %v1971_v10, %v1974_v38  ;;  %v1994_v42 = vsel %vm1984_vm1, %v1980_v7, 1326507024  ;;  %vm1983_vm2 = vcmp.lt.s32.totalorder %v3775_v36, 3 }
 0x5e5   :  { %v1776_v45 = vadd.f32 0.008332121, %v1775_v46  ;;  %vm1982_vm3 = vcmp.lt.s32.totalorder %v3775_v36, 2  ;;  %v1985_v26 = vsel %vm1981_vm7, %v1965_v2, %v1968_v16  ;;  %v1991_v11 = vsel %vm1983_vm2, %v1974_v38, %v1990_v23 }
 0x5e6   :  { %v1896_v9 = vsub.s32 %v1892_v47, %v1895_v33  ;;  %v1995_v43 = vsel %vm1983_vm2, %v1977_v5, %v1994_v42  ;;  %v1987_v22 = vsel %vm1983_vm2, %v1971_v10, %v1986_v54  ;;  %v1992_v47 = vsel %vm1982_vm3, %v1989_v49, %v1991_v11 }
 0x5e7   :  { %v1777_v56 = vmul.f32 %v1776_v45, %v3767_v29  ;;  %v1996_v14 = vsel %vm1982_vm3, %v1993_v6, %v1995_v43  ;;  %vm2115_vm13 = vcmp.gt.s32.totalorder %v2114_v63, 0  ;;  %v1999_v41 = vshrl.u32 %v3771_v61, 16 }
 0x5e8   :  { %vm1897_vm8 = vcmp.lt.s32.totalorder %v1896_v9, 0  ;;  %v1898_v46 = vsub.s32 0, %v1896_v9  ;;  %v2000_v45 = vand.u32 65535, %v1996_v14  ;;  %v2001_v27 = vshrl.u32 %v1996_v14, 16 }
 0x5e9   :  { %v1778_v13 = vadd.f32 -0.16666654, %v1777_v56  ;;  %v2022_v40 = vand.u32 65535, %v1992_v47  ;;  %v2023_v55 = vshrl.u32 %v1992_v47, 16  ;;  %v3810_v31 = vshll.u32 %v2112_v3, 8 }
 0x5ea   :  { %v1899_v34 = vsel %vm1897_vm8, %v1898_v46, %v1896_v9  ;;  %v1918_v32 = vsub.s32 4, %v3787_v25  ;;  %v2003_v12 = vmul.u32 %v2001_v27, %v1998_v52  ;;  %v3818_v19 = vsel %vm1982_vm3, %v1985_v26, %v1987_v22 }
 0x5eb   :  { %v1900_v18 = vclz %v1899_v34  ;;  %v3813_v48 = vmul.f32 %v1778_v13, %v3767_v29  ;;  %v2004_v4 = vmul.u32 %v2000_v45, %v1999_v41  ;;  %v2025_v16 = vmul.u32 %v2023_v55, %v1998_v52 }
 0x5ec   :  { %v2116_v10 = vsel %vm2115_vm13, %v2114_v63, 0  ;;  %v2002_v38 = vmul.u32 %v2000_v45, %v1998_v52  ;;  %v2005_v5 = vmul.u32 %v2001_v27, %v1999_v41  ;;  %v2006_v7 = vshll.u32 %v2003_v12, 16 }
 0x5ed   :  { %v2379_v8 = vadd.s32 4294967294, %v1900_v18  ;;  %v2024_v33 = vmul.u32 %v2022_v40, %v1998_v52  ;;  %v2026_v3 = vmul.u32 %v2022_v40, %v1999_v41  ;;  %v2028_v2 = vshll.u32 %v2025_v16, 16 }
 0x5ee   :  { %v2007_v23 = vshrl.u32 %v2003_v12, 16  ;;  %vm2010_vm15 = vc.u32 %v2002_v38, %v2006_v7  ;;  %v2008_v6 = vshll.u32 %v2004_v4, 16  ;;  %v2012_v42 = vadd.s32 %v2006_v7, %v2002_v38 }
 0x5ef   :  { %vm2380_vm14 = vcmp.lt.s32.totalorder %v2379_v8, 0  ;;  %v2011_v36 = vsel %vm2010_vm15, 1, %v4031_v1  ;;  %v2027_v13 = vmul.u32 %v2023_v55, %v1999_v41  ;;  %v2030_v43 = vshll.u32 %v2026_v3, 16 }
 0x5f0   :  { %v1903_v56 = vsel %vm2380_vm14, 0, %v2379_v8  ;;  %v2013_v11 = vadd.s32 %v2011_v36, %v2005_v5  ;;  %vm2014_vm4 = vc.u32 %v2012_v42, %v2008_v6  ;;  %vm2032_vm5 = vc.u32 %v2024_v33, %v2028_v2 }
 0x5f1   :  { %v1904_v49 = vsub.s32 32, %v1903_v56  ;;  %v1908_v54 = vsub.s32 4294967266, %v1903_v56  ;;  %v1905_v46 = vshll.u32 %v1896_v9, %v1903_v56  ;;  %v2034_v34 = vadd.s32 %v2028_v2, %v2024_v33 }
 0x5f2   :  { %v2015_v47 = vsel %vm2014_vm4, 1, %v4031_v1  ;;  %v2033_v14 = vsel %vm2032_vm5, 1, %v4031_v1  ;;  %v2009_v18 = vshrl.u32 %v2004_v4, 16  ;;  %vm3826_vm12 = vcmp.le.f32.partialorder %v1794_v57, 0.7853982 }
 0x5f3   :  { %v1906_v26 = vshrl.u32 %v1888_v53, %v1904_v49  ;;  %v1909_v63 = vadd.s32 127, %v1908_v54  ;;  %v2017_v45 = vadd.s32 %v2015_v47, %v2013_v11  ;;  %v2035_v27 = vadd.s32 %v2033_v14, %v2027_v13 }
 0x5f4   :  { %vm2036_vm9 = vc.u32 %v2034_v34, %v2030_v43  ;;  %v2029_v41 = vshrl.u32 %v2025_v16, 16  ;;  %v2118_v55 = vand.u32 31, %v2116_v10  ;;  %v2031_v12 = vshrl.u32 %v2026_v3, 16 }
 0x5f5   :  { %v1907_v52 = vor.u32 %v1906_v26, %v1905_v46  ;;  %v1910_v22 = vshll.u32 %v1909_v63, 23  ;;  %v2037_v40 = vsel %vm2036_vm9, 1, %v4031_v1  ;;  %v2018_v8 = vadd.s32 %v2017_v45, %v2007_v23 }
 0x5f6   :  { %v2039_v38 = vadd.s32 %v2037_v40, %v2035_v27  ;;  %v3831_v5 = vshrl.u32 %v2116_v10, 5  ;;  %v3833_v56 = vadd.s32 %v2034_v34, %v2030_v43  ;;  %v2119_v33 = vsub.s32 32, %v2118_v55 }
 0x5f7   :  { %v1911_v9 = vor.u32 4788187, %v1910_v22  ;;  %v1914_v7 = vcvt.s32.f32 %v1907_v52  ;;  %v3835_v2 = vadd.s32 %v2018_v8, %v2009_v18  ;;  %v2121_v49 = vshll.u32 %v4032_v62, %v2118_v55 }
 0x5f8   :  { %v2040_v57 = vadd.s32 %v2039_v38, %v2029_v41  ;;  %v2124_v16 = vshll.u32 %v4045_v58, %v2118_v55  ;;  %v2122_v6 = vshrl.u32 %v4045_v58, %v2119_v33  ;;  %v2125_v3 = vshrl.u32 %v4046_v24, %v2119_v33 }
 0x5f9   :  { %v1912_v4 = vand.u32 2147483647, %v1911_v9  ;;  %v2127_v10 = vshll.u32 %v4046_v24, %v2118_v55  ;;  %vm2044_vm10 = vc.u32 %v3835_v2, %v3833_v56  ;;  %v2128_v36 = vshrl.u32 %v4047_v44, %v2119_v33 }
 0x5fa   :  { %v2041_v23 = vadd.s32 %v2040_v57, %v2031_v12  ;;  %v2130_v42 = vshll.u32 %v4047_v44, %v2118_v55  ;;  %v2123_v46 = vor.u32 %v2122_v6, %v2121_v49  ;;  %v2126_v26 = vor.u32 %v2125_v3, %v2124_v16 }
 0x5fb   :  { %v1915_v54 = vmul.f32 %v1914_v7, %v1912_v4  ;;  %v2131_v63 = vshrl.u32 %v2478_v15, %v2119_v33  ;;  %v2129_v43 = vor.u32 %v2128_v36, %v2127_v10  ;;  %v2133_v58 = vshll.u32 %v2478_v15, %v2118_v55 }
 0x5fc   :  { %v2045_v11 = vadd.s32 1, %v2041_v23  ;;  %v2134_v34 = vshrl.u32 %v2479_v17, %v2119_v33  ;;  %v1780_v24 = vadd.f32 1.0, %v3813_v48  ;;  %v2042_v22 = vmul.u32 %v3771_v61, %v3818_v19 }
 0x5fd   :  { %v1916_v13 = vxor.u32 2147483648, %v1915_v54  ;;  %v2132_v44 = vor.u32 %v2131_v63, %v2130_v42  ;;  %vm2136_vm11 = vcmp.lt.s32.totalorder %v3831_v5, 1  ;;  %vm2139_vm7 = vcmp.lt.s32.totalorder %v3831_v5, 4 }
 0x5fe   :  { %v2046_v15 = vsel %vm2044_vm10, %v2045_v11, %v2041_v23  ;;  %v2135_v14 = vor.u32 %v2134_v34, %v2133_v58  ;;  %v2144_v61 = vsel %vm2136_vm11, %v2123_v46, %v2126_v26  ;;  %vm2138_vm1 = vcmp.lt.s32.totalorder %v3831_v5, 3 }
 0x5ff   :  { %v1917_v52 = vsel %vm1796_vm6, %v1916_v13, %v1915_v54  ;;  %v2047_v48 = vadd.s32 %v2046_v15, %v2042_v22  ;;  %v2145_v19 = vsel %vm2139_vm7, %v2132_v44, 920167782  ;;  %v2148_v18 = vsel %vm2136_vm11, %v2126_v26, %v2129_v43 }
 0x600   :  { %v3857_v47 = vsel %vm3826_vm12, %v3653_v21, %v1917_v52  ;;  %v2149_v45 = vsel %vm2139_vm7, %v2135_v14, 1326507024  ;;  %vm2137_vm8 = vcmp.lt.s32.totalorder %v3831_v5, 2  ;;  %v2146_v41 = vsel %vm2138_vm1, %v2129_v43, %v2145_v19 }
 0x601   :  { %v3865_v17 = vmul.f32 %v3857_v47, %v3857_v47  ;;  %v2048_v9 = vadd.s32 536870912, %v2047_v48  ;;  %v2147_v40 = vsel %vm2137_vm8, %v2144_v61, %v2146_v41  ;;  %v2150_v55 = vsel %vm2138_vm1, %v2132_v44, %v2149_v45 }
 0x602   :  { %v2153_v8 = vand.u32 65535, %v3810_v31  ;;  %v2154_v12 = vshrl.u32 %v3810_v31, 16  ;;  %v2141_v7 = vsel %vm2139_vm7, %v2129_v43, 2102212464  ;;  %v2151_v57 = vsel %vm2137_vm8, %v2148_v18, %v2150_v55 }
 0x603   :  { %v1930_v27 = vmul.f32 -0.00019511016, %v3865_v17  ;;  %v3887_v4 = vshrl.u32 %v2048_v9, 30  ;;  %v2155_v49 = vand.u32 65535, %v2151_v57  ;;  %v2156_v16 = vshrl.u32 %v2151_v57, 16  ;;  %v2270_v57 = vld [vmem:[#allocation2 + $0x108] sm:$0xff] }
 0x604   :  { %v2178_v54 = vshrl.u32 %v2147_v40, 16  ;;  %v1768_v6 = vmul.f32 -0.001358992, %v3767_v29  ;;  %v2120_v23 = vshrl.u32 %v4032_v62, %v2119_v33  ;;  %v2177_v36 = vand.u32 65535, %v2147_v40  ;;  %2297 = vmatpush.msrb.mxu3 %v2270_v57 }
 0x605   :  { %v1931_v38 = vadd.f32 0.008332121, %v1930_v27  ;;  %v2050_v10 = vshll.u32 %v3887_v4, 30  ;;  %v3898_v42 = vmul.f32 %v1780_v24, %v3762_v50  ;;  %v3905_v13 = vsel %vm1796_vm6, %v1918_v32, %v3787_v25 }
 0x606   :  { %v2158_v63 = vmul.u32 %v2156_v16, %v2153_v8  ;;  %v3907_v11 = vmul.u32 %v2155_v49, %v2154_v12  ;;  %v2140_v58 = vsel %vm2136_vm11, %v2120_v23, %v2123_v46  ;;  %v2142_v62 = vsel %vm2138_vm1, %v2126_v26, %v2141_v7 }
 0x607   :  { %v1932_v3 = vmul.f32 %v1931_v38, %v3865_v17  ;;  %v3909_v43 = vsub.s32 %v2047_v48, %v2050_v10  ;;  %v2180_v50 = vmul.u32 %v2178_v54, %v2153_v8  ;;  %v2157_v34 = vmul.u32 %v2155_v49, %v2153_v8 }
 0x608   :  { %v2161_v24 = vshll.u32 %v2158_v63, 16  ;;  %v1769_v52 = vadd.f32 0.041655596, %v1768_v6  ;;  %v2160_v32 = vmul.u32 %v2156_v16, %v2154_v12  ;;  %v3917_v22 = vmul.u32 %v2177_v36, %v2154_v12 }
 0x609   :  { %v1933_v33 = vadd.f32 -0.16666654, %v1932_v3  ;;  %vm2052_vm2 = vcmp.lt.s32.totalorder %v3909_v43, 0  ;;  %v2053_v25 = vsub.s32 0, %v3909_v43  ;;  %v2163_v44 = vshll.u32 %v3907_v11, 16  ;;  %v2269_v3 = vld [vmem:[#allocation2 + $0x100] sm:$0xff] }
 0x60a   :  { %vm2165_vm3 = vc.u32 %v2157_v34, %v2161_v24  ;;  %v2167_v15 = vadd.s32 %v2161_v24, %v2157_v34  ;;  %v2183_v46 = vshll.u32 %v2180_v50, 16  ;;  %v2162_v26 = vshrl.u32 %v2158_v63, 16  ;;  %2298 = vmatpush.msrb.mxu3 %v2269_v3  ;;  %v2268_v24 = vld [vmem:[#allocation2 + $0xf8] sm:$0xff] }
 0x60b   :  { %v2054_v14 = vsel %vm2052_vm2, %v2053_v25, %v3909_v43  ;;  %v2166_v48 = vsel %vm2165_vm3, 1, %v4031_v1  ;;  %v2179_v61 = vmul.u32 %v2177_v36, %v2153_v8  ;;  %v1934_v19 = vmul.f32 %v1933_v33, %v3865_v17 }
 0x60c   :  { %v2055_v18 = vclz %v2054_v14  ;;  %v2168_v45 = vadd.s32 %v2166_v48, %v2160_v32  ;;  %vm2169_vm13 = vc.u32 %v2167_v15, %v2163_v44  ;;  %v2182_v9 = vmul.u32 %v2178_v54, %v2154_v12  ;;  %2299 = vmatpush.msrb.mxu3 %v2268_v24  ;;  %v2267_v44 = vld [vmem:[#allocation2 + $0xf0] sm:$0xff] }
 0x60d   :  { %v2170_v27 = vsel %vm2169_vm13, 1, %v4031_v1  ;;  %v2185_v41 = vshll.u32 %v3917_v22, 16  ;;  %vm2187_vm14 = vc.u32 %v2179_v61, %v2183_v46  ;;  %v2189_v7 = vadd.s32 %v2183_v46, %v2179_v61 }
 0x60e   :  { %v2382_v40 = vadd.s32 4294967294, %v2055_v18  ;;  %v2172_v55 = vadd.s32 %v2170_v27, %v2168_v45  ;;  %v2188_v38 = vsel %vm2187_vm14, 1, %v4031_v1  ;;  %v1787_v49 = vxor.u32 2147483648, %v3898_v42  ;;  %2300 = vmatpush.msrb.mxu3 %v2267_v44 }
 0x60f   :  { %v2043_v8 = vadd.s32 %v3833_v56, %v3835_v2  ;;  %v2190_v16 = vadd.s32 %v2188_v38, %v2182_v9  ;;  %v1770_v6 = vmul.f32 %v1769_v52, %v3767_v29  ;;  %v2143_v12 = vsel %vm2137_vm8, %v2140_v58, %v2142_v62 }
 0x610   :  { %vm2383_vm15 = vcmp.lt.s32.totalorder %v2382_v40, 0  ;;  %v2173_v54 = vadd.s32 %v2172_v55, %v2162_v26  ;;  %vm2191_vm4 = vc.u32 %v2189_v7, %v2185_v41  ;;  %v2164_v23 = vshrl.u32 %v3907_v11, 16 }
 0x611   :  { %v2058_v10 = vsel %vm2383_vm15, 0, %v2382_v40  ;;  %v2192_v36 = vsel %vm2191_vm4, 1, %v4031_v1  ;;  %v1771_v63 = vadd.f32 -0.4999988, %v1770_v6  ;;  %v1935_v33 = vadd.f32 1.0, %v1934_v19 }
 0x612   :  { %v2059_v56 = vsub.s32 32, %v2058_v10  ;;  %v2063_v2 = vsub.s32 4294967266, %v2058_v10  ;;  %v2184_v34 = vshrl.u32 %v2180_v50, 16  ;;  %vm1782_vm5 = vweird.f32 %v3603_v0 }
 0x613   :  { %v2186_v5 = vshrl.u32 %v3917_v22, 16  ;;  %v2194_v58 = vadd.s32 %v2192_v36, %v2190_v16  ;;  %v1772_v62 = vmul.f32 %v1771_v63, %v3767_v29  ;;  %v1923_v52 = vmul.f32 -0.001358992, %v3865_v17 }
 0x614   :  { %v2060_v11 = vshll.u32 %v3909_v43, %v2058_v10  ;;  %v2061_v1 = vshrl.u32 %v2043_v8, %v2059_v56  ;;  %v2064_v25 = vadd.s32 127, %v2063_v2  ;;  %v3939_v32 = vadd.s32 %v2173_v54, %v2164_v23 }
 0x615   :  { %v2195_v15 = vadd.s32 %v2194_v58, %v2184_v34  ;;  %v1773_v50 = vadd.f32 1.0, %v1772_v62  ;;  %v1921_v22 = vsel %vm3826_vm12, 0, %v3905_v13  ;;  %v1924_v46 = vadd.f32 0.041655596, %v1923_v52 }
 0x616   :  { %v2062_v14 = vor.u32 %v2061_v1, %v2060_v11  ;;  %v2065_v26 = vshll.u32 %v2064_v25, 23  ;;  %v3944_v29 = vadd.s32 %v2189_v7, %v2185_v41  ;;  %vm1786_vm6 = vcmp.eq.s32.totalorder %v3790_v39, 0 }
 0x617   :  { %v2196_v43 = vadd.s32 %v2195_v15, %v2186_v5  ;;  %v1788_v48 = vsel %vm1786_vm6, %v1773_v50, %v1787_v49  ;;  %v1790_v61 = vxor.u32 2147483648, %v1773_v50  ;;  %v1925_v19 = vmul.f32 %v1924_v46, %v3865_v17 }
 0x618   :  { %v2066_v18 = vor.u32 4788187, %v2065_v26  ;;  %vm2199_vm9 = vc.u32 %v3939_v32, %v3944_v29  ;;  %vm1789_vm10 = vcmp.eq.s32.totalorder %v3790_v39, 2  ;;  %v1938_v53 = vadd.s32 3, %v1921_v22 }
 0x619   :  { %v2200_v13 = vadd.s32 1, %v2196_v43  ;;  %vm1785_vm12 = vcmp.lt.s32.totalorder %v3790_v39, 2  ;;  %v1791_v45 = vsel %vm1789_vm10, %v1790_v61, %v3898_v42  ;;  %v1926_v27 = vadd.f32 -0.4999988, %v1925_v19 }
 0x61a   :  { %v2067_v9 = vand.u32 2147483647, %v2066_v18  ;;  %v2069_v41 = vcvt.s32.f32 %v2062_v14  ;;  %v2197_v40 = vmul.u32 %v3810_v31, %v2143_v12  ;;  %v1792_v55 = vsel %vm1785_vm12, %v1788_v48, %v1791_v45 }
 0x61b   :  { %v1936_v38 = vmul.f32 %v1935_v33, %v3857_v47  ;;  %v2201_v7 = vsel %vm2199_vm9, %v2200_v13, %v2196_v43  ;;  %v1793_v57 = vsel %vm1782_vm5, nan, %v1792_v55  ;;  %v1927_v49 = vmul.f32 %v1926_v27, %v3865_v17 }
 0x61c   :  { %v2070_v8 = vmul.f32 %v2069_v41, %v2067_v9  ;;  %v2202_v16 = vadd.s32 %v2201_v7, %v2197_v40  ;;  %v2259_v39 = vmul.f32 %v1793_v57, %v3054_v28  ;;  %v1939_v6 = vand.u32 3, %v1938_v53 }
 0x61d   :  { %v1928_v42 = vadd.f32 1.0, %v1927_v49  ;;  %vm1951_vm11 = vcmp.lt.s32.totalorder %v3717_v20, 0  ;;  %v1942_v31 = vxor.u32 2147483648, %v1936_v38  ;;  %vm3963_vm7 = vcmp.le.f32.partialorder %v1949_v59, 0.7853982 }
 0x61e   :  { %v2071_v54 = vxor.u32 2147483648, %v2070_v8  ;;  %v2203_v3 = vadd.s32 536870912, %v2202_v16  ;;  %v2263_v10 = vadd.f32 %v2259_v39, %v3174_v37  ;;  %vm1941_vm1 = vcmp.eq.s32.totalorder %v1939_v6, 0 }
 0x61f   :  { %v1945_v47 = vxor.u32 2147483648, %v1928_v42  ;;  %v2073_v23 = vsub.s32 4, %v3887_v4  ;;  %v1943_v63 = vsel %vm1941_vm1, %v1928_v42, %v1942_v31  ;;  %vm1944_vm8 = vcmp.eq.s32.totalorder %v1939_v6, 2 }
 0x620   :  { %v2072_v17 = vsel %vm1951_vm11, %v2071_v54, %v2070_v8  ;;  %v3969_v12 = vshrl.u32 %v2203_v3, 30  ;;  %2387 = vmatmul.msk.f32.vlgmr.msrb.gmra.mxu3 %vm41_vm0, %v2263_v10  ;;  %vm1940_vm2 = vcmp.lt.s32.totalorder %v1939_v6, 2  ;;  %vm1937_vm3 = vweird.f32 %v3653_v21 }
 0x621   :  { %v2075_v36 = vsel %vm3963_vm7, %v3717_v20, %v2072_v17  ;;  %v1946_v56 = vsel %vm1944_vm8, %v1945_v47, %v1936_v38  ;;  %v2074_v58 = vsel %vm1951_vm11, %v2073_v23, %v3887_v4  ;;  %vm2092_vm6 = vweird.f32 %v3717_v20 }
 0x622   :  { %v2077_v59 = vmul.f32 %v2075_v36, %v2075_v36  ;;  %v2205_v33 = vshll.u32 %v3969_v12, 30  ;;  %v1947_v2 = vsel %vm1940_vm2, %v1943_v63, %v1946_v56  ;;  %v2076_v21 = vsel %vm3963_vm7, 0, %v2074_v58 }
 0x623   :  { %v1948_v5 = vsel %vm1937_vm3, nan, %v1947_v2  ;;  %vm2106_vm9 = vcmp.lt.s32.totalorder %v3740_v60, 0  ;;  %vm2105_vm10 = vcmp.le.f32.partialorder %v2104_v35, 0.7853982  ;;  %v2228_v20 = vsub.s32 4, %v3969_v12 }
 0x624   :  { %v2085_v34 = vmul.f32 -0.00019511016, %v2077_v59  ;;  %v2206_v24 = vsub.s32 %v2202_v16, %v2205_v33  ;;  %v2260_v62 = vmul.f32 %v1948_v5, %v3054_v28  ;;  %v2078_v52 = vmul.f32 -0.001358992, %v2077_v59 }
 0x625   :  { %v2093_v28 = vadd.s32 3, %v2076_v21  ;;  %vm2247_vm1 = vweird.f32 %v3740_v60 }
 0x626   :  { %v2086_v11 = vadd.f32 0.008332121, %v2085_v34  ;;  %vm2207_vm13 = vcmp.lt.s32.totalorder %v2206_v24, 0  ;;  %v2208_v1 = vsub.s32 0, %v2206_v24  ;;  %v2264_v25 = vadd.f32 %v2260_v62, %v3174_v37 }
 0x627   :  { %v2079_v44 = vadd.f32 0.041655596, %v2078_v52  ;;  %v2198_v37 = vadd.s32 %v3944_v29, %v3939_v32  ;;  %v2094_v45 = vand.u32 3, %v2093_v28 }
 0x628   :  { %v2087_v15 = vmul.f32 %v2086_v11, %v2077_v59  ;;  %v2209_v50 = vsel %vm2207_vm13, %v2208_v1, %v2206_v24  ;;  %2388 = vmatmul.msk.f32.gmra.mxu3 %vm41_vm0, %v2264_v25 }
 0x629   :  { %v2210_v22 = vclz %v2209_v50  ;;  %v2080_v46 = vmul.f32 %v2079_v44, %v2077_v59  ;;  %vm2096_vm15 = vcmp.eq.s32.totalorder %v2094_v45, 0  ;;  %vm2099_vm4 = vcmp.eq.s32.totalorder %v2094_v45, 2 }
 0x62a   :  { %v2088_v14 = vadd.f32 -0.16666654, %v2087_v15  ;;  %vm2095_vm5 = vcmp.lt.s32.totalorder %v2094_v45, 2 }
 0x62b   :  { %v2385_v4 = vadd.s32 4294967294, %v2210_v22  ;;  %v2081_v26 = vadd.f32 -0.4999988, %v2080_v46 }
 0x62c   :  { %v2089_v43 = vmul.f32 %v2088_v14, %v2077_v59  ;;  %v2418_v14 = vld [vmem:[#allocation2 + $0x158] ss:$0 sm:$0xff] }
 0x62d   :  { %vm2386_vm14 = vcmp.lt.s32.totalorder %v2385_v4, 0  ;;  %v2082_v48 = vmul.f32 %v2081_v26, %v2077_v59 }
 0x62e   :  { %v2090_v61 = vadd.f32 1.0, %v2089_v43  ;;  %v2213_v19 = vsel %vm2386_vm14, 0, %v2385_v4 }
 0x62f   :  { %v2214_v18 = vsub.s32 32, %v2213_v19  ;;  %v2218_v53 = vsub.s32 4294967266, %v2213_v19  ;;  %v2083_v13 = vadd.f32 1.0, %v2082_v48  ;;  %v2215_v9 = vshll.u32 %v2206_v24, %v2213_v19 }
 0x630   :  { %v2091_v27 = vmul.f32 %v2090_v61, %v2075_v36  ;;  %v2229_v36 = vsel %vm2106_vm9, %v2228_v20, %v3969_v12 }
 0x631   :  { %v2216_v41 = vshrl.u32 %v2198_v37, %v2214_v18  ;;  %v2219_v40 = vadd.s32 127, %v2218_v53  ;;  %v2100_v55 = vxor.u32 2147483648, %v2083_v13  ;;  %v2231_v56 = vsel %vm2105_vm10, 0, %v2229_v36 }
 0x632   :  { %v2097_v38 = vxor.u32 2147483648, %v2091_v27  ;;  %v2248_v5 = vadd.s32 3, %v2231_v56 }
 0x633   :  { %v2217_v7 = vor.u32 %v2216_v41, %v2215_v9  ;;  %v2220_v57 = vshll.u32 %v2219_v40, 23  ;;  %v2101_v8 = vsel %vm2099_vm4, %v2100_v55, %v2091_v27 }
 0x634   :  { %v2098_v49 = vsel %vm2096_vm15, %v2083_v13, %v2097_v38  ;;  %v2249_v11 = vand.u32 3, %v2248_v5 }
 0x635   :  { %v2221_v16 = vor.u32 4788187, %v2220_v57  ;;  %v2102_v32 = vsel %vm2095_vm5, %v2098_v49, %v2101_v8  ;;  %v2224_v6 = vcvt.s32.f32 %v2217_v7 }
 0x636   :  { %v2103_v29 = vsel %vm2092_vm6, nan, %v2102_v32  ;;  %vm2251_vm12 = vcmp.eq.s32.totalorder %v2249_v11, 0  ;;  %vm2254_vm11 = vcmp.eq.s32.totalorder %v2249_v11, 2  ;;  %vm2250_vm7 = vcmp.lt.s32.totalorder %v2249_v11, 2 }
 0x637   :  { %v2222_v39 = vand.u32 2147483647, %v2221_v16  ;;  %v2261_v42 = vmul.f32 %v2103_v29, %v3057_v30 }
 0x639   :  { %v2225_v54 = vmul.f32 %v2224_v6, %v2222_v39  ;;  %v2265_v3 = vadd.f32 %v2261_v42, %v3194_v51 }
 0x63b   :  { %v2226_v10 = vxor.u32 2147483648, %v2225_v54  ;;  %2389 = vmatmul.msk.f32.gmra.mxu3 %vm41_vm0, %v2265_v3 }
 0x63d   :  { %v2227_v31 = vsel %vm2106_vm9, %v2226_v10, %v2225_v54 }
 0x63e   :  { %v2230_v47 = vsel %vm2105_vm10, %v3740_v60, %v2227_v31 }
 0x63f   :  { %v2232_v0 = vmul.f32 %v2230_v47, %v2230_v47 }
 0x641   :  { %v2240_v17 = vmul.f32 -0.00019511016, %v2232_v0  ;;  %v2233_v23 = vmul.f32 -0.001358992, %v2232_v0 }
 0x643   :  { %v2241_v63 = vadd.f32 0.008332121, %v2240_v17  ;;  %v2234_v59 = vadd.f32 0.041655596, %v2233_v23 }
 0x645   :  { %v2242_v33 = vmul.f32 %v2241_v63, %v2232_v0  ;;  %v2235_v2 = vmul.f32 %v2234_v59, %v2232_v0 }
 0x647   :  { %v2243_v34 = vadd.f32 -0.16666654, %v2242_v33  ;;  %v2236_v24 = vadd.f32 -0.4999988, %v2235_v2 }
 0x649   :  { %v2244_v58 = vmul.f32 %v2243_v34, %v2232_v0  ;;  %v2237_v35 = vmul.f32 %v2236_v24, %v2232_v0 }
 0x64b   :  { %v2245_v62 = vadd.f32 1.0, %v2244_v58  ;;  %v2238_v52 = vadd.f32 1.0, %v2237_v35 }
 0x64d   :  { %v2246_v1 = vmul.f32 %v2245_v62, %v2230_v47  ;;  %v2255_v25 = vxor.u32 2147483648, %v2238_v52 }
 0x64f   :  { %v2252_v44 = vxor.u32 2147483648, %v2246_v1  ;;  %v2256_v15 = vsel %vm2254_vm11, %v2255_v25, %v2246_v1 }
 0x651   :  { %v2253_v12 = vsel %vm2251_vm12, %v2238_v52, %v2252_v44 }
 0x652   :  { %v2257_v50 = vsel %vm2250_vm7, %v2253_v12, %v2256_v15 }
 0x653   :  { %v2258_v21 = vsel %vm2247_vm1, nan, %v2257_v50 }
 0x654   :  { %v2262_v22 = vmul.f32 %v2258_v21, %v3057_v30 }
 0x656   :  { %v2266_v46 = vadd.f32 %v2262_v22, %v3194_v51 }
 0x658   :  { %2390 = vmatmul.msk.f32.gmra.mxu3 %vm41_vm0, %v2266_v46 }
 0x6a3   :  { %v2302_v4 = vpop.f32.mrf.mxu3 }
 0x6a4   :  { %v2303_v26 = vadd.f32 %v2418_v14, %v2302_v4 }
 0x6a6   :  { %2314 = vst [vmem:[#allocation5] sm:$0xff] %v2303_v26 }
 0x6ab   :  { %v2305_v28 = vpop.f32.mrf.mxu3 }
 0x6ac   :  { %v2306_v43 = vadd.f32 %v2418_v14, %v2305_v28 }
 0x6ae   :  { %2315 = vst [vmem:[#allocation5 + $0x8] sm:$0xff] %v2306_v43 }
 0x6be   :  { %v2308_v48 = vpop.f32.mrf.mxu3 }
 0x6bf   :  { %v2309_v61 = vadd.f32 %v2418_v14, %v2308_v48 }
 0x6c1   :  { %2316 = vst [vmem:[#allocation5 + $0x10] sm:$0xff] %v2309_v61 }
 0x6db   :  { %v2311_v30 = vpop.f32.mrf.mxu3 }
 0x6dc   :  { %v2312_v51 = vadd.f32 %v2418_v14, %v2311_v30 }
 0x6de   :  { %2317 = vst [vmem:[#allocation5 + $0x18] sm:$0xff] %v2312_v51 }
 0x6df   :  { %2330 = dma.vmem_to_hbm [thread:$0]  %s2323_s8, 640, %s2325_s11, [#allocation4], %s2474_s20, %s2474_s20, %s2475_s21  }
 0x6e0   :  { %2471 = dma.done.wait [#allocation4], 640  }
 0x6e1   :  { %2472 = vsyncadd [#allocation4], 4294966656 }
 0x6e2   :  { %2335 = vsyncpa [#allocation3], 1 }
 0x6e3   :  { %2336 = vsyncpa [#allocation4], 1 }

</bundles_post_ra>
